<compile_context>
chip_gen: v6e
topology: v6e:2x2x1
jax: 0.10.0
libtpu: 0.0.40
codegen_flags: <defaults>
</compile_context>

<pallas_src>
import jax
import jax.numpy as jnp
from jax import lax
from jax.experimental import pallas as pl
from jax.experimental.pallas import tpu as pltpu

# ----------------------------- hyper parameters -----------------------------
VOCAB = 16
WORDEMB_SIZE = 32
POS_TAG_NUM = 8
POS_TAG_SIZE = 16
HIDDEN_SIZE = 32          # bi-LSTM output size (HIDDEN_SIZE // 2 per direction)
GCN_LAYER = 2
NUM_TAGS = 4
B = 2
T = 8
DIN = WORDEMB_SIZE + POS_TAG_SIZE
H_DIR = HIDDEN_SIZE // 2  # per-direction hidden size
G4 = 4 * H_DIR            # gate width per direction (i,f,g,o)


# ----------------------------- fused forward kernel -------------------------
def segment_fused_kernel(x_ref, m_ref, wih_ref, whh_ref, b_ref,
                         bigg_ref, gw_ref, gb_ref, tw_ref, tb_ref,
                         trans_ref, start_ref, stop_ref,
                         out_ref, rnn_scr):
    """Whole Segment_Model forward in one kernel.

    x_ref:    [T*B, Din]   time-major-flat masked inputs (row = t*B + b)
    m_ref:    [T*B, 1]     float mask (time-major-flat)
    wih_ref:  [Din, 2*G4]  fused W_ih (fwd gates | bwd gates), 128 lanes wide
    whh_ref:  [2*Hd, 2*G4] block-diagonal fused W_hh
    b_ref:    [1, 2*G4]    fused b_ih + b_hh for both directions
    bigg_ref: [T*B, T*B]   graph expanded to a batch-block matrix
    gw_ref:   [L, H, H]    GCN weights;   gb_ref: [L, 1, H] GCN biases
    tw_ref:   [H, K]       tagger weight; tb_ref: [1, K]   tagger bias
    trans_ref:[K, K]       CRF transitions (trans[j,k] = j->k)
    start_ref/stop_ref: [1, K]
    out_ref:  [B, T] int32 decoded tag sequence
    rnn_scr:  [T*B, H] VMEM scratch for bi-LSTM outputs
    """
    # -------- Bi-LSTM: hoisted input projection + fused-direction recurrence --------
    gx = jnp.dot(x_ref[...], wih_ref[...],
                 preferred_element_type=jnp.float32) + b_ref[...]      # [T*B, 2*G4]
    m_all = m_ref[...]                                                 # [T*B, 1]
    whh = whh_ref[...]                                                 # [2*Hd, 2*G4]

    h_f = jnp.zeros((B, H_DIR), jnp.float32)
    c_f = jnp.zeros((B, H_DIR), jnp.float32)
    h_b = jnp.zeros((B, H_DIR), jnp.float32)
    c_b = jnp.zeros((B, H_DIR), jnp.float32)

    def lstm_cell(gates, h, c, m):
        # PyTorch gate order: i, f, g, o
        i_g = jax.nn.sigmoid(gates[:, 0:H_DIR])
        f_g = jax.nn.sigmoid(gates[:, H_DIR:2 * H_DIR])
        g_g = jnp.tanh(gates[:, 2 * H_DIR:3 * H_DIR])
        o_g = jax.nn.sigmoid(gates[:, 3 * H_DIR:4 * H_DIR])
        c_new = f_g * c + i_g * g_g
        h_new = o_g * jnp.tanh(c_new)
        keep = 1.0 - m
        # pack/pad_packed semantics: state frozen, output zero at padded steps.
        return m * h_new + keep * h, m * c_new + keep * c, m * h_new

    for s in range(T):                      # fully unrolled: static slices, LLO visibility
        sb = T - 1 - s                      # backward-direction time index
        h_cat = jnp.concatenate([h_f, h_b], axis=1)                    # [B, 2*Hd]
        gh = jnp.dot(h_cat, whh, preferred_element_type=jnp.float32)   # [B, 2*G4]
        g_f = gh[:, 0:G4] + gx[s * B:(s + 1) * B, 0:G4]
        g_b = gh[:, G4:2 * G4] + gx[sb * B:(sb + 1) * B, G4:2 * G4]
        m_f = m_all[s * B:(s + 1) * B, :]
        m_b = m_all[sb * B:(sb + 1) * B, :]
        h_f, c_f, o_f = lstm_cell(g_f, h_f, c_f, m_f)
        h_b, c_b, o_b = lstm_cell(g_b, h_b, c_b, m_b)
        rnn_scr[s * B:(s + 1) * B, 0:H_DIR] = o_f
        rnn_scr[sb * B:(sb + 1) * B, H_DIR:HIDDEN_SIZE] = o_b

    # -------- GCN stack + tagger on flat time-major [T*B, H] --------
    # TODO(synk): GCN internals not given; assumed canonical relu(W @ (A h) + b).
    h = rnn_scr[...]                                                   # [T*B, H]
    bigg = bigg_ref[...]                                               # [T*B, T*B]
    for l in range(GCN_LAYER):
        ax = jnp.dot(bigg, h, preferred_element_type=jnp.float32)      # graph aggregation
        h = jnp.maximum(
            jnp.dot(ax, gw_ref[l], preferred_element_type=jnp.float32) + gb_ref[l],
            0.0)
    feats = jnp.dot(h, tw_ref[...],
                    preferred_element_type=jnp.float32) + tb_ref[...]  # [T*B, K]

    # -------- CRF Viterbi decode (DP + in-kernel backtrace) --------
    # TODO(synk): CRF_Layer internals not given; assumed standard linear-chain CRF
    # with start/stop transitions; mask not applied in decode (matches forward()).
    trans = trans_ref[...]                                             # [K, K]
    dp = start_ref[...] + feats[0:B, :]                                # [B, K]
    bps = []
    for t in range(1, T):                                              # unrolled (T=8)
        best = jnp.full((B, NUM_TAGS), -1e30, jnp.float32)
        besti = jnp.zeros((B, NUM_TAGS), jnp.int32)
        for j in range(NUM_TAGS):                                      # unrolled (K=4)
            cand = dp[:, j:j + 1] + trans[j:j + 1, :]                  # [B, K]
            upd = cand > best
            best = jnp.where(upd, cand, best)
            besti = jnp.where(upd, jnp.int32(j), besti)
        dp = best + feats[t * B:(t + 1) * B, :]
        bps.append(besti)
    dp = dp + stop_ref[...]

    lane = lax.broadcasted_iota(jnp.int32, (B, NUM_TAGS), 1)
    lane_f = lane.astype(jnp.float32)
    best_val = jnp.max(dp, axis=1, keepdims=True)
    last = jnp.min(jnp.where(dp == best_val, lane_f, jnp.float32(NUM_TAGS)),
                   axis=1, keepdims=True).astype(jnp.int32)            # [B, 1] argmax
    out_ref[:, T - 1:T] = last
    for t in range(T - 1, 0, -1):
        sel = lane == last
        picked = jnp.sum(jnp.where(sel, bps[t - 1].astype(jnp.float32), 0.0),
                         axis=1, keepdims=True)
        last = picked.astype(jnp.int32)
        out_ref[:, t - 1:t] = last


def segment_fused(x2d, m2d, wih, whh, bias, bigg, gw, gb, tw, tb, trans, start, stop):
    return pl.pallas_call(
        segment_fused_kernel,
        out_shape=jax.ShapeDtypeStruct((B, T), jnp.int32),
        scratch_shapes=[pltpu.VMEM((T * B, HIDDEN_SIZE), jnp.float32)],
    )(x2d, m2d, wih, whh, bias, bigg, gw, gb, tw, tb, trans, start, stop)


# ----------------------------- model forward (glue + kernel) ----------------
@jax.jit
def segment_model_forward(params, word_ids, pos_ids, graph, masks):
    # Embedding lookups (glue).
    w_emb = jnp.take(params['word_emb'], word_ids, axis=0)             # [B,T,We]
    p_emb = jnp.take(params['pos_emb'], pos_ids, axis=0)               # [B,T,Pe]
    rnn_in = jnp.concatenate([w_emb, p_emb], axis=-1)                  # [B,T,Din]
    maskf = masks.astype(jnp.float32)
    rnn_in = rnn_in * maskf[:, :, None]

    # Time-major flat views feeding the fused kernel (row = t*B + b).
    x2d = jnp.transpose(rnn_in, (1, 0, 2)).reshape(T * B, DIN)
    m2d = jnp.transpose(maskf, (1, 0)).reshape(T * B, 1)

    # Fuse both LSTM directions into one 128-lane-wide gate matmul.
    wih = jnp.concatenate([params['wih_f'], params['wih_b']], axis=1)  # [Din, 2*G4]
    whh = jnp.zeros((2 * H_DIR, 2 * G4), jnp.float32)
    whh = whh.at[:H_DIR, :G4].set(params['whh_f'])
    whh = whh.at[H_DIR:, G4:].set(params['whh_b'])                     # block-diagonal
    bias = jnp.concatenate([params['b_f'], params['b_b']], axis=1)     # [1, 2*G4]

    # Expand graph to a [T*B, T*B] block matrix so the GCN aggregation over the
    # whole batch is a single 2-D matmul on the flat time-major activations.
    bigg = jnp.einsum('btk,bc->tbkc', graph, jnp.eye(B, dtype=graph.dtype))
    bigg = bigg.reshape(T * B, T * B)

    return segment_fused(x2d, m2d, wih, whh, bias, bigg,
                         params['gcn_w'], params['gcn_b'],
                         params['tag_w'], params['tag_b'],
                         params['crf_trans'], params['crf_start'],
                         params['crf_stop'])


# ----------------------------- parameter init --------------------------------
def init_params(key):
    ks = jax.random.split(key, 16)
    s = 0.1
    params = {
        'word_emb': s * jax.random.normal(ks[0], (VOCAB, WORDEMB_SIZE), jnp.float32),
        'pos_emb': s * jax.random.normal(ks[1], (POS_TAG_NUM, POS_TAG_SIZE), jnp.float32),
        'wih_f': s * jax.random.normal(ks[2], (DIN, G4), jnp.float32),
        'whh_f': s * jax.random.normal(ks[3], (H_DIR, G4), jnp.float32),
        'b_f': s * jax.random.normal(ks[4], (1, G4), jnp.float32),
        'wih_b': s * jax.random.normal(ks[5], (DIN, G4), jnp.float32),
        'whh_b': s * jax.random.normal(ks[6], (H_DIR, G4), jnp.float32),
        'b_b': s * jax.random.normal(ks[7], (1, G4), jnp.float32),
        'gcn_w': s * jax.random.normal(ks[8], (GCN_LAYER, HIDDEN_SIZE, HIDDEN_SIZE), jnp.float32),
        'gcn_b': s * jax.random.normal(ks[9], (GCN_LAYER, 1, HIDDEN_SIZE), jnp.float32),
        'tag_w': s * jax.random.normal(ks[10], (HIDDEN_SIZE, NUM_TAGS), jnp.float32),
        'tag_b': s * jax.random.normal(ks[11], (1, NUM_TAGS), jnp.float32),
        'crf_trans': s * jax.random.normal(ks[12], (NUM_TAGS, NUM_TAGS), jnp.float32),
        'crf_start': s * jax.random.normal(ks[13], (1, NUM_TAGS), jnp.float32),
        'crf_stop': s * jax.random.normal(ks[14], (1, NUM_TAGS), jnp.float32),
    }
    return params


# ----------------------------- main ------------------------------------------
if __name__ == "__main__":
    key = jax.random.PRNGKey(0)
    k_in, k_par = jax.random.split(key)
    kw, kp, kg = jax.random.split(k_in, 3)

    word_ids = jax.random.randint(kw, (B, T), 0, VOCAB, dtype=jnp.int32)
    pos_ids = jax.random.randint(kp, (B, T), 0, POS_TAG_NUM, dtype=jnp.int32)

    # Descending lengths (pack_padded_sequence requires sorted-by-length input).
    lengths = jnp.array([T, T - 2], dtype=jnp.int32)
    masks = (jnp.arange(T)[None, :] < lengths[:, None]).astype(jnp.int32)   # [B,T]

    # Simple symmetric adjacency with self loops, row-normalized, zeroed at pads.
    adj = (jax.random.uniform(kg, (B, T, T)) > 0.6).astype(jnp.float32)
    adj = adj + jnp.transpose(adj, (0, 2, 1)) + jnp.eye(T)[None]
    adj = jnp.minimum(adj, 1.0)
    mf = masks.astype(jnp.float32)
    adj = adj * mf[:, :, None] * mf[:, None, :]
    graph = adj / jnp.maximum(adj.sum(-1, keepdims=True), 1.0)

    params = init_params(k_par)

    tag_seq = segment_model_forward(params, word_ids, pos_ids, graph, masks)
    tag_seq = jax.block_until_ready(tag_seq)
    assert tag_seq.shape == (B, T)
    assert bool(jnp.all((tag_seq >= 0) & (tag_seq < NUM_TAGS)))
    print("KERNEL_OK")
</pallas_src>

<mosaic_0001>
module attributes {stable_mosaic.version = 11 : i64} {
  func.func @segment_fused_kernel(%arg0: memref<16x48xf32, #tpu.memory_space<vmem>>, %arg1: memref<16x1xf32, #tpu.memory_space<vmem>>, %arg2: memref<48x128xf32, #tpu.memory_space<vmem>>, %arg3: memref<32x128xf32, #tpu.memory_space<vmem>>, %arg4: memref<1x128xf32, #tpu.memory_space<vmem>>, %arg5: memref<16x16xf32, #tpu.memory_space<vmem>>, %arg6: memref<2x32x32xf32, #tpu.memory_space<vmem>>, %arg7: memref<2x1x32xf32, #tpu.memory_space<vmem>>, %arg8: memref<32x4xf32, #tpu.memory_space<vmem>>, %arg9: memref<1x4xf32, #tpu.memory_space<vmem>>, %arg10: memref<4x4xf32, #tpu.memory_space<vmem>>, %arg11: memref<1x4xf32, #tpu.memory_space<vmem>>, %arg12: memref<1x4xf32, #tpu.memory_space<vmem>>, %arg13: memref<2x8xi32, #tpu.memory_space<vmem>>, %arg14: memref<16x32xf32, #tpu.memory_space<vmem>>) attributes {dimension_semantics = [], scalar_prefetch = 0 : i64, scratch_operands = 1 : i64, tpu.core_type = #tpu.core_type<tc>} {
    %c0 = arith.constant 0 : index
    %c0_0 = arith.constant 0 : index
    %0 = vector.load %arg0[%c0, %c0_0] : memref<16x48xf32, #tpu.memory_space<vmem>>, vector<16x48xf32>
    %c0_1 = arith.constant 0 : index
    %c0_2 = arith.constant 0 : index
    %1 = vector.load %arg2[%c0_1, %c0_2] : memref<48x128xf32, #tpu.memory_space<vmem>>, vector<48x128xf32>
    %cst = arith.constant dense<0.000000e+00> : vector<16x128xf32>
    %2 = tpu.matmul %0, %1, %cst {dimension_numbers = #tpu.dot_dimension_numbers<[1], [0], [0], [1], [0, 0, 1, 1], [], []>} : vector<16x48xf32>, vector<48x128xf32>, vector<16x128xf32> -> vector<16x128xf32>
    %c0_3 = arith.constant 0 : index
    %c0_4 = arith.constant 0 : index
    %3 = vector.load %arg4[%c0_3, %c0_4] : memref<1x128xf32, #tpu.memory_space<vmem>>, vector<1x128xf32>
    %4 = vector.broadcast %3 : vector<1x128xf32> to vector<16x128xf32>
    %5 = arith.addf %2, %4 : vector<16x128xf32>
    %c0_5 = arith.constant 0 : index
    %c0_6 = arith.constant 0 : index
    %6 = vector.load %arg1[%c0_5, %c0_6] : memref<16x1xf32, #tpu.memory_space<vmem>>, vector<16x1xf32>
    %c0_7 = arith.constant 0 : index
    %c0_8 = arith.constant 0 : index
    %7 = vector.load %arg3[%c0_7, %c0_8] : memref<32x128xf32, #tpu.memory_space<vmem>>, vector<32x128xf32>
    %cst_9 = arith.constant 0.000000e+00 : f32
    %8 = vector.broadcast %cst_9 : f32 to vector<2x16xf32>
    %cst_10 = arith.constant 0.000000e+00 : f32
    %9 = vector.broadcast %cst_10 : f32 to vector<2x16xf32>
    %cst_11 = arith.constant 0.000000e+00 : f32
    %10 = vector.broadcast %cst_11 : f32 to vector<2x16xf32>
    %cst_12 = arith.constant 0.000000e+00 : f32
    %11 = vector.broadcast %cst_12 : f32 to vector<2x16xf32>
    %12 = tpu.concatenate %8, %10 in 1 : vector<2x16xf32>, vector<2x16xf32> -> vector<2x32xf32>
    %cst_13 = arith.constant dense<0.000000e+00> : vector<2x128xf32>
    %13 = tpu.matmul %12, %7, %cst_13 {dimension_numbers = #tpu.dot_dimension_numbers<[1], [0], [0], [1], [0, 0, 1, 1], [], []>} : vector<2x32xf32>, vector<32x128xf32>, vector<2x128xf32> -> vector<2x128xf32>
    %14 = vector.extract_strided_slice %13 {offsets = [0, 0], sizes = [2, 64], strides = [1, 1]} : vector<2x128xf32> to vector<2x64xf32>
    %15 = vector.extract_strided_slice %5 {offsets = [0, 0], sizes = [2, 64], strides = [1, 1]} : vector<16x128xf32> to vector<2x64xf32>
    %16 = arith.addf %14, %15 : vector<2x64xf32>
    %17 = vector.extract_strided_slice %13 {offsets = [0, 64], sizes = [2, 64], strides = [1, 1]} : vector<2x128xf32> to vector<2x64xf32>
    %18 = vector.extract_strided_slice %5 {offsets = [14, 64], sizes = [2, 64], strides = [1, 1]} : vector<16x128xf32> to vector<2x64xf32>
    %19 = arith.addf %17, %18 : vector<2x64xf32>
    %20 = vector.extract_strided_slice %6 {offsets = [0, 0], sizes = [2, 1], strides = [1, 1]} : vector<16x1xf32> to vector<2x1xf32>
    %21 = vector.extract_strided_slice %6 {offsets = [14, 0], sizes = [2, 1], strides = [1, 1]} : vector<16x1xf32> to vector<2x1xf32>
    %22 = vector.extract_strided_slice %16 {offsets = [0, 0], sizes = [2, 16], strides = [1, 1]} : vector<2x64xf32> to vector<2x16xf32>
    %23 = arith.negf %22 : vector<2x16xf32>
    %24 = math.exp %23 : vector<2x16xf32>
    %cst_14 = arith.constant 1.000000e+00 : f32
    %25 = vector.broadcast %cst_14 : f32 to vector<2x16xf32>
    %26 = arith.addf %25, %24 : vector<2x16xf32>
    %27 = arith.divf %25, %26 : vector<2x16xf32>
    %28 = vector.extract_strided_slice %16 {offsets = [0, 16], sizes = [2, 16], strides = [1, 1]} : vector<2x64xf32> to vector<2x16xf32>
    %29 = arith.negf %28 : vector<2x16xf32>
    %30 = math.exp %29 : vector<2x16xf32>
    %cst_15 = arith.constant 1.000000e+00 : f32
    %31 = vector.broadcast %cst_15 : f32 to vector<2x16xf32>
    %32 = arith.addf %31, %30 : vector<2x16xf32>
    %33 = arith.divf %31, %32 : vector<2x16xf32>
    %34 = vector.extract_strided_slice %16 {offsets = [0, 32], sizes = [2, 16], strides = [1, 1]} : vector<2x64xf32> to vector<2x16xf32>
    %35 = math.tanh %34 : vector<2x16xf32>
    %36 = vector.extract_strided_slice %16 {offsets = [0, 48], sizes = [2, 16], strides = [1, 1]} : vector<2x64xf32> to vector<2x16xf32>
    %37 = arith.negf %36 : vector<2x16xf32>
    %38 = math.exp %37 : vector<2x16xf32>
    %cst_16 = arith.constant 1.000000e+00 : f32
    %39 = vector.broadcast %cst_16 : f32 to vector<2x16xf32>
    %40 = arith.addf %39, %38 : vector<2x16xf32>
    %41 = arith.divf %39, %40 : vector<2x16xf32>
    %42 = arith.mulf %33, %9 : vector<2x16xf32>
    %43 = arith.mulf %27, %35 : vector<2x16xf32>
    %44 = arith.addf %42, %43 : vector<2x16xf32>
    %45 = math.tanh %44 : vector<2x16xf32>
    %46 = arith.mulf %41, %45 : vector<2x16xf32>
    %cst_17 = arith.constant 1.000000e+00 : f32
    %47 = vector.broadcast %cst_17 : f32 to vector<2x1xf32>
    %48 = arith.subf %47, %20 : vector<2x1xf32>
    %49 = vector.broadcast %20 : vector<2x1xf32> to vector<2x16xf32>
    %50 = arith.mulf %49, %46 : vector<2x16xf32>
    %51 = vector.broadcast %48 : vector<2x1xf32> to vector<2x16xf32>
    %52 = arith.mulf %51, %8 : vector<2x16xf32>
    %53 = arith.addf %50, %52 : vector<2x16xf32>
    %54 = vector.broadcast %20 : vector<2x1xf32> to vector<2x16xf32>
    %55 = arith.mulf %54, %44 : vector<2x16xf32>
    %56 = vector.broadcast %48 : vector<2x1xf32> to vector<2x16xf32>
    %57 = arith.mulf %56, %9 : vector<2x16xf32>
    %58 = arith.addf %55, %57 : vector<2x16xf32>
    %59 = vector.broadcast %20 : vector<2x1xf32> to vector<2x16xf32>
    %60 = arith.mulf %59, %46 : vector<2x16xf32>
    %61 = vector.extract_strided_slice %19 {offsets = [0, 0], sizes = [2, 16], strides = [1, 1]} : vector<2x64xf32> to vector<2x16xf32>
    %62 = arith.negf %61 : vector<2x16xf32>
    %63 = math.exp %62 : vector<2x16xf32>
    %cst_18 = arith.constant 1.000000e+00 : f32
    %64 = vector.broadcast %cst_18 : f32 to vector<2x16xf32>
    %65 = arith.addf %64, %63 : vector<2x16xf32>
    %66 = arith.divf %64, %65 : vector<2x16xf32>
    %67 = vector.extract_strided_slice %19 {offsets = [0, 16], sizes = [2, 16], strides = [1, 1]} : vector<2x64xf32> to vector<2x16xf32>
    %68 = arith.negf %67 : vector<2x16xf32>
    %69 = math.exp %68 : vector<2x16xf32>
    %cst_19 = arith.constant 1.000000e+00 : f32
    %70 = vector.broadcast %cst_19 : f32 to vector<2x16xf32>
    %71 = arith.addf %70, %69 : vector<2x16xf32>
    %72 = arith.divf %70, %71 : vector<2x16xf32>
    %73 = vector.extract_strided_slice %19 {offsets = [0, 32], sizes = [2, 16], strides = [1, 1]} : vector<2x64xf32> to vector<2x16xf32>
    %74 = math.tanh %73 : vector<2x16xf32>
    %75 = vector.extract_strided_slice %19 {offsets = [0, 48], sizes = [2, 16], strides = [1, 1]} : vector<2x64xf32> to vector<2x16xf32>
    %76 = arith.negf %75 : vector<2x16xf32>
    %77 = math.exp %76 : vector<2x16xf32>
    %cst_20 = arith.constant 1.000000e+00 : f32
    %78 = vector.broadcast %cst_20 : f32 to vector<2x16xf32>
    %79 = arith.addf %78, %77 : vector<2x16xf32>
    %80 = arith.divf %78, %79 : vector<2x16xf32>
    %81 = arith.mulf %72, %11 : vector<2x16xf32>
    %82 = arith.mulf %66, %74 : vector<2x16xf32>
    %83 = arith.addf %81, %82 : vector<2x16xf32>
    %84 = math.tanh %83 : vector<2x16xf32>
    %85 = arith.mulf %80, %84 : vector<2x16xf32>
    %cst_21 = arith.constant 1.000000e+00 : f32
    %86 = vector.broadcast %cst_21 : f32 to vector<2x1xf32>
    %87 = arith.subf %86, %21 : vector<2x1xf32>
    %88 = vector.broadcast %21 : vector<2x1xf32> to vector<2x16xf32>
    %89 = arith.mulf %88, %85 : vector<2x16xf32>
    %90 = vector.broadcast %87 : vector<2x1xf32> to vector<2x16xf32>
    %91 = arith.mulf %90, %10 : vector<2x16xf32>
    %92 = arith.addf %89, %91 : vector<2x16xf32>
    %93 = vector.broadcast %21 : vector<2x1xf32> to vector<2x16xf32>
    %94 = arith.mulf %93, %83 : vector<2x16xf32>
    %95 = vector.broadcast %87 : vector<2x1xf32> to vector<2x16xf32>
    %96 = arith.mulf %95, %11 : vector<2x16xf32>
    %97 = arith.addf %94, %96 : vector<2x16xf32>
    %98 = vector.broadcast %21 : vector<2x1xf32> to vector<2x16xf32>
    %99 = arith.mulf %98, %85 : vector<2x16xf32>
    %c0_22 = arith.constant 0 : index
    %c0_23 = arith.constant 0 : index
    %100 = vector.load %arg14[%c0_22, %c0_23] : memref<16x32xf32, #tpu.memory_space<vmem>>, vector<2x16xf32>
    tpu.vector_store %arg14[%c0_22, %c0_23], %60 {strides = array<i32>} : memref<16x32xf32, #tpu.memory_space<vmem>>, vector<2x16xf32>,
    %c14 = arith.constant 14 : index
    %c16 = arith.constant 16 : index
    %101 = vector.load %arg14[%c14, %c16] : memref<16x32xf32, #tpu.memory_space<vmem>>, vector<2x16xf32>
    tpu.vector_store %arg14[%c14, %c16], %99 {strides = array<i32>} : memref<16x32xf32, #tpu.memory_space<vmem>>, vector<2x16xf32>,
    %102 = tpu.concatenate %53, %92 in 1 : vector<2x16xf32>, vector<2x16xf32> -> vector<2x32xf32>
    %cst_24 = arith.constant dense<0.000000e+00> : vector<2x128xf32>
    %103 = tpu.matmul %102, %7, %cst_24 {dimension_numbers = #tpu.dot_dimension_numbers<[1], [0], [0], [1], [0, 0, 1, 1], [], []>} : vector<2x32xf32>, vector<32x128xf32>, vector<2x128xf32> -> vector<2x128xf32>
    %104 = vector.extract_strided_slice %103 {offsets = [0, 0], sizes = [2, 64], strides = [1, 1]} : vector<2x128xf32> to vector<2x64xf32>
    %105 = vector.extract_strided_slice %5 {offsets = [2, 0], sizes = [2, 64], strides = [1, 1]} : vector<16x128xf32> to vector<2x64xf32>
    %106 = arith.addf %104, %105 : vector<2x64xf32>
    %107 = vector.extract_strided_slice %103 {offsets = [0, 64], sizes = [2, 64], strides = [1, 1]} : vector<2x128xf32> to vector<2x64xf32>
    %108 = vector.extract_strided_slice %5 {offsets = [12, 64], sizes = [2, 64], strides = [1, 1]} : vector<16x128xf32> to vector<2x64xf32>
    %109 = arith.addf %107, %108 : vector<2x64xf32>
    %110 = vector.extract_strided_slice %6 {offsets = [2, 0], sizes = [2, 1], strides = [1, 1]} : vector<16x1xf32> to vector<2x1xf32>
    %111 = vector.extract_strided_slice %6 {offsets = [12, 0], sizes = [2, 1], strides = [1, 1]} : vector<16x1xf32> to vector<2x1xf32>
    %112 = vector.extract_strided_slice %106 {offsets = [0, 0], sizes = [2, 16], strides = [1, 1]} : vector<2x64xf32> to vector<2x16xf32>
    %113 = arith.negf %112 : vector<2x16xf32>
    %114 = math.exp %113 : vector<2x16xf32>
    %cst_25 = arith.constant 1.000000e+00 : f32
    %115 = vector.broadcast %cst_25 : f32 to vector<2x16xf32>
    %116 = arith.addf %115, %114 : vector<2x16xf32>
    %117 = arith.divf %115, %116 : vector<2x16xf32>
    %118 = vector.extract_strided_slice %106 {offsets = [0, 16], sizes = [2, 16], strides = [1, 1]} : vector<2x64xf32> to vector<2x16xf32>
    %119 = arith.negf %118 : vector<2x16xf32>
    %120 = math.exp %119 : vector<2x16xf32>
    %cst_26 = arith.constant 1.000000e+00 : f32
    %121 = vector.broadcast %cst_26 : f32 to vector<2x16xf32>
    %122 = arith.addf %121, %120 : vector<2x16xf32>
    %123 = arith.divf %121, %122 : vector<2x16xf32>
    %124 = vector.extract_strided_slice %106 {offsets = [0, 32], sizes = [2, 16], strides = [1, 1]} : vector<2x64xf32> to vector<2x16xf32>
    %125 = math.tanh %124 : vector<2x16xf32>
    %126 = vector.extract_strided_slice %106 {offsets = [0, 48], sizes = [2, 16], strides = [1, 1]} : vector<2x64xf32> to vector<2x16xf32>
    %127 = arith.negf %126 : vector<2x16xf32>
    %128 = math.exp %127 : vector<2x16xf32>
    %cst_27 = arith.constant 1.000000e+00 : f32
    %129 = vector.broadcast %cst_27 : f32 to vector<2x16xf32>
    %130 = arith.addf %129, %128 : vector<2x16xf32>
    %131 = arith.divf %129, %130 : vector<2x16xf32>
    %132 = arith.mulf %123, %58 : vector<2x16xf32>
    %133 = arith.mulf %117, %125 : vector<2x16xf32>
    %134 = arith.addf %132, %133 : vector<2x16xf32>
    %135 = math.tanh %134 : vector<2x16xf32>
    %136 = arith.mulf %131, %135 : vector<2x16xf32>
    %cst_28 = arith.constant 1.000000e+00 : f32
    %137 = vector.broadcast %cst_28 : f32 to vector<2x1xf32>
    %138 = arith.subf %137, %110 : vector<2x1xf32>
    %139 = vector.broadcast %110 : vector<2x1xf32> to vector<2x16xf32>
    %140 = arith.mulf %139, %136 : vector<2x16xf32>
    %141 = vector.broadcast %138 : vector<2x1xf32> to vector<2x16xf32>
    %142 = arith.mulf %141, %53 : vector<2x16xf32>
    %143 = arith.addf %140, %142 : vector<2x16xf32>
    %144 = vector.broadcast %110 : vector<2x1xf32> to vector<2x16xf32>
    %145 = arith.mulf %144, %134 : vector<2x16xf32>
    %146 = vector.broadcast %138 : vector<2x1xf32> to vector<2x16xf32>
    %147 = arith.mulf %146, %58 : vector<2x16xf32>
    %148 = arith.addf %145, %147 : vector<2x16xf32>
    %149 = vector.broadcast %110 : vector<2x1xf32> to vector<2x16xf32>
    %150 = arith.mulf %149, %136 : vector<2x16xf32>
    %151 = vector.extract_strided_slice %109 {offsets = [0, 0], sizes = [2, 16], strides = [1, 1]} : vector<2x64xf32> to vector<2x16xf32>
    %152 = arith.negf %151 : vector<2x16xf32>
    %153 = math.exp %152 : vector<2x16xf32>
    %cst_29 = arith.constant 1.000000e+00 : f32
    %154 = vector.broadcast %cst_29 : f32 to vector<2x16xf32>
    %155 = arith.addf %154, %153 : vector<2x16xf32>
    %156 = arith.divf %154, %155 : vector<2x16xf32>
    %157 = vector.extract_strided_slice %109 {offsets = [0, 16], sizes = [2, 16], strides = [1, 1]} : vector<2x64xf32> to vector<2x16xf32>
    %158 = arith.negf %157 : vector<2x16xf32>
    %159 = math.exp %158 : vector<2x16xf32>
    %cst_30 = arith.constant 1.000000e+00 : f32
    %160 = vector.broadcast %cst_30 : f32 to vector<2x16xf32>
    %161 = arith.addf %160, %159 : vector<2x16xf32>
    %162 = arith.divf %160, %161 : vector<2x16xf32>
    %163 = vector.extract_strided_slice %109 {offsets = [0, 32], sizes = [2, 16], strides = [1, 1]} : vector<2x64xf32> to vector<2x16xf32>
    %164 = math.tanh %163 : vector<2x16xf32>
    %165 = vector.extract_strided_slice %109 {offsets = [0, 48], sizes = [2, 16], strides = [1, 1]} : vector<2x64xf32> to vector<2x16xf32>
    %166 = arith.negf %165 : vector<2x16xf32>
    %167 = math.exp %166 : vector<2x16xf32>
    %cst_31 = arith.constant 1.000000e+00 : f32
    %168 = vector.broadcast %cst_31 : f32 to vector<2x16xf32>
    %169 = arith.addf %168, %167 : vector<2x16xf32>
    %170 = arith.divf %168, %169 : vector<2x16xf32>
    %171 = arith.mulf %162, %97 : vector<2x16xf32>
    %172 = arith.mulf %156, %164 : vector<2x16xf32>
    %173 = arith.addf %171, %172 : vector<2x16xf32>
    %174 = math.tanh %173 : vector<2x16xf32>
    %175 = arith.mulf %170, %174 : vector<2x16xf32>
    %cst_32 = arith.constant 1.000000e+00 : f32
    %176 = vector.broadcast %cst_32 : f32 to vector<2x1xf32>
    %177 = arith.subf %176, %111 : vector<2x1xf32>
    %178 = vector.broadcast %111 : vector<2x1xf32> to vector<2x16xf32>
    %179 = arith.mulf %178, %175 : vector<2x16xf32>
    %180 = vector.broadcast %177 : vector<2x1xf32> to vector<2x16xf32>
    %181 = arith.mulf %180, %92 : vector<2x16xf32>
    %182 = arith.addf %179, %181 : vector<2x16xf32>
    %183 = vector.broadcast %111 : vector<2x1xf32> to vector<2x16xf32>
    %184 = arith.mulf %183, %173 : vector<2x16xf32>
    %185 = vector.broadcast %177 : vector<2x1xf32> to vector<2x16xf32>
    %186 = arith.mulf %185, %97 : vector<2x16xf32>
    %187 = arith.addf %184, %186 : vector<2x16xf32>
    %188 = vector.broadcast %111 : vector<2x1xf32> to vector<2x16xf32>
    %189 = arith.mulf %188, %175 : vector<2x16xf32>
    %c2 = arith.constant 2 : index
    %c0_33 = arith.constant 0 : index
    %190 = vector.load %arg14[%c2, %c0_33] : memref<16x32xf32, #tpu.memory_space<vmem>>, vector<2x16xf32>
    tpu.vector_store %arg14[%c2, %c0_33], %150 {strides = array<i32>} : memref<16x32xf32, #tpu.memory_space<vmem>>, vector<2x16xf32>,
    %c12 = arith.constant 12 : index
    %c16_34 = arith.constant 16 : index
    %191 = vector.load %arg14[%c12, %c16_34] : memref<16x32xf32, #tpu.memory_space<vmem>>, vector<2x16xf32>
    tpu.vector_store %arg14[%c12, %c16_34], %189 {strides = array<i32>} : memref<16x32xf32, #tpu.memory_space<vmem>>, vector<2x16xf32>,
    %192 = tpu.concatenate %143, %182 in 1 : vector<2x16xf32>, vector<2x16xf32> -> vector<2x32xf32>
    %cst_35 = arith.constant dense<0.000000e+00> : vector<2x128xf32>
    %193 = tpu.matmul %192, %7, %cst_35 {dimension_numbers = #tpu.dot_dimension_numbers<[1], [0], [0], [1], [0, 0, 1, 1], [], []>} : vector<2x32xf32>, vector<32x128xf32>, vector<2x128xf32> -> vector<2x128xf32>
    %194 = vector.extract_strided_slice %193 {offsets = [0, 0], sizes = [2, 64], strides = [1, 1]} : vector<2x128xf32> to vector<2x64xf32>
    %195 = vector.extract_strided_slice %5 {offsets = [4, 0], sizes = [2, 64], strides = [1, 1]} : vector<16x128xf32> to vector<2x64xf32>
    %196 = arith.addf %194, %195 : vector<2x64xf32>
    %197 = vector.extract_strided_slice %193 {offsets = [0, 64], sizes = [2, 64], strides = [1, 1]} : vector<2x128xf32> to vector<2x64xf32>
    %198 = vector.extract_strided_slice %5 {offsets = [10, 64], sizes = [2, 64], strides = [1, 1]} : vector<16x128xf32> to vector<2x64xf32>
    %199 = arith.addf %197, %198 : vector<2x64xf32>
    %200 = vector.extract_strided_slice %6 {offsets = [4, 0], sizes = [2, 1], strides = [1, 1]} : vector<16x1xf32> to vector<2x1xf32>
    %201 = vector.extract_strided_slice %6 {offsets = [10, 0], sizes = [2, 1], strides = [1, 1]} : vector<16x1xf32> to vector<2x1xf32>
    %202 = vector.extract_strided_slice %196 {offsets = [0, 0], sizes = [2, 16], strides = [1, 1]} : vector<2x64xf32> to vector<2x16xf32>
    %203 = arith.negf %202 : vector<2x16xf32>
    %204 = math.exp %203 : vector<2x16xf32>
    %cst_36 = arith.constant 1.000000e+00 : f32
    %205 = vector.broadcast %cst_36 : f32 to vector<2x16xf32>
    %206 = arith.addf %205, %204 : vector<2x16xf32>
    %207 = arith.divf %205, %206 : vector<2x16xf32>
    %208 = vector.extract_strided_slice %196 {offsets = [0, 16], sizes = [2, 16], strides = [1, 1]} : vector<2x64xf32> to vector<2x16xf32>
    %209 = arith.negf %208 : vector<2x16xf32>
    %210 = math.exp %209 : vector<2x16xf32>
    %cst_37 = arith.constant 1.000000e+00 : f32
    %211 = vector.broadcast %cst_37 : f32 to vector<2x16xf32>
    %212 = arith.addf %211, %210 : vector<2x16xf32>
    %213 = arith.divf %211, %212 : vector<2x16xf32>
    %214 = vector.extract_strided_slice %196 {offsets = [0, 32], sizes = [2, 16], strides = [1, 1]} : vector<2x64xf32> to vector<2x16xf32>
    %215 = math.tanh %214 : vector<2x16xf32>
    %216 = vector.extract_strided_slice %196 {offsets = [0, 48], sizes = [2, 16], strides = [1, 1]} : vector<2x64xf32> to vector<2x16xf32>
    %217 = arith.negf %216 : vector<2x16xf32>
    %218 = math.exp %217 : vector<2x16xf32>
    %cst_38 = arith.constant 1.000000e+00 : f32
    %219 = vector.broadcast %cst_38 : f32 to vector<2x16xf32>
    %220 = arith.addf %219, %218 : vector<2x16xf32>
    %221 = arith.divf %219, %220 : vector<2x16xf32>
    %222 = arith.mulf %213, %148 : vector<2x16xf32>
    %223 = arith.mulf %207, %215 : vector<2x16xf32>
    %224 = arith.addf %222, %223 : vector<2x16xf32>
    %225 = math.tanh %224 : vector<2x16xf32>
    %226 = arith.mulf %221, %225 : vector<2x16xf32>
    %cst_39 = arith.constant 1.000000e+00 : f32
    %227 = vector.broadcast %cst_39 : f32 to vector<2x1xf32>
    %228 = arith.subf %227, %200 : vector<2x1xf32>
    %229 = vector.broadcast %200 : vector<2x1xf32> to vector<2x16xf32>
    %230 = arith.mulf %229, %226 : vector<2x16xf32>
    %231 = vector.broadcast %228 : vector<2x1xf32> to vector<2x16xf32>
    %232 = arith.mulf %231, %143 : vector<2x16xf32>
    %233 = arith.addf %230, %232 : vector<2x16xf32>
    %234 = vector.broadcast %200 : vector<2x1xf32> to vector<2x16xf32>
    %235 = arith.mulf %234, %224 : vector<2x16xf32>
    %236 = vector.broadcast %228 : vector<2x1xf32> to vector<2x16xf32>
    %237 = arith.mulf %236, %148 : vector<2x16xf32>
    %238 = arith.addf %235, %237 : vector<2x16xf32>
    %239 = vector.broadcast %200 : vector<2x1xf32> to vector<2x16xf32>
    %240 = arith.mulf %239, %226 : vector<2x16xf32>
    %241 = vector.extract_strided_slice %199 {offsets = [0, 0], sizes = [2, 16], strides = [1, 1]} : vector<2x64xf32> to vector<2x16xf32>
    %242 = arith.negf %241 : vector<2x16xf32>
    %243 = math.exp %242 : vector<2x16xf32>
    %cst_40 = arith.constant 1.000000e+00 : f32
    %244 = vector.broadcast %cst_40 : f32 to vector<2x16xf32>
    %245 = arith.addf %244, %243 : vector<2x16xf32>
    %246 = arith.divf %244, %245 : vector<2x16xf32>
    %247 = vector.extract_strided_slice %199 {offsets = [0, 16], sizes = [2, 16], strides = [1, 1]} : vector<2x64xf32> to vector<2x16xf32>
    %248 = arith.negf %247 : vector<2x16xf32>
    %249 = math.exp %248 : vector<2x16xf32>
    %cst_41 = arith.constant 1.000000e+00 : f32
    %250 = vector.broadcast %cst_41 : f32 to vector<2x16xf32>
    %251 = arith.addf %250, %249 : vector<2x16xf32>
    %252 = arith.divf %250, %251 : vector<2x16xf32>
    %253 = vector.extract_strided_slice %199 {offsets = [0, 32], sizes = [2, 16], strides = [1, 1]} : vector<2x64xf32> to vector<2x16xf32>
    %254 = math.tanh %253 : vector<2x16xf32>
    %255 = vector.extract_strided_slice %199 {offsets = [0, 48], sizes = [2, 16], strides = [1, 1]} : vector<2x64xf32> to vector<2x16xf32>
    %256 = arith.negf %255 : vector<2x16xf32>
    %257 = math.exp %256 : vector<2x16xf32>
    %cst_42 = arith.constant 1.000000e+00 : f32
    %258 = vector.broadcast %cst_42 : f32 to vector<2x16xf32>
    %259 = arith.addf %258, %257 : vector<2x16xf32>
    %260 = arith.divf %258, %259 : vector<2x16xf32>
    %261 = arith.mulf %252, %187 : vector<2x16xf32>
    %262 = arith.mulf %246, %254 : vector<2x16xf32>
    %263 = arith.addf %261, %262 : vector<2x16xf32>
    %264 = math.tanh %263 : vector<2x16xf32>
    %265 = arith.mulf %260, %264 : vector<2x16xf32>
    %cst_43 = arith.constant 1.000000e+00 : f32
    %266 = vector.broadcast %cst_43 : f32 to vector<2x1xf32>
    %267 = arith.subf %266, %201 : vector<2x1xf32>
    %268 = vector.broadcast %201 : vector<2x1xf32> to vector<2x16xf32>
    %269 = arith.mulf %268, %265 : vector<2x16xf32>
    %270 = vector.broadcast %267 : vector<2x1xf32> to vector<2x16xf32>
    %271 = arith.mulf %270, %182 : vector<2x16xf32>
    %272 = arith.addf %269, %271 : vector<2x16xf32>
    %273 = vector.broadcast %201 : vector<2x1xf32> to vector<2x16xf32>
    %274 = arith.mulf %273, %263 : vector<2x16xf32>
    %275 = vector.broadcast %267 : vector<2x1xf32> to vector<2x16xf32>
    %276 = arith.mulf %275, %187 : vector<2x16xf32>
    %277 = arith.addf %274, %276 : vector<2x16xf32>
    %278 = vector.broadcast %201 : vector<2x1xf32> to vector<2x16xf32>
    %279 = arith.mulf %278, %265 : vector<2x16xf32>
    %c4 = arith.constant 4 : index
    %c0_44 = arith.constant 0 : index
    %280 = vector.load %arg14[%c4, %c0_44] : memref<16x32xf32, #tpu.memory_space<vmem>>, vector<2x16xf32>
    tpu.vector_store %arg14[%c4, %c0_44], %240 {strides = array<i32>} : memref<16x32xf32, #tpu.memory_space<vmem>>, vector<2x16xf32>,
    %c10 = arith.constant 10 : index
    %c16_45 = arith.constant 16 : index
    %281 = vector.load %arg14[%c10, %c16_45] : memref<16x32xf32, #tpu.memory_space<vmem>>, vector<2x16xf32>
    tpu.vector_store %arg14[%c10, %c16_45], %279 {strides = array<i32>} : memref<16x32xf32, #tpu.memory_space<vmem>>, vector<2x16xf32>,
    %282 = tpu.concatenate %233, %272 in 1 : vector<2x16xf32>, vector<2x16xf32> -> vector<2x32xf32>
    %cst_46 = arith.constant dense<0.000000e+00> : vector<2x128xf32>
    %283 = tpu.matmul %282, %7, %cst_46 {dimension_numbers = #tpu.dot_dimension_numbers<[1], [0], [0], [1], [0, 0, 1, 1], [], []>} : vector<2x32xf32>, vector<32x128xf32>, vector<2x128xf32> -> vector<2x128xf32>
    %284 = vector.extract_strided_slice %283 {offsets = [0, 0], sizes = [2, 64], strides = [1, 1]} : vector<2x128xf32> to vector<2x64xf32>
    %285 = vector.extract_strided_slice %5 {offsets = [6, 0], sizes = [2, 64], strides = [1, 1]} : vector<16x128xf32> to vector<2x64xf32>
    %286 = arith.addf %284, %285 : vector<2x64xf32>
    %287 = vector.extract_strided_slice %283 {offsets = [0, 64], sizes = [2, 64], strides = [1, 1]} : vector<2x128xf32> to vector<2x64xf32>
    %288 = vector.extract_strided_slice %5 {offsets = [8, 64], sizes = [2, 64], strides = [1, 1]} : vector<16x128xf32> to vector<2x64xf32>
    %289 = arith.addf %287, %288 : vector<2x64xf32>
    %290 = vector.extract_strided_slice %6 {offsets = [6, 0], sizes = [2, 1], strides = [1, 1]} : vector<16x1xf32> to vector<2x1xf32>
    %291 = vector.extract_strided_slice %6 {offsets = [8, 0], sizes = [2, 1], strides = [1, 1]} : vector<16x1xf32> to vector<2x1xf32>
    %292 = vector.extract_strided_slice %286 {offsets = [0, 0], sizes = [2, 16], strides = [1, 1]} : vector<2x64xf32> to vector<2x16xf32>
    %293 = arith.negf %292 : vector<2x16xf32>
    %294 = math.exp %293 : vector<2x16xf32>
    %cst_47 = arith.constant 1.000000e+00 : f32
    %295 = vector.broadcast %cst_47 : f32 to vector<2x16xf32>
    %296 = arith.addf %295, %294 : vector<2x16xf32>
    %297 = arith.divf %295, %296 : vector<2x16xf32>
    %298 = vector.extract_strided_slice %286 {offsets = [0, 16], sizes = [2, 16], strides = [1, 1]} : vector<2x64xf32> to vector<2x16xf32>
    %299 = arith.negf %298 : vector<2x16xf32>
    %300 = math.exp %299 : vector<2x16xf32>
    %cst_48 = arith.constant 1.000000e+00 : f32
    %301 = vector.broadcast %cst_48 : f32 to vector<2x16xf32>
    %302 = arith.addf %301, %300 : vector<2x16xf32>
    %303 = arith.divf %301, %302 : vector<2x16xf32>
    %304 = vector.extract_strided_slice %286 {offsets = [0, 32], sizes = [2, 16], strides = [1, 1]} : vector<2x64xf32> to vector<2x16xf32>
    %305 = math.tanh %304 : vector<2x16xf32>
    %306 = vector.extract_strided_slice %286 {offsets = [0, 48], sizes = [2, 16], strides = [1, 1]} : vector<2x64xf32> to vector<2x16xf32>
    %307 = arith.negf %306 : vector<2x16xf32>
    %308 = math.exp %307 : vector<2x16xf32>
    %cst_49 = arith.constant 1.000000e+00 : f32
    %309 = vector.broadcast %cst_49 : f32 to vector<2x16xf32>
    %310 = arith.addf %309, %308 : vector<2x16xf32>
    %311 = arith.divf %309, %310 : vector<2x16xf32>
    %312 = arith.mulf %303, %238 : vector<2x16xf32>
    %313 = arith.mulf %297, %305 : vector<2x16xf32>
    %314 = arith.addf %312, %313 : vector<2x16xf32>
    %315 = math.tanh %314 : vector<2x16xf32>
    %316 = arith.mulf %311, %315 : vector<2x16xf32>
    %cst_50 = arith.constant 1.000000e+00 : f32
    %317 = vector.broadcast %cst_50 : f32 to vector<2x1xf32>
    %318 = arith.subf %317, %290 : vector<2x1xf32>
    %319 = vector.broadcast %290 : vector<2x1xf32> to vector<2x16xf32>
    %320 = arith.mulf %319, %316 : vector<2x16xf32>
    %321 = vector.broadcast %318 : vector<2x1xf32> to vector<2x16xf32>
    %322 = arith.mulf %321, %233 : vector<2x16xf32>
    %323 = arith.addf %320, %322 : vector<2x16xf32>
    %324 = vector.broadcast %290 : vector<2x1xf32> to vector<2x16xf32>
    %325 = arith.mulf %324, %314 : vector<2x16xf32>
    %326 = vector.broadcast %318 : vector<2x1xf32> to vector<2x16xf32>
    %327 = arith.mulf %326, %238 : vector<2x16xf32>
    %328 = arith.addf %325, %327 : vector<2x16xf32>
    %329 = vector.broadcast %290 : vector<2x1xf32> to vector<2x16xf32>
    %330 = arith.mulf %329, %316 : vector<2x16xf32>
    %331 = vector.extract_strided_slice %289 {offsets = [0, 0], sizes = [2, 16], strides = [1, 1]} : vector<2x64xf32> to vector<2x16xf32>
    %332 = arith.negf %331 : vector<2x16xf32>
    %333 = math.exp %332 : vector<2x16xf32>
    %cst_51 = arith.constant 1.000000e+00 : f32
    %334 = vector.broadcast %cst_51 : f32 to vector<2x16xf32>
    %335 = arith.addf %334, %333 : vector<2x16xf32>
    %336 = arith.divf %334, %335 : vector<2x16xf32>
    %337 = vector.extract_strided_slice %289 {offsets = [0, 16], sizes = [2, 16], strides = [1, 1]} : vector<2x64xf32> to vector<2x16xf32>
    %338 = arith.negf %337 : vector<2x16xf32>
    %339 = math.exp %338 : vector<2x16xf32>
    %cst_52 = arith.constant 1.000000e+00 : f32
    %340 = vector.broadcast %cst_52 : f32 to vector<2x16xf32>
    %341 = arith.addf %340, %339 : vector<2x16xf32>
    %342 = arith.divf %340, %341 : vector<2x16xf32>
    %343 = vector.extract_strided_slice %289 {offsets = [0, 32], sizes = [2, 16], strides = [1, 1]} : vector<2x64xf32> to vector<2x16xf32>
    %344 = math.tanh %343 : vector<2x16xf32>
    %345 = vector.extract_strided_slice %289 {offsets = [0, 48], sizes = [2, 16], strides = [1, 1]} : vector<2x64xf32> to vector<2x16xf32>
    %346 = arith.negf %345 : vector<2x16xf32>
    %347 = math.exp %346 : vector<2x16xf32>
    %cst_53 = arith.constant 1.000000e+00 : f32
    %348 = vector.broadcast %cst_53 : f32 to vector<2x16xf32>
    %349 = arith.addf %348, %347 : vector<2x16xf32>
    %350 = arith.divf %348, %349 : vector<2x16xf32>
    %351 = arith.mulf %342, %277 : vector<2x16xf32>
    %352 = arith.mulf %336, %344 : vector<2x16xf32>
    %353 = arith.addf %351, %352 : vector<2x16xf32>
    %354 = math.tanh %353 : vector<2x16xf32>
    %355 = arith.mulf %350, %354 : vector<2x16xf32>
    %cst_54 = arith.constant 1.000000e+00 : f32
    %356 = vector.broadcast %cst_54 : f32 to vector<2x1xf32>
    %357 = arith.subf %356, %291 : vector<2x1xf32>
    %358 = vector.broadcast %291 : vector<2x1xf32> to vector<2x16xf32>
    %359 = arith.mulf %358, %355 : vector<2x16xf32>
    %360 = vector.broadcast %357 : vector<2x1xf32> to vector<2x16xf32>
    %361 = arith.mulf %360, %272 : vector<2x16xf32>
    %362 = arith.addf %359, %361 : vector<2x16xf32>
    %363 = vector.broadcast %291 : vector<2x1xf32> to vector<2x16xf32>
    %364 = arith.mulf %363, %353 : vector<2x16xf32>
    %365 = vector.broadcast %357 : vector<2x1xf32> to vector<2x16xf32>
    %366 = arith.mulf %365, %277 : vector<2x16xf32>
    %367 = arith.addf %364, %366 : vector<2x16xf32>
    %368 = vector.broadcast %291 : vector<2x1xf32> to vector<2x16xf32>
    %369 = arith.mulf %368, %355 : vector<2x16xf32>
    %c6 = arith.constant 6 : index
    %c0_55 = arith.constant 0 : index
    %370 = vector.load %arg14[%c6, %c0_55] : memref<16x32xf32, #tpu.memory_space<vmem>>, vector<2x16xf32>
    tpu.vector_store %arg14[%c6, %c0_55], %330 {strides = array<i32>} : memref<16x32xf32, #tpu.memory_space<vmem>>, vector<2x16xf32>,
    %c8 = arith.constant 8 : index
    %c16_56 = arith.constant 16 : index
    %371 = vector.load %arg14[%c8, %c16_56] : memref<16x32xf32, #tpu.memory_space<vmem>>, vector<2x16xf32>
    tpu.vector_store %arg14[%c8, %c16_56], %369 {strides = array<i32>} : memref<16x32xf32, #tpu.memory_space<vmem>>, vector<2x16xf32>,
    %372 = tpu.concatenate %323, %362 in 1 : vector<2x16xf32>, vector<2x16xf32> -> vector<2x32xf32>
    %cst_57 = arith.constant dense<0.000000e+00> : vector<2x128xf32>
    %373 = tpu.matmul %372, %7, %cst_57 {dimension_numbers = #tpu.dot_dimension_numbers<[1], [0], [0], [1], [0, 0, 1, 1], [], []>} : vector<2x32xf32>, vector<32x128xf32>, vector<2x128xf32> -> vector<2x128xf32>
    %374 = vector.extract_strided_slice %373 {offsets = [0, 0], sizes = [2, 64], strides = [1, 1]} : vector<2x128xf32> to vector<2x64xf32>
    %375 = vector.extract_strided_slice %5 {offsets = [8, 0], sizes = [2, 64], strides = [1, 1]} : vector<16x128xf32> to vector<2x64xf32>
    %376 = arith.addf %374, %375 : vector<2x64xf32>
    %377 = vector.extract_strided_slice %373 {offsets = [0, 64], sizes = [2, 64], strides = [1, 1]} : vector<2x128xf32> to vector<2x64xf32>
    %378 = vector.extract_strided_slice %5 {offsets = [6, 64], sizes = [2, 64], strides = [1, 1]} : vector<16x128xf32> to vector<2x64xf32>
    %379 = arith.addf %377, %378 : vector<2x64xf32>
    %380 = vector.extract_strided_slice %6 {offsets = [8, 0], sizes = [2, 1], strides = [1, 1]} : vector<16x1xf32> to vector<2x1xf32>
    %381 = vector.extract_strided_slice %6 {offsets = [6, 0], sizes = [2, 1], strides = [1, 1]} : vector<16x1xf32> to vector<2x1xf32>
    %382 = vector.extract_strided_slice %376 {offsets = [0, 0], sizes = [2, 16], strides = [1, 1]} : vector<2x64xf32> to vector<2x16xf32>
    %383 = arith.negf %382 : vector<2x16xf32>
    %384 = math.exp %383 : vector<2x16xf32>
    %cst_58 = arith.constant 1.000000e+00 : f32
    %385 = vector.broadcast %cst_58 : f32 to vector<2x16xf32>
    %386 = arith.addf %385, %384 : vector<2x16xf32>
    %387 = arith.divf %385, %386 : vector<2x16xf32>
    %388 = vector.extract_strided_slice %376 {offsets = [0, 16], sizes = [2, 16], strides = [1, 1]} : vector<2x64xf32> to vector<2x16xf32>
    %389 = arith.negf %388 : vector<2x16xf32>
    %390 = math.exp %389 : vector<2x16xf32>
    %cst_59 = arith.constant 1.000000e+00 : f32
    %391 = vector.broadcast %cst_59 : f32 to vector<2x16xf32>
    %392 = arith.addf %391, %390 : vector<2x16xf32>
    %393 = arith.divf %391, %392 : vector<2x16xf32>
    %394 = vector.extract_strided_slice %376 {offsets = [0, 32], sizes = [2, 16], strides = [1, 1]} : vector<2x64xf32> to vector<2x16xf32>
    %395 = math.tanh %394 : vector<2x16xf32>
    %396 = vector.extract_strided_slice %376 {offsets = [0, 48], sizes = [2, 16], strides = [1, 1]} : vector<2x64xf32> to vector<2x16xf32>
    %397 = arith.negf %396 : vector<2x16xf32>
    %398 = math.exp %397 : vector<2x16xf32>
    %cst_60 = arith.constant 1.000000e+00 : f32
    %399 = vector.broadcast %cst_60 : f32 to vector<2x16xf32>
    %400 = arith.addf %399, %398 : vector<2x16xf32>
    %401 = arith.divf %399, %400 : vector<2x16xf32>
    %402 = arith.mulf %393, %328 : vector<2x16xf32>
    %403 = arith.mulf %387, %395 : vector<2x16xf32>
    %404 = arith.addf %402, %403 : vector<2x16xf32>
    %405 = math.tanh %404 : vector<2x16xf32>
    %406 = arith.mulf %401, %405 : vector<2x16xf32>
    %cst_61 = arith.constant 1.000000e+00 : f32
    %407 = vector.broadcast %cst_61 : f32 to vector<2x1xf32>
    %408 = arith.subf %407, %380 : vector<2x1xf32>
    %409 = vector.broadcast %380 : vector<2x1xf32> to vector<2x16xf32>
    %410 = arith.mulf %409, %406 : vector<2x16xf32>
    %411 = vector.broadcast %408 : vector<2x1xf32> to vector<2x16xf32>
    %412 = arith.mulf %411, %323 : vector<2x16xf32>
    %413 = arith.addf %410, %412 : vector<2x16xf32>
    %414 = vector.broadcast %380 : vector<2x1xf32> to vector<2x16xf32>
    %415 = arith.mulf %414, %404 : vector<2x16xf32>
    %416 = vector.broadcast %408 : vector<2x1xf32> to vector<2x16xf32>
    %417 = arith.mulf %416, %328 : vector<2x16xf32>
    %418 = arith.addf %415, %417 : vector<2x16xf32>
    %419 = vector.broadcast %380 : vector<2x1xf32> to vector<2x16xf32>
    %420 = arith.mulf %419, %406 : vector<2x16xf32>
    %421 = vector.extract_strided_slice %379 {offsets = [0, 0], sizes = [2, 16], strides = [1, 1]} : vector<2x64xf32> to vector<2x16xf32>
    %422 = arith.negf %421 : vector<2x16xf32>
    %423 = math.exp %422 : vector<2x16xf32>
    %cst_62 = arith.constant 1.000000e+00 : f32
    %424 = vector.broadcast %cst_62 : f32 to vector<2x16xf32>
    %425 = arith.addf %424, %423 : vector<2x16xf32>
    %426 = arith.divf %424, %425 : vector<2x16xf32>
    %427 = vector.extract_strided_slice %379 {offsets = [0, 16], sizes = [2, 16], strides = [1, 1]} : vector<2x64xf32> to vector<2x16xf32>
    %428 = arith.negf %427 : vector<2x16xf32>
    %429 = math.exp %428 : vector<2x16xf32>
    %cst_63 = arith.constant 1.000000e+00 : f32
    %430 = vector.broadcast %cst_63 : f32 to vector<2x16xf32>
    %431 = arith.addf %430, %429 : vector<2x16xf32>
    %432 = arith.divf %430, %431 : vector<2x16xf32>
    %433 = vector.extract_strided_slice %379 {offsets = [0, 32], sizes = [2, 16], strides = [1, 1]} : vector<2x64xf32> to vector<2x16xf32>
    %434 = math.tanh %433 : vector<2x16xf32>
    %435 = vector.extract_strided_slice %379 {offsets = [0, 48], sizes = [2, 16], strides = [1, 1]} : vector<2x64xf32> to vector<2x16xf32>
    %436 = arith.negf %435 : vector<2x16xf32>
    %437 = math.exp %436 : vector<2x16xf32>
    %cst_64 = arith.constant 1.000000e+00 : f32
    %438 = vector.broadcast %cst_64 : f32 to vector<2x16xf32>
    %439 = arith.addf %438, %437 : vector<2x16xf32>
    %440 = arith.divf %438, %439 : vector<2x16xf32>
    %441 = arith.mulf %432, %367 : vector<2x16xf32>
    %442 = arith.mulf %426, %434 : vector<2x16xf32>
    %443 = arith.addf %441, %442 : vector<2x16xf32>
    %444 = math.tanh %443 : vector<2x16xf32>
    %445 = arith.mulf %440, %444 : vector<2x16xf32>
    %cst_65 = arith.constant 1.000000e+00 : f32
    %446 = vector.broadcast %cst_65 : f32 to vector<2x1xf32>
    %447 = arith.subf %446, %381 : vector<2x1xf32>
    %448 = vector.broadcast %381 : vector<2x1xf32> to vector<2x16xf32>
    %449 = arith.mulf %448, %445 : vector<2x16xf32>
    %450 = vector.broadcast %447 : vector<2x1xf32> to vector<2x16xf32>
    %451 = arith.mulf %450, %362 : vector<2x16xf32>
    %452 = arith.addf %449, %451 : vector<2x16xf32>
    %453 = vector.broadcast %381 : vector<2x1xf32> to vector<2x16xf32>
    %454 = arith.mulf %453, %443 : vector<2x16xf32>
    %455 = vector.broadcast %447 : vector<2x1xf32> to vector<2x16xf32>
    %456 = arith.mulf %455, %367 : vector<2x16xf32>
    %457 = arith.addf %454, %456 : vector<2x16xf32>
    %458 = vector.broadcast %381 : vector<2x1xf32> to vector<2x16xf32>
    %459 = arith.mulf %458, %445 : vector<2x16xf32>
    %c8_66 = arith.constant 8 : index
    %c0_67 = arith.constant 0 : index
    %460 = vector.load %arg14[%c8_66, %c0_67] : memref<16x32xf32, #tpu.memory_space<vmem>>, vector<2x16xf32>
    tpu.vector_store %arg14[%c8_66, %c0_67], %420 {strides = array<i32>} : memref<16x32xf32, #tpu.memory_space<vmem>>, vector<2x16xf32>,
    %c6_68 = arith.constant 6 : index
    %c16_69 = arith.constant 16 : index
    %461 = vector.load %arg14[%c6_68, %c16_69] : memref<16x32xf32, #tpu.memory_space<vmem>>, vector<2x16xf32>
    tpu.vector_store %arg14[%c6_68, %c16_69], %459 {strides = array<i32>} : memref<16x32xf32, #tpu.memory_space<vmem>>, vector<2x16xf32>,
    %462 = tpu.concatenate %413, %452 in 1 : vector<2x16xf32>, vector<2x16xf32> -> vector<2x32xf32>
    %cst_70 = arith.constant dense<0.000000e+00> : vector<2x128xf32>
    %463 = tpu.matmul %462, %7, %cst_70 {dimension_numbers = #tpu.dot_dimension_numbers<[1], [0], [0], [1], [0, 0, 1, 1], [], []>} : vector<2x32xf32>, vector<32x128xf32>, vector<2x128xf32> -> vector<2x128xf32>
    %464 = vector.extract_strided_slice %463 {offsets = [0, 0], sizes = [2, 64], strides = [1, 1]} : vector<2x128xf32> to vector<2x64xf32>
    %465 = vector.extract_strided_slice %5 {offsets = [10, 0], sizes = [2, 64], strides = [1, 1]} : vector<16x128xf32> to vector<2x64xf32>
    %466 = arith.addf %464, %465 : vector<2x64xf32>
    %467 = vector.extract_strided_slice %463 {offsets = [0, 64], sizes = [2, 64], strides = [1, 1]} : vector<2x128xf32> to vector<2x64xf32>
    %468 = vector.extract_strided_slice %5 {offsets = [4, 64], sizes = [2, 64], strides = [1, 1]} : vector<16x128xf32> to vector<2x64xf32>
    %469 = arith.addf %467, %468 : vector<2x64xf32>
    %470 = vector.extract_strided_slice %6 {offsets = [10, 0], sizes = [2, 1], strides = [1, 1]} : vector<16x1xf32> to vector<2x1xf32>
    %471 = vector.extract_strided_slice %6 {offsets = [4, 0], sizes = [2, 1], strides = [1, 1]} : vector<16x1xf32> to vector<2x1xf32>
    %472 = vector.extract_strided_slice %466 {offsets = [0, 0], sizes = [2, 16], strides = [1, 1]} : vector<2x64xf32> to vector<2x16xf32>
    %473 = arith.negf %472 : vector<2x16xf32>
    %474 = math.exp %473 : vector<2x16xf32>
    %cst_71 = arith.constant 1.000000e+00 : f32
    %475 = vector.broadcast %cst_71 : f32 to vector<2x16xf32>
    %476 = arith.addf %475, %474 : vector<2x16xf32>
    %477 = arith.divf %475, %476 : vector<2x16xf32>
    %478 = vector.extract_strided_slice %466 {offsets = [0, 16], sizes = [2, 16], strides = [1, 1]} : vector<2x64xf32> to vector<2x16xf32>
    %479 = arith.negf %478 : vector<2x16xf32>
    %480 = math.exp %479 : vector<2x16xf32>
    %cst_72 = arith.constant 1.000000e+00 : f32
    %481 = vector.broadcast %cst_72 : f32 to vector<2x16xf32>
    %482 = arith.addf %481, %480 : vector<2x16xf32>
    %483 = arith.divf %481, %482 : vector<2x16xf32>
    %484 = vector.extract_strided_slice %466 {offsets = [0, 32], sizes = [2, 16], strides = [1, 1]} : vector<2x64xf32> to vector<2x16xf32>
    %485 = math.tanh %484 : vector<2x16xf32>
    %486 = vector.extract_strided_slice %466 {offsets = [0, 48], sizes = [2, 16], strides = [1, 1]} : vector<2x64xf32> to vector<2x16xf32>
    %487 = arith.negf %486 : vector<2x16xf32>
    %488 = math.exp %487 : vector<2x16xf32>
    %cst_73 = arith.constant 1.000000e+00 : f32
    %489 = vector.broadcast %cst_73 : f32 to vector<2x16xf32>
    %490 = arith.addf %489, %488 : vector<2x16xf32>
    %491 = arith.divf %489, %490 : vector<2x16xf32>
    %492 = arith.mulf %483, %418 : vector<2x16xf32>
    %493 = arith.mulf %477, %485 : vector<2x16xf32>
    %494 = arith.addf %492, %493 : vector<2x16xf32>
    %495 = math.tanh %494 : vector<2x16xf32>
    %496 = arith.mulf %491, %495 : vector<2x16xf32>
    %cst_74 = arith.constant 1.000000e+00 : f32
    %497 = vector.broadcast %cst_74 : f32 to vector<2x1xf32>
    %498 = arith.subf %497, %470 : vector<2x1xf32>
    %499 = vector.broadcast %470 : vector<2x1xf32> to vector<2x16xf32>
    %500 = arith.mulf %499, %496 : vector<2x16xf32>
    %501 = vector.broadcast %498 : vector<2x1xf32> to vector<2x16xf32>
    %502 = arith.mulf %501, %413 : vector<2x16xf32>
    %503 = arith.addf %500, %502 : vector<2x16xf32>
    %504 = vector.broadcast %470 : vector<2x1xf32> to vector<2x16xf32>
    %505 = arith.mulf %504, %494 : vector<2x16xf32>
    %506 = vector.broadcast %498 : vector<2x1xf32> to vector<2x16xf32>
    %507 = arith.mulf %506, %418 : vector<2x16xf32>
    %508 = arith.addf %505, %507 : vector<2x16xf32>
    %509 = vector.broadcast %470 : vector<2x1xf32> to vector<2x16xf32>
    %510 = arith.mulf %509, %496 : vector<2x16xf32>
    %511 = vector.extract_strided_slice %469 {offsets = [0, 0], sizes = [2, 16], strides = [1, 1]} : vector<2x64xf32> to vector<2x16xf32>
    %512 = arith.negf %511 : vector<2x16xf32>
    %513 = math.exp %512 : vector<2x16xf32>
    %cst_75 = arith.constant 1.000000e+00 : f32
    %514 = vector.broadcast %cst_75 : f32 to vector<2x16xf32>
    %515 = arith.addf %514, %513 : vector<2x16xf32>
    %516 = arith.divf %514, %515 : vector<2x16xf32>
    %517 = vector.extract_strided_slice %469 {offsets = [0, 16], sizes = [2, 16], strides = [1, 1]} : vector<2x64xf32> to vector<2x16xf32>
    %518 = arith.negf %517 : vector<2x16xf32>
    %519 = math.exp %518 : vector<2x16xf32>
    %cst_76 = arith.constant 1.000000e+00 : f32
    %520 = vector.broadcast %cst_76 : f32 to vector<2x16xf32>
    %521 = arith.addf %520, %519 : vector<2x16xf32>
    %522 = arith.divf %520, %521 : vector<2x16xf32>
    %523 = vector.extract_strided_slice %469 {offsets = [0, 32], sizes = [2, 16], strides = [1, 1]} : vector<2x64xf32> to vector<2x16xf32>
    %524 = math.tanh %523 : vector<2x16xf32>
    %525 = vector.extract_strided_slice %469 {offsets = [0, 48], sizes = [2, 16], strides = [1, 1]} : vector<2x64xf32> to vector<2x16xf32>
    %526 = arith.negf %525 : vector<2x16xf32>
    %527 = math.exp %526 : vector<2x16xf32>
    %cst_77 = arith.constant 1.000000e+00 : f32
    %528 = vector.broadcast %cst_77 : f32 to vector<2x16xf32>
    %529 = arith.addf %528, %527 : vector<2x16xf32>
    %530 = arith.divf %528, %529 : vector<2x16xf32>
    %531 = arith.mulf %522, %457 : vector<2x16xf32>
    %532 = arith.mulf %516, %524 : vector<2x16xf32>
    %533 = arith.addf %531, %532 : vector<2x16xf32>
    %534 = math.tanh %533 : vector<2x16xf32>
    %535 = arith.mulf %530, %534 : vector<2x16xf32>
    %cst_78 = arith.constant 1.000000e+00 : f32
    %536 = vector.broadcast %cst_78 : f32 to vector<2x1xf32>
    %537 = arith.subf %536, %471 : vector<2x1xf32>
    %538 = vector.broadcast %471 : vector<2x1xf32> to vector<2x16xf32>
    %539 = arith.mulf %538, %535 : vector<2x16xf32>
    %540 = vector.broadcast %537 : vector<2x1xf32> to vector<2x16xf32>
    %541 = arith.mulf %540, %452 : vector<2x16xf32>
    %542 = arith.addf %539, %541 : vector<2x16xf32>
    %543 = vector.broadcast %471 : vector<2x1xf32> to vector<2x16xf32>
    %544 = arith.mulf %543, %533 : vector<2x16xf32>
    %545 = vector.broadcast %537 : vector<2x1xf32> to vector<2x16xf32>
    %546 = arith.mulf %545, %457 : vector<2x16xf32>
    %547 = arith.addf %544, %546 : vector<2x16xf32>
    %548 = vector.broadcast %471 : vector<2x1xf32> to vector<2x16xf32>
    %549 = arith.mulf %548, %535 : vector<2x16xf32>
    %c10_79 = arith.constant 10 : index
    %c0_80 = arith.constant 0 : index
    %550 = vector.load %arg14[%c10_79, %c0_80] : memref<16x32xf32, #tpu.memory_space<vmem>>, vector<2x16xf32>
    tpu.vector_store %arg14[%c10_79, %c0_80], %510 {strides = array<i32>} : memref<16x32xf32, #tpu.memory_space<vmem>>, vector<2x16xf32>,
    %c4_81 = arith.constant 4 : index
    %c16_82 = arith.constant 16 : index
    %551 = vector.load %arg14[%c4_81, %c16_82] : memref<16x32xf32, #tpu.memory_space<vmem>>, vector<2x16xf32>
    tpu.vector_store %arg14[%c4_81, %c16_82], %549 {strides = array<i32>} : memref<16x32xf32, #tpu.memory_space<vmem>>, vector<2x16xf32>,
    %552 = tpu.concatenate %503, %542 in 1 : vector<2x16xf32>, vector<2x16xf32> -> vector<2x32xf32>
    %cst_83 = arith.constant dense<0.000000e+00> : vector<2x128xf32>
    %553 = tpu.matmul %552, %7, %cst_83 {dimension_numbers = #tpu.dot_dimension_numbers<[1], [0], [0], [1], [0, 0, 1, 1], [], []>} : vector<2x32xf32>, vector<32x128xf32>, vector<2x128xf32> -> vector<2x128xf32>
    %554 = vector.extract_strided_slice %553 {offsets = [0, 0], sizes = [2, 64], strides = [1, 1]} : vector<2x128xf32> to vector<2x64xf32>
    %555 = vector.extract_strided_slice %5 {offsets = [12, 0], sizes = [2, 64], strides = [1, 1]} : vector<16x128xf32> to vector<2x64xf32>
    %556 = arith.addf %554, %555 : vector<2x64xf32>
    %557 = vector.extract_strided_slice %553 {offsets = [0, 64], sizes = [2, 64], strides = [1, 1]} : vector<2x128xf32> to vector<2x64xf32>
    %558 = vector.extract_strided_slice %5 {offsets = [2, 64], sizes = [2, 64], strides = [1, 1]} : vector<16x128xf32> to vector<2x64xf32>
    %559 = arith.addf %557, %558 : vector<2x64xf32>
    %560 = vector.extract_strided_slice %6 {offsets = [12, 0], sizes = [2, 1], strides = [1, 1]} : vector<16x1xf32> to vector<2x1xf32>
    %561 = vector.extract_strided_slice %6 {offsets = [2, 0], sizes = [2, 1], strides = [1, 1]} : vector<16x1xf32> to vector<2x1xf32>
    %562 = vector.extract_strided_slice %556 {offsets = [0, 0], sizes = [2, 16], strides = [1, 1]} : vector<2x64xf32> to vector<2x16xf32>
    %563 = arith.negf %562 : vector<2x16xf32>
    %564 = math.exp %563 : vector<2x16xf32>
    %cst_84 = arith.constant 1.000000e+00 : f32
    %565 = vector.broadcast %cst_84 : f32 to vector<2x16xf32>
    %566 = arith.addf %565, %564 : vector<2x16xf32>
    %567 = arith.divf %565, %566 : vector<2x16xf32>
    %568 = vector.extract_strided_slice %556 {offsets = [0, 16], sizes = [2, 16], strides = [1, 1]} : vector<2x64xf32> to vector<2x16xf32>
    %569 = arith.negf %568 : vector<2x16xf32>
    %570 = math.exp %569 : vector<2x16xf32>
    %cst_85 = arith.constant 1.000000e+00 : f32
    %571 = vector.broadcast %cst_85 : f32 to vector<2x16xf32>
    %572 = arith.addf %571, %570 : vector<2x16xf32>
    %573 = arith.divf %571, %572 : vector<2x16xf32>
    %574 = vector.extract_strided_slice %556 {offsets = [0, 32], sizes = [2, 16], strides = [1, 1]} : vector<2x64xf32> to vector<2x16xf32>
    %575 = math.tanh %574 : vector<2x16xf32>
    %576 = vector.extract_strided_slice %556 {offsets = [0, 48], sizes = [2, 16], strides = [1, 1]} : vector<2x64xf32> to vector<2x16xf32>
    %577 = arith.negf %576 : vector<2x16xf32>
    %578 = math.exp %577 : vector<2x16xf32>
    %cst_86 = arith.constant 1.000000e+00 : f32
    %579 = vector.broadcast %cst_86 : f32 to vector<2x16xf32>
    %580 = arith.addf %579, %578 : vector<2x16xf32>
    %581 = arith.divf %579, %580 : vector<2x16xf32>
    %582 = arith.mulf %573, %508 : vector<2x16xf32>
    %583 = arith.mulf %567, %575 : vector<2x16xf32>
    %584 = arith.addf %582, %583 : vector<2x16xf32>
    %585 = math.tanh %584 : vector<2x16xf32>
    %586 = arith.mulf %581, %585 : vector<2x16xf32>
    %cst_87 = arith.constant 1.000000e+00 : f32
    %587 = vector.broadcast %cst_87 : f32 to vector<2x1xf32>
    %588 = arith.subf %587, %560 : vector<2x1xf32>
    %589 = vector.broadcast %560 : vector<2x1xf32> to vector<2x16xf32>
    %590 = arith.mulf %589, %586 : vector<2x16xf32>
    %591 = vector.broadcast %588 : vector<2x1xf32> to vector<2x16xf32>
    %592 = arith.mulf %591, %503 : vector<2x16xf32>
    %593 = arith.addf %590, %592 : vector<2x16xf32>
    %594 = vector.broadcast %560 : vector<2x1xf32> to vector<2x16xf32>
    %595 = arith.mulf %594, %584 : vector<2x16xf32>
    %596 = vector.broadcast %588 : vector<2x1xf32> to vector<2x16xf32>
    %597 = arith.mulf %596, %508 : vector<2x16xf32>
    %598 = arith.addf %595, %597 : vector<2x16xf32>
    %599 = vector.broadcast %560 : vector<2x1xf32> to vector<2x16xf32>
    %600 = arith.mulf %599, %586 : vector<2x16xf32>
    %601 = vector.extract_strided_slice %559 {offsets = [0, 0], sizes = [2, 16], strides = [1, 1]} : vector<2x64xf32> to vector<2x16xf32>
    %602 = arith.negf %601 : vector<2x16xf32>
    %603 = math.exp %602 : vector<2x16xf32>
    %cst_88 = arith.constant 1.000000e+00 : f32
    %604 = vector.broadcast %cst_88 : f32 to vector<2x16xf32>
    %605 = arith.addf %604, %603 : vector<2x16xf32>
    %606 = arith.divf %604, %605 : vector<2x16xf32>
    %607 = vector.extract_strided_slice %559 {offsets = [0, 16], sizes = [2, 16], strides = [1, 1]} : vector<2x64xf32> to vector<2x16xf32>
    %608 = arith.negf %607 : vector<2x16xf32>
    %609 = math.exp %608 : vector<2x16xf32>
    %cst_89 = arith.constant 1.000000e+00 : f32
    %610 = vector.broadcast %cst_89 : f32 to vector<2x16xf32>
    %611 = arith.addf %610, %609 : vector<2x16xf32>
    %612 = arith.divf %610, %611 : vector<2x16xf32>
    %613 = vector.extract_strided_slice %559 {offsets = [0, 32], sizes = [2, 16], strides = [1, 1]} : vector<2x64xf32> to vector<2x16xf32>
    %614 = math.tanh %613 : vector<2x16xf32>
    %615 = vector.extract_strided_slice %559 {offsets = [0, 48], sizes = [2, 16], strides = [1, 1]} : vector<2x64xf32> to vector<2x16xf32>
    %616 = arith.negf %615 : vector<2x16xf32>
    %617 = math.exp %616 : vector<2x16xf32>
    %cst_90 = arith.constant 1.000000e+00 : f32
    %618 = vector.broadcast %cst_90 : f32 to vector<2x16xf32>
    %619 = arith.addf %618, %617 : vector<2x16xf32>
    %620 = arith.divf %618, %619 : vector<2x16xf32>
    %621 = arith.mulf %612, %547 : vector<2x16xf32>
    %622 = arith.mulf %606, %614 : vector<2x16xf32>
    %623 = arith.addf %621, %622 : vector<2x16xf32>
    %624 = math.tanh %623 : vector<2x16xf32>
    %625 = arith.mulf %620, %624 : vector<2x16xf32>
    %cst_91 = arith.constant 1.000000e+00 : f32
    %626 = vector.broadcast %cst_91 : f32 to vector<2x1xf32>
    %627 = arith.subf %626, %561 : vector<2x1xf32>
    %628 = vector.broadcast %561 : vector<2x1xf32> to vector<2x16xf32>
    %629 = arith.mulf %628, %625 : vector<2x16xf32>
    %630 = vector.broadcast %627 : vector<2x1xf32> to vector<2x16xf32>
    %631 = arith.mulf %630, %542 : vector<2x16xf32>
    %632 = arith.addf %629, %631 : vector<2x16xf32>
    %633 = vector.broadcast %561 : vector<2x1xf32> to vector<2x16xf32>
    %634 = arith.mulf %633, %623 : vector<2x16xf32>
    %635 = vector.broadcast %627 : vector<2x1xf32> to vector<2x16xf32>
    %636 = arith.mulf %635, %547 : vector<2x16xf32>
    %637 = arith.addf %634, %636 : vector<2x16xf32>
    %638 = vector.broadcast %561 : vector<2x1xf32> to vector<2x16xf32>
    %639 = arith.mulf %638, %625 : vector<2x16xf32>
    %c12_92 = arith.constant 12 : index
    %c0_93 = arith.constant 0 : index
    %640 = vector.load %arg14[%c12_92, %c0_93] : memref<16x32xf32, #tpu.memory_space<vmem>>, vector<2x16xf32>
    tpu.vector_store %arg14[%c12_92, %c0_93], %600 {strides = array<i32>} : memref<16x32xf32, #tpu.memory_space<vmem>>, vector<2x16xf32>,
    %c2_94 = arith.constant 2 : index
    %c16_95 = arith.constant 16 : index
    %641 = vector.load %arg14[%c2_94, %c16_95] : memref<16x32xf32, #tpu.memory_space<vmem>>, vector<2x16xf32>
    tpu.vector_store %arg14[%c2_94, %c16_95], %639 {strides = array<i32>} : memref<16x32xf32, #tpu.memory_space<vmem>>, vector<2x16xf32>,
    %642 = tpu.concatenate %593, %632 in 1 : vector<2x16xf32>, vector<2x16xf32> -> vector<2x32xf32>
    %cst_96 = arith.constant dense<0.000000e+00> : vector<2x128xf32>
    %643 = tpu.matmul %642, %7, %cst_96 {dimension_numbers = #tpu.dot_dimension_numbers<[1], [0], [0], [1], [0, 0, 1, 1], [], []>} : vector<2x32xf32>, vector<32x128xf32>, vector<2x128xf32> -> vector<2x128xf32>
    %644 = vector.extract_strided_slice %643 {offsets = [0, 0], sizes = [2, 64], strides = [1, 1]} : vector<2x128xf32> to vector<2x64xf32>
    %645 = vector.extract_strided_slice %5 {offsets = [14, 0], sizes = [2, 64], strides = [1, 1]} : vector<16x128xf32> to vector<2x64xf32>
    %646 = arith.addf %644, %645 : vector<2x64xf32>
    %647 = vector.extract_strided_slice %643 {offsets = [0, 64], sizes = [2, 64], strides = [1, 1]} : vector<2x128xf32> to vector<2x64xf32>
    %648 = vector.extract_strided_slice %5 {offsets = [0, 64], sizes = [2, 64], strides = [1, 1]} : vector<16x128xf32> to vector<2x64xf32>
    %649 = arith.addf %647, %648 : vector<2x64xf32>
    %650 = vector.extract_strided_slice %6 {offsets = [14, 0], sizes = [2, 1], strides = [1, 1]} : vector<16x1xf32> to vector<2x1xf32>
    %651 = vector.extract_strided_slice %6 {offsets = [0, 0], sizes = [2, 1], strides = [1, 1]} : vector<16x1xf32> to vector<2x1xf32>
    %652 = vector.extract_strided_slice %646 {offsets = [0, 0], sizes = [2, 16], strides = [1, 1]} : vector<2x64xf32> to vector<2x16xf32>
    %653 = arith.negf %652 : vector<2x16xf32>
    %654 = math.exp %653 : vector<2x16xf32>
    %cst_97 = arith.constant 1.000000e+00 : f32
    %655 = vector.broadcast %cst_97 : f32 to vector<2x16xf32>
    %656 = arith.addf %655, %654 : vector<2x16xf32>
    %657 = arith.divf %655, %656 : vector<2x16xf32>
    %658 = vector.extract_strided_slice %646 {offsets = [0, 16], sizes = [2, 16], strides = [1, 1]} : vector<2x64xf32> to vector<2x16xf32>
    %659 = arith.negf %658 : vector<2x16xf32>
    %660 = math.exp %659 : vector<2x16xf32>
    %cst_98 = arith.constant 1.000000e+00 : f32
    %661 = vector.broadcast %cst_98 : f32 to vector<2x16xf32>
    %662 = arith.addf %661, %660 : vector<2x16xf32>
    %663 = arith.divf %661, %662 : vector<2x16xf32>
    %664 = vector.extract_strided_slice %646 {offsets = [0, 32], sizes = [2, 16], strides = [1, 1]} : vector<2x64xf32> to vector<2x16xf32>
    %665 = math.tanh %664 : vector<2x16xf32>
    %666 = vector.extract_strided_slice %646 {offsets = [0, 48], sizes = [2, 16], strides = [1, 1]} : vector<2x64xf32> to vector<2x16xf32>
    %667 = arith.negf %666 : vector<2x16xf32>
    %668 = math.exp %667 : vector<2x16xf32>
    %cst_99 = arith.constant 1.000000e+00 : f32
    %669 = vector.broadcast %cst_99 : f32 to vector<2x16xf32>
    %670 = arith.addf %669, %668 : vector<2x16xf32>
    %671 = arith.divf %669, %670 : vector<2x16xf32>
    %672 = arith.mulf %663, %598 : vector<2x16xf32>
    %673 = arith.mulf %657, %665 : vector<2x16xf32>
    %674 = arith.addf %672, %673 : vector<2x16xf32>
    %675 = math.tanh %674 : vector<2x16xf32>
    %676 = arith.mulf %671, %675 : vector<2x16xf32>
    %677 = vector.broadcast %650 : vector<2x1xf32> to vector<2x16xf32>
    %678 = arith.mulf %677, %676 : vector<2x16xf32>
    %679 = vector.extract_strided_slice %649 {offsets = [0, 0], sizes = [2, 16], strides = [1, 1]} : vector<2x64xf32> to vector<2x16xf32>
    %680 = arith.negf %679 : vector<2x16xf32>
    %681 = math.exp %680 : vector<2x16xf32>
    %cst_100 = arith.constant 1.000000e+00 : f32
    %682 = vector.broadcast %cst_100 : f32 to vector<2x16xf32>
    %683 = arith.addf %682, %681 : vector<2x16xf32>
    %684 = arith.divf %682, %683 : vector<2x16xf32>
    %685 = vector.extract_strided_slice %649 {offsets = [0, 16], sizes = [2, 16], strides = [1, 1]} : vector<2x64xf32> to vector<2x16xf32>
    %686 = arith.negf %685 : vector<2x16xf32>
    %687 = math.exp %686 : vector<2x16xf32>
    %cst_101 = arith.constant 1.000000e+00 : f32
    %688 = vector.broadcast %cst_101 : f32 to vector<2x16xf32>
    %689 = arith.addf %688, %687 : vector<2x16xf32>
    %690 = arith.divf %688, %689 : vector<2x16xf32>
    %691 = vector.extract_strided_slice %649 {offsets = [0, 32], sizes = [2, 16], strides = [1, 1]} : vector<2x64xf32> to vector<2x16xf32>
    %692 = math.tanh %691 : vector<2x16xf32>
    %693 = vector.extract_strided_slice %649 {offsets = [0, 48], sizes = [2, 16], strides = [1, 1]} : vector<2x64xf32> to vector<2x16xf32>
    %694 = arith.negf %693 : vector<2x16xf32>
    %695 = math.exp %694 : vector<2x16xf32>
    %cst_102 = arith.constant 1.000000e+00 : f32
    %696 = vector.broadcast %cst_102 : f32 to vector<2x16xf32>
    %697 = arith.addf %696, %695 : vector<2x16xf32>
    %698 = arith.divf %696, %697 : vector<2x16xf32>
    %699 = arith.mulf %690, %637 : vector<2x16xf32>
    %700 = arith.mulf %684, %692 : vector<2x16xf32>
    %701 = arith.addf %699, %700 : vector<2x16xf32>
    %702 = math.tanh %701 : vector<2x16xf32>
    %703 = arith.mulf %698, %702 : vector<2x16xf32>
    %704 = vector.broadcast %651 : vector<2x1xf32> to vector<2x16xf32>
    %705 = arith.mulf %704, %703 : vector<2x16xf32>
    %c14_103 = arith.constant 14 : index
    %c0_104 = arith.constant 0 : index
    %706 = vector.load %arg14[%c14_103, %c0_104] : memref<16x32xf32, #tpu.memory_space<vmem>>, vector<2x16xf32>
    tpu.vector_store %arg14[%c14_103, %c0_104], %678 {strides = array<i32>} : memref<16x32xf32, #tpu.memory_space<vmem>>, vector<2x16xf32>,
    %c0_105 = arith.constant 0 : index
    %c16_106 = arith.constant 16 : index
    %707 = vector.load %arg14[%c0_105, %c16_106] : memref<16x32xf32, #tpu.memory_space<vmem>>, vector<2x16xf32>
    tpu.vector_store %arg14[%c0_105, %c16_106], %705 {strides = array<i32>} : memref<16x32xf32, #tpu.memory_space<vmem>>, vector<2x16xf32>,
    %c0_107 = arith.constant 0 : index
    %c0_108 = arith.constant 0 : index
    %708 = vector.load %arg14[%c0_107, %c0_108] : memref<16x32xf32, #tpu.memory_space<vmem>>, vector<16x32xf32>
    %c0_109 = arith.constant 0 : index
    %c0_110 = arith.constant 0 : index
    %709 = vector.load %arg5[%c0_109, %c0_110] : memref<16x16xf32, #tpu.memory_space<vmem>>, vector<16x16xf32>
    %cst_111 = arith.constant dense<0.000000e+00> : vector<16x32xf32>
    %710 = tpu.matmul %709, %708, %cst_111 {dimension_numbers = #tpu.dot_dimension_numbers<[1], [0], [0], [1], [0, 0, 1, 1], [], []>} : vector<16x16xf32>, vector<16x32xf32>, vector<16x32xf32> -> vector<16x32xf32>
    %c0_112 = arith.constant 0 : index
    %c0_113 = arith.constant 0 : index
    %c0_114 = arith.constant 0 : index
    %711 = vector.load %arg6[%c0_112, %c0_113, %c0_114] : memref<2x32x32xf32, #tpu.memory_space<vmem>>, vector<1x32x32xf32>
    %712 = vector.shape_cast %711 : vector<1x32x32xf32> to vector<32x32xf32>
    %cst_115 = arith.constant dense<0.000000e+00> : vector<16x32xf32>
    %713 = tpu.matmul %710, %712, %cst_115 {dimension_numbers = #tpu.dot_dimension_numbers<[1], [0], [0], [1], [0, 0, 1, 1], [], []>} : vector<16x32xf32>, vector<32x32xf32>, vector<16x32xf32> -> vector<16x32xf32>
    %c0_116 = arith.constant 0 : index
    %c0_117 = arith.constant 0 : index
    %c0_118 = arith.constant 0 : index
    %714 = vector.load %arg7[%c0_116, %c0_117, %c0_118] : memref<2x1x32xf32, #tpu.memory_space<vmem>>, vector<1x1x32xf32>
    %715 = vector.shape_cast %714 : vector<1x1x32xf32> to vector<1x32xf32>
    %716 = vector.broadcast %715 : vector<1x32xf32> to vector<16x32xf32>
    %717 = arith.addf %713, %716 : vector<16x32xf32>
    %cst_119 = arith.constant 0.000000e+00 : f32
    %718 = vector.broadcast %cst_119 : f32 to vector<16x32xf32>
    %719 = arith.maximumf %717, %718 : vector<16x32xf32>
    %cst_120 = arith.constant dense<0.000000e+00> : vector<16x32xf32>
    %720 = tpu.matmul %709, %719, %cst_120 {dimension_numbers = #tpu.dot_dimension_numbers<[1], [0], [0], [1], [0, 0, 1, 1], [], []>} : vector<16x16xf32>, vector<16x32xf32>, vector<16x32xf32> -> vector<16x32xf32>
    %c1 = arith.constant 1 : index
    %c0_121 = arith.constant 0 : index
    %c0_122 = arith.constant 0 : index
    %721 = vector.load %arg6[%c1, %c0_121, %c0_122] : memref<2x32x32xf32, #tpu.memory_space<vmem>>, vector<1x32x32xf32>
    %722 = vector.shape_cast %721 : vector<1x32x32xf32> to vector<32x32xf32>
    %cst_123 = arith.constant dense<0.000000e+00> : vector<16x32xf32>
    %723 = tpu.matmul %720, %722, %cst_123 {dimension_numbers = #tpu.dot_dimension_numbers<[1], [0], [0], [1], [0, 0, 1, 1], [], []>} : vector<16x32xf32>, vector<32x32xf32>, vector<16x32xf32> -> vector<16x32xf32>
    %c1_124 = arith.constant 1 : index
    %c0_125 = arith.constant 0 : index
    %c0_126 = arith.constant 0 : index
    %724 = vector.load %arg7[%c1_124, %c0_125, %c0_126] : memref<2x1x32xf32, #tpu.memory_space<vmem>>, vector<1x1x32xf32>
    %725 = vector.shape_cast %724 : vector<1x1x32xf32> to vector<1x32xf32>
    %726 = vector.broadcast %725 : vector<1x32xf32> to vector<16x32xf32>
    %727 = arith.addf %723, %726 : vector<16x32xf32>
    %cst_127 = arith.constant 0.000000e+00 : f32
    %728 = vector.broadcast %cst_127 : f32 to vector<16x32xf32>
    %729 = arith.maximumf %727, %728 : vector<16x32xf32>
    %c0_128 = arith.constant 0 : index
    %c0_129 = arith.constant 0 : index
    %730 = vector.load %arg8[%c0_128, %c0_129] : memref<32x4xf32, #tpu.memory_space<vmem>>, vector<32x4xf32>
    %cst_130 = arith.constant dense<0.000000e+00> : vector<16x4xf32>
    %731 = tpu.matmul %729, %730, %cst_130 {dimension_numbers = #tpu.dot_dimension_numbers<[1], [0], [0], [1], [0, 0, 1, 1], [], []>} : vector<16x32xf32>, vector<32x4xf32>, vector<16x4xf32> -> vector<16x4xf32>
    %c0_131 = arith.constant 0 : index
    %c0_132 = arith.constant 0 : index
    %732 = vector.load %arg9[%c0_131, %c0_132] : memref<1x4xf32, #tpu.memory_space<vmem>>, vector<1x4xf32>
    %733 = vector.broadcast %732 : vector<1x4xf32> to vector<16x4xf32>
    %734 = arith.addf %731, %733 : vector<16x4xf32>
    %c0_133 = arith.constant 0 : index
    %c0_134 = arith.constant 0 : index
    %735 = vector.load %arg10[%c0_133, %c0_134] : memref<4x4xf32, #tpu.memory_space<vmem>>, vector<4x4xf32>
    %c0_135 = arith.constant 0 : index
    %c0_136 = arith.constant 0 : index
    %736 = vector.load %arg11[%c0_135, %c0_136] : memref<1x4xf32, #tpu.memory_space<vmem>>, vector<1x4xf32>
    %737 = vector.extract_strided_slice %734 {offsets = [0, 0], sizes = [2, 4], strides = [1, 1]} : vector<16x4xf32> to vector<2x4xf32>
    %738 = vector.broadcast %736 : vector<1x4xf32> to vector<2x4xf32>
    %739 = arith.addf %738, %737 : vector<2x4xf32>
    %cst_137 = arith.constant -1.000000e+30 : f32
    %740 = vector.broadcast %cst_137 : f32 to vector<2x4xf32>
    %c0_i32 = arith.constant 0 : i32
    %741 = vector.broadcast %c0_i32 : i32 to vector<2x4xi32>
    %742 = vector.extract_strided_slice %739 {offsets = [0, 0], sizes = [2, 1], strides = [1, 1]} : vector<2x4xf32> to vector<2x1xf32>
    %743 = vector.extract_strided_slice %735 {offsets = [0, 0], sizes = [1, 4], strides = [1, 1]} : vector<4x4xf32> to vector<1x4xf32>
    %744 = vector.broadcast %742 : vector<2x1xf32> to vector<2x4xf32>
    %745 = vector.broadcast %743 : vector<1x4xf32> to vector<2x4xf32>
    %746 = arith.addf %744, %745 : vector<2x4xf32>
    %747 = arith.cmpf ogt, %746, %740 : vector<2x4xf32>
    %748 = arith.select %747, %746, %740 : vector<2x4xi1>, vector<2x4xf32>
    %c0_i32_138 = arith.constant 0 : i32
    %749 = vector.broadcast %c0_i32_138 : i32 to vector<2x4xi32>
    %750 = arith.select %747, %749, %741 : vector<2x4xi1>, vector<2x4xi32>
    %751 = vector.extract_strided_slice %739 {offsets = [0, 1], sizes = [2, 1], strides = [1, 1]} : vector<2x4xf32> to vector<2x1xf32>
    %752 = vector.extract_strided_slice %735 {offsets = [1, 0], sizes = [1, 4], strides = [1, 1]} : vector<4x4xf32> to vector<1x4xf32>
    %753 = vector.broadcast %751 : vector<2x1xf32> to vector<2x4xf32>
    %754 = vector.broadcast %752 : vector<1x4xf32> to vector<2x4xf32>
    %755 = arith.addf %753, %754 : vector<2x4xf32>
    %756 = arith.cmpf ogt, %755, %748 : vector<2x4xf32>
    %757 = arith.select %756, %755, %748 : vector<2x4xi1>, vector<2x4xf32>
    %c1_i32 = arith.constant 1 : i32
    %758 = vector.broadcast %c1_i32 : i32 to vector<2x4xi32>
    %759 = arith.select %756, %758, %750 : vector<2x4xi1>, vector<2x4xi32>
    %760 = vector.extract_strided_slice %739 {offsets = [0, 2], sizes = [2, 1], strides = [1, 1]} : vector<2x4xf32> to vector<2x1xf32>
    %761 = vector.extract_strided_slice %735 {offsets = [2, 0], sizes = [1, 4], strides = [1, 1]} : vector<4x4xf32> to vector<1x4xf32>
    %762 = vector.broadcast %760 : vector<2x1xf32> to vector<2x4xf32>
    %763 = vector.broadcast %761 : vector<1x4xf32> to vector<2x4xf32>
    %764 = arith.addf %762, %763 : vector<2x4xf32>
    %765 = arith.cmpf ogt, %764, %757 : vector<2x4xf32>
    %766 = arith.select %765, %764, %757 : vector<2x4xi1>, vector<2x4xf32>
    %c2_i32 = arith.constant 2 : i32
    %767 = vector.broadcast %c2_i32 : i32 to vector<2x4xi32>
    %768 = arith.select %765, %767, %759 : vector<2x4xi1>, vector<2x4xi32>
    %769 = vector.extract_strided_slice %739 {offsets = [0, 3], sizes = [2, 1], strides = [1, 1]} : vector<2x4xf32> to vector<2x1xf32>
    %770 = vector.extract_strided_slice %735 {offsets = [3, 0], sizes = [1, 4], strides = [1, 1]} : vector<4x4xf32> to vector<1x4xf32>
    %771 = vector.broadcast %769 : vector<2x1xf32> to vector<2x4xf32>
    %772 = vector.broadcast %770 : vector<1x4xf32> to vector<2x4xf32>
    %773 = arith.addf %771, %772 : vector<2x4xf32>
    %774 = arith.cmpf ogt, %773, %766 : vector<2x4xf32>
    %775 = arith.select %774, %773, %766 : vector<2x4xi1>, vector<2x4xf32>
    %c3_i32 = arith.constant 3 : i32
    %776 = vector.broadcast %c3_i32 : i32 to vector<2x4xi32>
    %777 = arith.select %774, %776, %768 : vector<2x4xi1>, vector<2x4xi32>
    %778 = vector.extract_strided_slice %734 {offsets = [2, 0], sizes = [2, 4], strides = [1, 1]} : vector<16x4xf32> to vector<2x4xf32>
    %779 = arith.addf %775, %778 : vector<2x4xf32>
    %cst_139 = arith.constant -1.000000e+30 : f32
    %780 = vector.broadcast %cst_139 : f32 to vector<2x4xf32>
    %c0_i32_140 = arith.constant 0 : i32
    %781 = vector.broadcast %c0_i32_140 : i32 to vector<2x4xi32>
    %782 = vector.extract_strided_slice %779 {offsets = [0, 0], sizes = [2, 1], strides = [1, 1]} : vector<2x4xf32> to vector<2x1xf32>
    %783 = vector.extract_strided_slice %735 {offsets = [0, 0], sizes = [1, 4], strides = [1, 1]} : vector<4x4xf32> to vector<1x4xf32>
    %784 = vector.broadcast %782 : vector<2x1xf32> to vector<2x4xf32>
    %785 = vector.broadcast %783 : vector<1x4xf32> to vector<2x4xf32>
    %786 = arith.addf %784, %785 : vector<2x4xf32>
    %787 = arith.cmpf ogt, %786, %780 : vector<2x4xf32>
    %788 = arith.select %787, %786, %780 : vector<2x4xi1>, vector<2x4xf32>
    %c0_i32_141 = arith.constant 0 : i32
    %789 = vector.broadcast %c0_i32_141 : i32 to vector<2x4xi32>
    %790 = arith.select %787, %789, %781 : vector<2x4xi1>, vector<2x4xi32>
    %791 = vector.extract_strided_slice %779 {offsets = [0, 1], sizes = [2, 1], strides = [1, 1]} : vector<2x4xf32> to vector<2x1xf32>
    %792 = vector.extract_strided_slice %735 {offsets = [1, 0], sizes = [1, 4], strides = [1, 1]} : vector<4x4xf32> to vector<1x4xf32>
    %793 = vector.broadcast %791 : vector<2x1xf32> to vector<2x4xf32>
    %794 = vector.broadcast %792 : vector<1x4xf32> to vector<2x4xf32>
    %795 = arith.addf %793, %794 : vector<2x4xf32>
    %796 = arith.cmpf ogt, %795, %788 : vector<2x4xf32>
    %797 = arith.select %796, %795, %788 : vector<2x4xi1>, vector<2x4xf32>
    %c1_i32_142 = arith.constant 1 : i32
    %798 = vector.broadcast %c1_i32_142 : i32 to vector<2x4xi32>
    %799 = arith.select %796, %798, %790 : vector<2x4xi1>, vector<2x4xi32>
    %800 = vector.extract_strided_slice %779 {offsets = [0, 2], sizes = [2, 1], strides = [1, 1]} : vector<2x4xf32> to vector<2x1xf32>
    %801 = vector.extract_strided_slice %735 {offsets = [2, 0], sizes = [1, 4], strides = [1, 1]} : vector<4x4xf32> to vector<1x4xf32>
    %802 = vector.broadcast %800 : vector<2x1xf32> to vector<2x4xf32>
    %803 = vector.broadcast %801 : vector<1x4xf32> to vector<2x4xf32>
    %804 = arith.addf %802, %803 : vector<2x4xf32>
    %805 = arith.cmpf ogt, %804, %797 : vector<2x4xf32>
    %806 = arith.select %805, %804, %797 : vector<2x4xi1>, vector<2x4xf32>
    %c2_i32_143 = arith.constant 2 : i32
    %807 = vector.broadcast %c2_i32_143 : i32 to vector<2x4xi32>
    %808 = arith.select %805, %807, %799 : vector<2x4xi1>, vector<2x4xi32>
    %809 = vector.extract_strided_slice %779 {offsets = [0, 3], sizes = [2, 1], strides = [1, 1]} : vector<2x4xf32> to vector<2x1xf32>
    %810 = vector.extract_strided_slice %735 {offsets = [3, 0], sizes = [1, 4], strides = [1, 1]} : vector<4x4xf32> to vector<1x4xf32>
    %811 = vector.broadcast %809 : vector<2x1xf32> to vector<2x4xf32>
    %812 = vector.broadcast %810 : vector<1x4xf32> to vector<2x4xf32>
    %813 = arith.addf %811, %812 : vector<2x4xf32>
    %814 = arith.cmpf ogt, %813, %806 : vector<2x4xf32>
    %815 = arith.select %814, %813, %806 : vector<2x4xi1>, vector<2x4xf32>
    %c3_i32_144 = arith.constant 3 : i32
    %816 = vector.broadcast %c3_i32_144 : i32 to vector<2x4xi32>
    %817 = arith.select %814, %816, %808 : vector<2x4xi1>, vector<2x4xi32>
    %818 = vector.extract_strided_slice %734 {offsets = [4, 0], sizes = [2, 4], strides = [1, 1]} : vector<16x4xf32> to vector<2x4xf32>
    %819 = arith.addf %815, %818 : vector<2x4xf32>
    %cst_145 = arith.constant -1.000000e+30 : f32
    %820 = vector.broadcast %cst_145 : f32 to vector<2x4xf32>
    %c0_i32_146 = arith.constant 0 : i32
    %821 = vector.broadcast %c0_i32_146 : i32 to vector<2x4xi32>
    %822 = vector.extract_strided_slice %819 {offsets = [0, 0], sizes = [2, 1], strides = [1, 1]} : vector<2x4xf32> to vector<2x1xf32>
    %823 = vector.extract_strided_slice %735 {offsets = [0, 0], sizes = [1, 4], strides = [1, 1]} : vector<4x4xf32> to vector<1x4xf32>
    %824 = vector.broadcast %822 : vector<2x1xf32> to vector<2x4xf32>
    %825 = vector.broadcast %823 : vector<1x4xf32> to vector<2x4xf32>
    %826 = arith.addf %824, %825 : vector<2x4xf32>
    %827 = arith.cmpf ogt, %826, %820 : vector<2x4xf32>
    %828 = arith.select %827, %826, %820 : vector<2x4xi1>, vector<2x4xf32>
    %c0_i32_147 = arith.constant 0 : i32
    %829 = vector.broadcast %c0_i32_147 : i32 to vector<2x4xi32>
    %830 = arith.select %827, %829, %821 : vector<2x4xi1>, vector<2x4xi32>
    %831 = vector.extract_strided_slice %819 {offsets = [0, 1], sizes = [2, 1], strides = [1, 1]} : vector<2x4xf32> to vector<2x1xf32>
    %832 = vector.extract_strided_slice %735 {offsets = [1, 0], sizes = [1, 4], strides = [1, 1]} : vector<4x4xf32> to vector<1x4xf32>
    %833 = vector.broadcast %831 : vector<2x1xf32> to vector<2x4xf32>
    %834 = vector.broadcast %832 : vector<1x4xf32> to vector<2x4xf32>
    %835 = arith.addf %833, %834 : vector<2x4xf32>
    %836 = arith.cmpf ogt, %835, %828 : vector<2x4xf32>
    %837 = arith.select %836, %835, %828 : vector<2x4xi1>, vector<2x4xf32>
    %c1_i32_148 = arith.constant 1 : i32
    %838 = vector.broadcast %c1_i32_148 : i32 to vector<2x4xi32>
    %839 = arith.select %836, %838, %830 : vector<2x4xi1>, vector<2x4xi32>
    %840 = vector.extract_strided_slice %819 {offsets = [0, 2], sizes = [2, 1], strides = [1, 1]} : vector<2x4xf32> to vector<2x1xf32>
    %841 = vector.extract_strided_slice %735 {offsets = [2, 0], sizes = [1, 4], strides = [1, 1]} : vector<4x4xf32> to vector<1x4xf32>
    %842 = vector.broadcast %840 : vector<2x1xf32> to vector<2x4xf32>
    %843 = vector.broadcast %841 : vector<1x4xf32> to vector<2x4xf32>
    %844 = arith.addf %842, %843 : vector<2x4xf32>
    %845 = arith.cmpf ogt, %844, %837 : vector<2x4xf32>
    %846 = arith.select %845, %844, %837 : vector<2x4xi1>, vector<2x4xf32>
    %c2_i32_149 = arith.constant 2 : i32
    %847 = vector.broadcast %c2_i32_149 : i32 to vector<2x4xi32>
    %848 = arith.select %845, %847, %839 : vector<2x4xi1>, vector<2x4xi32>
    %849 = vector.extract_strided_slice %819 {offsets = [0, 3], sizes = [2, 1], strides = [1, 1]} : vector<2x4xf32> to vector<2x1xf32>
    %850 = vector.extract_strided_slice %735 {offsets = [3, 0], sizes = [1, 4], strides = [1, 1]} : vector<4x4xf32> to vector<1x4xf32>
    %851 = vector.broadcast %849 : vector<2x1xf32> to vector<2x4xf32>
    %852 = vector.broadcast %850 : vector<1x4xf32> to vector<2x4xf32>
    %853 = arith.addf %851, %852 : vector<2x4xf32>
    %854 = arith.cmpf ogt, %853, %846 : vector<2x4xf32>
    %855 = arith.select %854, %853, %846 : vector<2x4xi1>, vector<2x4xf32>
    %c3_i32_150 = arith.constant 3 : i32
    %856 = vector.broadcast %c3_i32_150 : i32 to vector<2x4xi32>
    %857 = arith.select %854, %856, %848 : vector<2x4xi1>, vector<2x4xi32>
    %858 = vector.extract_strided_slice %734 {offsets = [6, 0], sizes = [2, 4], strides = [1, 1]} : vector<16x4xf32> to vector<2x4xf32>
    %859 = arith.addf %855, %858 : vector<2x4xf32>
    %cst_151 = arith.constant -1.000000e+30 : f32
    %860 = vector.broadcast %cst_151 : f32 to vector<2x4xf32>
    %c0_i32_152 = arith.constant 0 : i32
    %861 = vector.broadcast %c0_i32_152 : i32 to vector<2x4xi32>
    %862 = vector.extract_strided_slice %859 {offsets = [0, 0], sizes = [2, 1], strides = [1, 1]} : vector<2x4xf32> to vector<2x1xf32>
    %863 = vector.extract_strided_slice %735 {offsets = [0, 0], sizes = [1, 4], strides = [1, 1]} : vector<4x4xf32> to vector<1x4xf32>
    %864 = vector.broadcast %862 : vector<2x1xf32> to vector<2x4xf32>
    %865 = vector.broadcast %863 : vector<1x4xf32> to vector<2x4xf32>
    %866 = arith.addf %864, %865 : vector<2x4xf32>
    %867 = arith.cmpf ogt, %866, %860 : vector<2x4xf32>
    %868 = arith.select %867, %866, %860 : vector<2x4xi1>, vector<2x4xf32>
    %c0_i32_153 = arith.constant 0 : i32
    %869 = vector.broadcast %c0_i32_153 : i32 to vector<2x4xi32>
    %870 = arith.select %867, %869, %861 : vector<2x4xi1>, vector<2x4xi32>
    %871 = vector.extract_strided_slice %859 {offsets = [0, 1], sizes = [2, 1], strides = [1, 1]} : vector<2x4xf32> to vector<2x1xf32>
    %872 = vector.extract_strided_slice %735 {offsets = [1, 0], sizes = [1, 4], strides = [1, 1]} : vector<4x4xf32> to vector<1x4xf32>
    %873 = vector.broadcast %871 : vector<2x1xf32> to vector<2x4xf32>
    %874 = vector.broadcast %872 : vector<1x4xf32> to vector<2x4xf32>
    %875 = arith.addf %873, %874 : vector<2x4xf32>
    %876 = arith.cmpf ogt, %875, %868 : vector<2x4xf32>
    %877 = arith.select %876, %875, %868 : vector<2x4xi1>, vector<2x4xf32>
    %c1_i32_154 = arith.constant 1 : i32
    %878 = vector.broadcast %c1_i32_154 : i32 to vector<2x4xi32>
    %879 = arith.select %876, %878, %870 : vector<2x4xi1>, vector<2x4xi32>
    %880 = vector.extract_strided_slice %859 {offsets = [0, 2], sizes = [2, 1], strides = [1, 1]} : vector<2x4xf32> to vector<2x1xf32>
    %881 = vector.extract_strided_slice %735 {offsets = [2, 0], sizes = [1, 4], strides = [1, 1]} : vector<4x4xf32> to vector<1x4xf32>
    %882 = vector.broadcast %880 : vector<2x1xf32> to vector<2x4xf32>
    %883 = vector.broadcast %881 : vector<1x4xf32> to vector<2x4xf32>
    %884 = arith.addf %882, %883 : vector<2x4xf32>
    %885 = arith.cmpf ogt, %884, %877 : vector<2x4xf32>
    %886 = arith.select %885, %884, %877 : vector<2x4xi1>, vector<2x4xf32>
    %c2_i32_155 = arith.constant 2 : i32
    %887 = vector.broadcast %c2_i32_155 : i32 to vector<2x4xi32>
    %888 = arith.select %885, %887, %879 : vector<2x4xi1>, vector<2x4xi32>
    %889 = vector.extract_strided_slice %859 {offsets = [0, 3], sizes = [2, 1], strides = [1, 1]} : vector<2x4xf32> to vector<2x1xf32>
    %890 = vector.extract_strided_slice %735 {offsets = [3, 0], sizes = [1, 4], strides = [1, 1]} : vector<4x4xf32> to vector<1x4xf32>
    %891 = vector.broadcast %889 : vector<2x1xf32> to vector<2x4xf32>
    %892 = vector.broadcast %890 : vector<1x4xf32> to vector<2x4xf32>
    %893 = arith.addf %891, %892 : vector<2x4xf32>
    %894 = arith.cmpf ogt, %893, %886 : vector<2x4xf32>
    %895 = arith.select %894, %893, %886 : vector<2x4xi1>, vector<2x4xf32>
    %c3_i32_156 = arith.constant 3 : i32
    %896 = vector.broadcast %c3_i32_156 : i32 to vector<2x4xi32>
    %897 = arith.select %894, %896, %888 : vector<2x4xi1>, vector<2x4xi32>
    %898 = vector.extract_strided_slice %734 {offsets = [8, 0], sizes = [2, 4], strides = [1, 1]} : vector<16x4xf32> to vector<2x4xf32>
    %899 = arith.addf %895, %898 : vector<2x4xf32>
    %cst_157 = arith.constant -1.000000e+30 : f32
    %900 = vector.broadcast %cst_157 : f32 to vector<2x4xf32>
    %c0_i32_158 = arith.constant 0 : i32
    %901 = vector.broadcast %c0_i32_158 : i32 to vector<2x4xi32>
    %902 = vector.extract_strided_slice %899 {offsets = [0, 0], sizes = [2, 1], strides = [1, 1]} : vector<2x4xf32> to vector<2x1xf32>
    %903 = vector.extract_strided_slice %735 {offsets = [0, 0], sizes = [1, 4], strides = [1, 1]} : vector<4x4xf32> to vector<1x4xf32>
    %904 = vector.broadcast %902 : vector<2x1xf32> to vector<2x4xf32>
    %905 = vector.broadcast %903 : vector<1x4xf32> to vector<2x4xf32>
    %906 = arith.addf %904, %905 : vector<2x4xf32>
    %907 = arith.cmpf ogt, %906, %900 : vector<2x4xf32>
    %908 = arith.select %907, %906, %900 : vector<2x4xi1>, vector<2x4xf32>
    %c0_i32_159 = arith.constant 0 : i32
    %909 = vector.broadcast %c0_i32_159 : i32 to vector<2x4xi32>
    %910 = arith.select %907, %909, %901 : vector<2x4xi1>, vector<2x4xi32>
    %911 = vector.extract_strided_slice %899 {offsets = [0, 1], sizes = [2, 1], strides = [1, 1]} : vector<2x4xf32> to vector<2x1xf32>
    %912 = vector.extract_strided_slice %735 {offsets = [1, 0], sizes = [1, 4], strides = [1, 1]} : vector<4x4xf32> to vector<1x4xf32>
    %913 = vector.broadcast %911 : vector<2x1xf32> to vector<2x4xf32>
    %914 = vector.broadcast %912 : vector<1x4xf32> to vector<2x4xf32>
    %915 = arith.addf %913, %914 : vector<2x4xf32>
    %916 = arith.cmpf ogt, %915, %908 : vector<2x4xf32>
    %917 = arith.select %916, %915, %908 : vector<2x4xi1>, vector<2x4xf32>
    %c1_i32_160 = arith.constant 1 : i32
    %918 = vector.broadcast %c1_i32_160 : i32 to vector<2x4xi32>
    %919 = arith.select %916, %918, %910 : vector<2x4xi1>, vector<2x4xi32>
    %920 = vector.extract_strided_slice %899 {offsets = [0, 2], sizes = [2, 1], strides = [1, 1]} : vector<2x4xf32> to vector<2x1xf32>
    %921 = vector.extract_strided_slice %735 {offsets = [2, 0], sizes = [1, 4], strides = [1, 1]} : vector<4x4xf32> to vector<1x4xf32>
    %922 = vector.broadcast %920 : vector<2x1xf32> to vector<2x4xf32>
    %923 = vector.broadcast %921 : vector<1x4xf32> to vector<2x4xf32>
    %924 = arith.addf %922, %923 : vector<2x4xf32>
    %925 = arith.cmpf ogt, %924, %917 : vector<2x4xf32>
    %926 = arith.select %925, %924, %917 : vector<2x4xi1>, vector<2x4xf32>
    %c2_i32_161 = arith.constant 2 : i32
    %927 = vector.broadcast %c2_i32_161 : i32 to vector<2x4xi32>
    %928 = arith.select %925, %927, %919 : vector<2x4xi1>, vector<2x4xi32>
    %929 = vector.extract_strided_slice %899 {offsets = [0, 3], sizes = [2, 1], strides = [1, 1]} : vector<2x4xf32> to vector<2x1xf32>
    %930 = vector.extract_strided_slice %735 {offsets = [3, 0], sizes = [1, 4], strides = [1, 1]} : vector<4x4xf32> to vector<1x4xf32>
    %931 = vector.broadcast %929 : vector<2x1xf32> to vector<2x4xf32>
    %932 = vector.broadcast %930 : vector<1x4xf32> to vector<2x4xf32>
    %933 = arith.addf %931, %932 : vector<2x4xf32>
    %934 = arith.cmpf ogt, %933, %926 : vector<2x4xf32>
    %935 = arith.select %934, %933, %926 : vector<2x4xi1>, vector<2x4xf32>
    %c3_i32_162 = arith.constant 3 : i32
    %936 = vector.broadcast %c3_i32_162 : i32 to vector<2x4xi32>
    %937 = arith.select %934, %936, %928 : vector<2x4xi1>, vector<2x4xi32>
    %938 = vector.extract_strided_slice %734 {offsets = [10, 0], sizes = [2, 4], strides = [1, 1]} : vector<16x4xf32> to vector<2x4xf32>
    %939 = arith.addf %935, %938 : vector<2x4xf32>
    %cst_163 = arith.constant -1.000000e+30 : f32
    %940 = vector.broadcast %cst_163 : f32 to vector<2x4xf32>
    %c0_i32_164 = arith.constant 0 : i32
    %941 = vector.broadcast %c0_i32_164 : i32 to vector<2x4xi32>
    %942 = vector.extract_strided_slice %939 {offsets = [0, 0], sizes = [2, 1], strides = [1, 1]} : vector<2x4xf32> to vector<2x1xf32>
    %943 = vector.extract_strided_slice %735 {offsets = [0, 0], sizes = [1, 4], strides = [1, 1]} : vector<4x4xf32> to vector<1x4xf32>
    %944 = vector.broadcast %942 : vector<2x1xf32> to vector<2x4xf32>
    %945 = vector.broadcast %943 : vector<1x4xf32> to vector<2x4xf32>
    %946 = arith.addf %944, %945 : vector<2x4xf32>
    %947 = arith.cmpf ogt, %946, %940 : vector<2x4xf32>
    %948 = arith.select %947, %946, %940 : vector<2x4xi1>, vector<2x4xf32>
    %c0_i32_165 = arith.constant 0 : i32
    %949 = vector.broadcast %c0_i32_165 : i32 to vector<2x4xi32>
    %950 = arith.select %947, %949, %941 : vector<2x4xi1>, vector<2x4xi32>
    %951 = vector.extract_strided_slice %939 {offsets = [0, 1], sizes = [2, 1], strides = [1, 1]} : vector<2x4xf32> to vector<2x1xf32>
    %952 = vector.extract_strided_slice %735 {offsets = [1, 0], sizes = [1, 4], strides = [1, 1]} : vector<4x4xf32> to vector<1x4xf32>
    %953 = vector.broadcast %951 : vector<2x1xf32> to vector<2x4xf32>
    %954 = vector.broadcast %952 : vector<1x4xf32> to vector<2x4xf32>
    %955 = arith.addf %953, %954 : vector<2x4xf32>
    %956 = arith.cmpf ogt, %955, %948 : vector<2x4xf32>
    %957 = arith.select %956, %955, %948 : vector<2x4xi1>, vector<2x4xf32>
    %c1_i32_166 = arith.constant 1 : i32
    %958 = vector.broadcast %c1_i32_166 : i32 to vector<2x4xi32>
    %959 = arith.select %956, %958, %950 : vector<2x4xi1>, vector<2x4xi32>
    %960 = vector.extract_strided_slice %939 {offsets = [0, 2], sizes = [2, 1], strides = [1, 1]} : vector<2x4xf32> to vector<2x1xf32>
    %961 = vector.extract_strided_slice %735 {offsets = [2, 0], sizes = [1, 4], strides = [1, 1]} : vector<4x4xf32> to vector<1x4xf32>
    %962 = vector.broadcast %960 : vector<2x1xf32> to vector<2x4xf32>
    %963 = vector.broadcast %961 : vector<1x4xf32> to vector<2x4xf32>
    %964 = arith.addf %962, %963 : vector<2x4xf32>
    %965 = arith.cmpf ogt, %964, %957 : vector<2x4xf32>
    %966 = arith.select %965, %964, %957 : vector<2x4xi1>, vector<2x4xf32>
    %c2_i32_167 = arith.constant 2 : i32
    %967 = vector.broadcast %c2_i32_167 : i32 to vector<2x4xi32>
    %968 = arith.select %965, %967, %959 : vector<2x4xi1>, vector<2x4xi32>
    %969 = vector.extract_strided_slice %939 {offsets = [0, 3], sizes = [2, 1], strides = [1, 1]} : vector<2x4xf32> to vector<2x1xf32>
    %970 = vector.extract_strided_slice %735 {offsets = [3, 0], sizes = [1, 4], strides = [1, 1]} : vector<4x4xf32> to vector<1x4xf32>
    %971 = vector.broadcast %969 : vector<2x1xf32> to vector<2x4xf32>
    %972 = vector.broadcast %970 : vector<1x4xf32> to vector<2x4xf32>
    %973 = arith.addf %971, %972 : vector<2x4xf32>
    %974 = arith.cmpf ogt, %973, %966 : vector<2x4xf32>
    %975 = arith.select %974, %973, %966 : vector<2x4xi1>, vector<2x4xf32>
    %c3_i32_168 = arith.constant 3 : i32
    %976 = vector.broadcast %c3_i32_168 : i32 to vector<2x4xi32>
    %977 = arith.select %974, %976, %968 : vector<2x4xi1>, vector<2x4xi32>
    %978 = vector.extract_strided_slice %734 {offsets = [12, 0], sizes = [2, 4], strides = [1, 1]} : vector<16x4xf32> to vector<2x4xf32>
    %979 = arith.addf %975, %978 : vector<2x4xf32>
    %cst_169 = arith.constant -1.000000e+30 : f32
    %980 = vector.broadcast %cst_169 : f32 to vector<2x4xf32>
    %c0_i32_170 = arith.constant 0 : i32
    %981 = vector.broadcast %c0_i32_170 : i32 to vector<2x4xi32>
    %982 = vector.extract_strided_slice %979 {offsets = [0, 0], sizes = [2, 1], strides = [1, 1]} : vector<2x4xf32> to vector<2x1xf32>
    %983 = vector.extract_strided_slice %735 {offsets = [0, 0], sizes = [1, 4], strides = [1, 1]} : vector<4x4xf32> to vector<1x4xf32>
    %984 = vector.broadcast %982 : vector<2x1xf32> to vector<2x4xf32>
    %985 = vector.broadcast %983 : vector<1x4xf32> to vector<2x4xf32>
    %986 = arith.addf %984, %985 : vector<2x4xf32>
    %987 = arith.cmpf ogt, %986, %980 : vector<2x4xf32>
    %988 = arith.select %987, %986, %980 : vector<2x4xi1>, vector<2x4xf32>
    %c0_i32_171 = arith.constant 0 : i32
    %989 = vector.broadcast %c0_i32_171 : i32 to vector<2x4xi32>
    %990 = arith.select %987, %989, %981 : vector<2x4xi1>, vector<2x4xi32>
    %991 = vector.extract_strided_slice %979 {offsets = [0, 1], sizes = [2, 1], strides = [1, 1]} : vector<2x4xf32> to vector<2x1xf32>
    %992 = vector.extract_strided_slice %735 {offsets = [1, 0], sizes = [1, 4], strides = [1, 1]} : vector<4x4xf32> to vector<1x4xf32>
    %993 = vector.broadcast %991 : vector<2x1xf32> to vector<2x4xf32>
    %994 = vector.broadcast %992 : vector<1x4xf32> to vector<2x4xf32>
    %995 = arith.addf %993, %994 : vector<2x4xf32>
    %996 = arith.cmpf ogt, %995, %988 : vector<2x4xf32>
    %997 = arith.select %996, %995, %988 : vector<2x4xi1>, vector<2x4xf32>
    %c1_i32_172 = arith.constant 1 : i32
    %998 = vector.broadcast %c1_i32_172 : i32 to vector<2x4xi32>
    %999 = arith.select %996, %998, %990 : vector<2x4xi1>, vector<2x4xi32>
    %1000 = vector.extract_strided_slice %979 {offsets = [0, 2], sizes = [2, 1], strides = [1, 1]} : vector<2x4xf32> to vector<2x1xf32>
    %1001 = vector.extract_strided_slice %735 {offsets = [2, 0], sizes = [1, 4], strides = [1, 1]} : vector<4x4xf32> to vector<1x4xf32>
    %1002 = vector.broadcast %1000 : vector<2x1xf32> to vector<2x4xf32>
    %1003 = vector.broadcast %1001 : vector<1x4xf32> to vector<2x4xf32>
    %1004 = arith.addf %1002, %1003 : vector<2x4xf32>
    %1005 = arith.cmpf ogt, %1004, %997 : vector<2x4xf32>
    %1006 = arith.select %1005, %1004, %997 : vector<2x4xi1>, vector<2x4xf32>
    %c2_i32_173 = arith.constant 2 : i32
    %1007 = vector.broadcast %c2_i32_173 : i32 to vector<2x4xi32>
    %1008 = arith.select %1005, %1007, %999 : vector<2x4xi1>, vector<2x4xi32>
    %1009 = vector.extract_strided_slice %979 {offsets = [0, 3], sizes = [2, 1], strides = [1, 1]} : vector<2x4xf32> to vector<2x1xf32>
    %1010 = vector.extract_strided_slice %735 {offsets = [3, 0], sizes = [1, 4], strides = [1, 1]} : vector<4x4xf32> to vector<1x4xf32>
    %1011 = vector.broadcast %1009 : vector<2x1xf32> to vector<2x4xf32>
    %1012 = vector.broadcast %1010 : vector<1x4xf32> to vector<2x4xf32>
    %1013 = arith.addf %1011, %1012 : vector<2x4xf32>
    %1014 = arith.cmpf ogt, %1013, %1006 : vector<2x4xf32>
    %1015 = arith.select %1014, %1013, %1006 : vector<2x4xi1>, vector<2x4xf32>
    %c3_i32_174 = arith.constant 3 : i32
    %1016 = vector.broadcast %c3_i32_174 : i32 to vector<2x4xi32>
    %1017 = arith.select %1014, %1016, %1008 : vector<2x4xi1>, vector<2x4xi32>
    %1018 = vector.extract_strided_slice %734 {offsets = [14, 0], sizes = [2, 4], strides = [1, 1]} : vector<16x4xf32> to vector<2x4xf32>
    %1019 = arith.addf %1015, %1018 : vector<2x4xf32>
    %c0_175 = arith.constant 0 : index
    %c0_176 = arith.constant 0 : index
    %1020 = vector.load %arg12[%c0_175, %c0_176] : memref<1x4xf32, #tpu.memory_space<vmem>>, vector<1x4xf32>
    %1021 = vector.broadcast %1020 : vector<1x4xf32> to vector<2x4xf32>
    %1022 = arith.addf %1019, %1021 : vector<2x4xf32>
    %1023 = tpu.iota {dimensions = array<i32: 1>} : vector<2x4xi32>
    %1024 = arith.sitofp %1023 : vector<2x4xi32> to vector<2x4xf32>
    %cst_177 = arith.constant dense<0xFF800000> : vector<2xf32>
    %1025 = vector.multi_reduction <maximumf>, %1022, %cst_177 [1] : vector<2x4xf32> to vector<2xf32>
    %1026 = vector.shape_cast %1025 : vector<2xf32> to vector<2x1xf32>
    %1027 = vector.broadcast %1026 : vector<2x1xf32> to vector<2x4xf32>
    %1028 = arith.cmpf oeq, %1022, %1027 : vector<2x4xf32>
    %cst_178 = arith.constant 4.000000e+00 : f32
    %1029 = vector.broadcast %cst_178 : f32 to vector<2x4xf32>
    %1030 = arith.select %1028, %1024, %1029 : vector<2x4xi1>, vector<2x4xf32>
    %cst_179 = arith.constant dense<0x7F800000> : vector<2xf32>
    %1031 = vector.multi_reduction <minimumf>, %1030, %cst_179 [1] : vector<2x4xf32> to vector<2xf32>
    %1032 = vector.shape_cast %1031 : vector<2xf32> to vector<2x1xf32>
    %1033 = arith.fptosi %1032 : vector<2x1xf32> to vector<2x1xi32>
    %c0_180 = arith.constant 0 : index
    %c7 = arith.constant 7 : index
    %1034 = vector.load %arg13[%c0_180, %c7] : memref<2x8xi32, #tpu.memory_space<vmem>>, vector<2x1xi32>
    tpu.vector_store %arg13[%c0_180, %c7], %1033 {strides = array<i32>} : memref<2x8xi32, #tpu.memory_space<vmem>>, vector<2x1xi32>,
    %1035 = vector.broadcast %1033 : vector<2x1xi32> to vector<2x4xi32>
    %1036 = arith.cmpi eq, %1023, %1035 : vector<2x4xi32>
    %1037 = arith.sitofp %1017 : vector<2x4xi32> to vector<2x4xf32>
    %cst_181 = arith.constant 0.000000e+00 : f32
    %1038 = vector.broadcast %cst_181 : f32 to vector<2x4xf32>
    %1039 = arith.select %1036, %1037, %1038 : vector<2x4xi1>, vector<2x4xf32>
    %cst_182 = arith.constant dense<0.000000e+00> : vector<2xf32>
    %1040 = vector.multi_reduction <add>, %1039, %cst_182 [1] : vector<2x4xf32> to vector<2xf32>
    %1041 = vector.shape_cast %1040 : vector<2xf32> to vector<2x1xf32>
    %1042 = arith.fptosi %1041 : vector<2x1xf32> to vector<2x1xi32>
    %c0_183 = arith.constant 0 : index
    %c6_184 = arith.constant 6 : index
    %1043 = vector.load %arg13[%c0_183, %c6_184] : memref<2x8xi32, #tpu.memory_space<vmem>>, vector<2x1xi32>
    tpu.vector_store %arg13[%c0_183, %c6_184], %1042 {strides = array<i32>} : memref<2x8xi32, #tpu.memory_space<vmem>>, vector<2x1xi32>,
    %1044 = vector.broadcast %1042 : vector<2x1xi32> to vector<2x4xi32>
    %1045 = arith.cmpi eq, %1023, %1044 : vector<2x4xi32>
    %1046 = arith.sitofp %977 : vector<2x4xi32> to vector<2x4xf32>
    %cst_185 = arith.constant 0.000000e+00 : f32
    %1047 = vector.broadcast %cst_185 : f32 to vector<2x4xf32>
    %1048 = arith.select %1045, %1046, %1047 : vector<2x4xi1>, vector<2x4xf32>
    %cst_186 = arith.constant dense<0.000000e+00> : vector<2xf32>
    %1049 = vector.multi_reduction <add>, %1048, %cst_186 [1] : vector<2x4xf32> to vector<2xf32>
    %1050 = vector.shape_cast %1049 : vector<2xf32> to vector<2x1xf32>
    %1051 = arith.fptosi %1050 : vector<2x1xf32> to vector<2x1xi32>
    %c0_187 = arith.constant 0 : index
    %c5 = arith.constant 5 : index
    %1052 = vector.load %arg13[%c0_187, %c5] : memref<2x8xi32, #tpu.memory_space<vmem>>, vector<2x1xi32>
    tpu.vector_store %arg13[%c0_187, %c5], %1051 {strides = array<i32>} : memref<2x8xi32, #tpu.memory_space<vmem>>, vector<2x1xi32>,
    %1053 = vector.broadcast %1051 : vector<2x1xi32> to vector<2x4xi32>
    %1054 = arith.cmpi eq, %1023, %1053 : vector<2x4xi32>
    %1055 = arith.sitofp %937 : vector<2x4xi32> to vector<2x4xf32>
    %cst_188 = arith.constant 0.000000e+00 : f32
    %1056 = vector.broadcast %cst_188 : f32 to vector<2x4xf32>
    %1057 = arith.select %1054, %1055, %1056 : vector<2x4xi1>, vector<2x4xf32>
    %cst_189 = arith.constant dense<0.000000e+00> : vector<2xf32>
    %1058 = vector.multi_reduction <add>, %1057, %cst_189 [1] : vector<2x4xf32> to vector<2xf32>
    %1059 = vector.shape_cast %1058 : vector<2xf32> to vector<2x1xf32>
    %1060 = arith.fptosi %1059 : vector<2x1xf32> to vector<2x1xi32>
    %c0_190 = arith.constant 0 : index
    %c4_191 = arith.constant 4 : index
    %1061 = vector.load %arg13[%c0_190, %c4_191] : memref<2x8xi32, #tpu.memory_space<vmem>>, vector<2x1xi32>
    tpu.vector_store %arg13[%c0_190, %c4_191], %1060 {strides = array<i32>} : memref<2x8xi32, #tpu.memory_space<vmem>>, vector<2x1xi32>,
    %1062 = vector.broadcast %1060 : vector<2x1xi32> to vector<2x4xi32>
    %1063 = arith.cmpi eq, %1023, %1062 : vector<2x4xi32>
    %1064 = arith.sitofp %897 : vector<2x4xi32> to vector<2x4xf32>
    %cst_192 = arith.constant 0.000000e+00 : f32
    %1065 = vector.broadcast %cst_192 : f32 to vector<2x4xf32>
    %1066 = arith.select %1063, %1064, %1065 : vector<2x4xi1>, vector<2x4xf32>
    %cst_193 = arith.constant dense<0.000000e+00> : vector<2xf32>
    %1067 = vector.multi_reduction <add>, %1066, %cst_193 [1] : vector<2x4xf32> to vector<2xf32>
    %1068 = vector.shape_cast %1067 : vector<2xf32> to vector<2x1xf32>
    %1069 = arith.fptosi %1068 : vector<2x1xf32> to vector<2x1xi32>
    %c0_194 = arith.constant 0 : index
    %c3 = arith.constant 3 : index
    %1070 = vector.load %arg13[%c0_194, %c3] : memref<2x8xi32, #tpu.memory_space<vmem>>, vector<2x1xi32>
    tpu.vector_store %arg13[%c0_194, %c3], %1069 {strides = array<i32>} : memref<2x8xi32, #tpu.memory_space<vmem>>, vector<2x1xi32>,
    %1071 = vector.broadcast %1069 : vector<2x1xi32> to vector<2x4xi32>
    %1072 = arith.cmpi eq, %1023, %1071 : vector<2x4xi32>
    %1073 = arith.sitofp %857 : vector<2x4xi32> to vector<2x4xf32>
    %cst_195 = arith.constant 0.000000e+00 : f32
    %1074 = vector.broadcast %cst_195 : f32 to vector<2x4xf32>
    %1075 = arith.select %1072, %1073, %1074 : vector<2x4xi1>, vector<2x4xf32>
    %cst_196 = arith.constant dense<0.000000e+00> : vector<2xf32>
    %1076 = vector.multi_reduction <add>, %1075, %cst_196 [1] : vector<2x4xf32> to vector<2xf32>
    %1077 = vector.shape_cast %1076 : vector<2xf32> to vector<2x1xf32>
    %1078 = arith.fptosi %1077 : vector<2x1xf32> to vector<2x1xi32>
    %c0_197 = arith.constant 0 : index
    %c2_198 = arith.constant 2 : index
    %1079 = vector.load %arg13[%c0_197, %c2_198] : memref<2x8xi32, #tpu.memory_space<vmem>>, vector<2x1xi32>
    tpu.vector_store %arg13[%c0_197, %c2_198], %1078 {strides = array<i32>} : memref<2x8xi32, #tpu.memory_space<vmem>>, vector<2x1xi32>,
    %1080 = vector.broadcast %1078 : vector<2x1xi32> to vector<2x4xi32>
    %1081 = arith.cmpi eq, %1023, %1080 : vector<2x4xi32>
    %1082 = arith.sitofp %817 : vector<2x4xi32> to vector<2x4xf32>
    %cst_199 = arith.constant 0.000000e+00 : f32
    %1083 = vector.broadcast %cst_199 : f32 to vector<2x4xf32>
    %1084 = arith.select %1081, %1082, %1083 : vector<2x4xi1>, vector<2x4xf32>
    %cst_200 = arith.constant dense<0.000000e+00> : vector<2xf32>
    %1085 = vector.multi_reduction <add>, %1084, %cst_200 [1] : vector<2x4xf32> to vector<2xf32>
    %1086 = vector.shape_cast %1085 : vector<2xf32> to vector<2x1xf32>
    %1087 = arith.fptosi %1086 : vector<2x1xf32> to vector<2x1xi32>
    %c0_201 = arith.constant 0 : index
    %c1_202 = arith.constant 1 : index
    %1088 = vector.load %arg13[%c0_201, %c1_202] : memref<2x8xi32, #tpu.memory_space<vmem>>, vector<2x1xi32>
    tpu.vector_store %arg13[%c0_201, %c1_202], %1087 {strides = array<i32>} : memref<2x8xi32, #tpu.memory_space<vmem>>, vector<2x1xi32>,
    %1089 = vector.broadcast %1087 : vector<2x1xi32> to vector<2x4xi32>
    %1090 = arith.cmpi eq, %1023, %1089 : vector<2x4xi32>
    %1091 = arith.sitofp %777 : vector<2x4xi32> to vector<2x4xf32>
    %cst_203 = arith.constant 0.000000e+00 : f32
    %1092 = vector.broadcast %cst_203 : f32 to vector<2x4xf32>
    %1093 = arith.select %1090, %1091, %1092 : vector<2x4xi1>, vector<2x4xf32>
    %cst_204 = arith.constant dense<0.000000e+00> : vector<2xf32>
    %1094 = vector.multi_reduction <add>, %1093, %cst_204 [1] : vector<2x4xf32> to vector<2xf32>
    %1095 = vector.shape_cast %1094 : vector<2xf32> to vector<2x1xf32>
    %1096 = arith.fptosi %1095 : vector<2x1xf32> to vector<2x1xi32>
    %c0_205 = arith.constant 0 : index
    %c0_206 = arith.constant 0 : index
    %1097 = vector.load %arg13[%c0_205, %c0_206] : memref<2x8xi32, #tpu.memory_space<vmem>>, vector<2x1xi32>
    tpu.vector_store %arg13[%c0_205, %c0_206], %1096 {strides = array<i32>} : memref<2x8xi32, #tpu.memory_space<vmem>>, vector<2x1xi32>,
    return
  }
}

</mosaic_0001>

<bundles_post_ra>
// kernel: segment_model_forward.1
= control target key start
LH: loop header
LB: loop body
LE: loop exit
PB: predicated region body
PF: predicated region fallthrough
CT: control target
= control target key end

     0   :  { %v2916_v2 = vmov 0.0   ;;  %vm60_vm0 = vcmask 392192   ;;  %s3735_s0 = inlined_call_operand.vmem [shape: f32[16,48], index: 0, kind: input, shape index: {}]   ;;  %s3736_s1 = inlined_call_operand.vmem [shape: f32[16,1], index: 1, kind: input, shape index: {}]   ;;  %s3737_s2 = inlined_call_operand.vmem [shape: f32[48,128], index: 2, kind: input, shape index: {}]   ;;  %s3738_s3 = inlined_call_operand.vmem [shape: f32[32,128], index: 3, kind: input, shape index: {}]   ;;  %s3739_s4 = inlined_call_operand.vmem [shape: f32[1,128], index: 4, kind: input, shape index: {}]   ;;  %s3740_s5 = inlined_call_operand.vmem [shape: f32[16,16], index: 5, kind: input, shape index: {}]   ;;  %s3741_s6 = inlined_call_operand.vmem [shape: f32[2,32,32], index: 6, kind: input, shape index: {}]   ;;  %s3742_s7 = inlined_call_operand.vmem [shape: f32[2,1,32], index: 7, kind: input, shape index: {}]   ;;  %s3743_s8 = inlined_call_operand.vmem [shape: f32[32,4], index: 8, kind: input, shape index: {}]   ;;  %s3744_s9 = inlined_call_operand.vmem [shape: f32[1,4], index: 9, kind: input, shape index: {}]   ;;  %s3745_s10 = inlined_call_operand.vmem [shape: f32[4,4], index: 10, kind: input, shape index: {}]   ;;  %s3746_s11 = inlined_call_operand.vmem [shape: f32[1,4], index: 11, kind: input, shape index: {}]   ;;  %s3747_s12 = inlined_call_operand.vmem [shape: f32[1,4], index: 12, kind: input, shape index: {}]   ;;  %s3748_s13 = inlined_call_operand.hbm [shape: s32[2,8], index: 13, kind: output, shape index: {}]  }
   0x1   :  { %v52_v0 = vld [vmem:[%s3737_s2 + $0x28] sm:$0xff]  ;;  %v51_v1 = vld [vmem:[%s3737_s2 + $0x20] sm:$0xff]  ;;  %2568 = vmatprep.subr.mxu1 %v2916_v2  ;;  %v3009_v3 = vld [vmem:[%s3738_s3 + $0x18] sm:$0xff] }
   0x2   :  { %2553 = vmatprep.subr.mxu0 %v52_v0  ;;  %v50_v4 = vld [vmem:[%s3737_s2 + $0x18] sm:$0xff]  ;;  %2569 = vmatpush3.msra.mxu1 %v3009_v3  ;;  %v3018_v5 = vld [vmem:[%s3738_s3 + $0x10] sm:$0xff]  ;;  %v45_v6 = vld [vmem:[%s3735_s0] sm:$0xff] }
   0x3   :  { %2554 = vmatpush3.msra.mxu0 %v52_v0  ;;  %2570 = vmatprep.subr.mxu1 %v2916_v2  ;;  %v49_v7 = vld [vmem:[%s3737_s2 + $0x10] sm:$0xff]  ;;  %v3031_v8 = vld [vmem:[%s3738_s3 + $0x8] sm:$0xff] }
   0x4   :  { %2555 = vmatprep.subr.mxu0 %v51_v1  ;;  %2571 = vmatpush3.msra.mxu1 %v3018_v5 }
   0x5   :  { %2556 = vmatpush3.msra.mxu0 %v51_v1 }
   0x6   :  { %18 = vsyncpa [#allocation4], 0  ;;  %2557 = vmatprep.subr.mxu0 %v50_v4  ;;  %2572 = vmatprep.subr.mxu1 %v2916_v2  ;;  %v48_v9 = vld [vmem:[%s3737_s2 + $0x8] sm:$0xff]  ;;  %v3041_v10 = vld [vmem:[%s3738_s3] sm:$0xff]  ;;  %vm2917_vm1 = vmmov 0   ;;  %v2918_v23 = vmov 0  }
   0x7   :  { %2558 = vmatpush3.msra.mxu0 %v50_v4  ;;  %2565 = vmatprep.mubr.msk.f32.mxu0 %vm60_vm0, %v45_v6  ;;  %v47_v11 = vld [vmem:[%s3737_s2] sm:$0xff]  ;;  %v46_v12 = vld [vmem:[%s3735_s0 + $0x8] sm:$0xff]  ;;  %s2920_s15 = smov 16   ;;  %s2921_s20 = smov 32   ;;  %vm338_vm2 = vcmask 130048   ;;  %vm148_vm3 = vcmask 261120  }
   0x8   :  { %2559 = vmatprep.subr.mxu0 %v49_v7  ;;  %2573 = vmatpush3.msra.mxu1 %v3031_v8  ;;  %v2433_v13 = vld [vmem:[%s3739_s4] ss:$0 sm:$0xff]  ;;  %s2919_s4 = smov 96   ;;  %v143_v38 = vld [vmem:[%s3736_s1 + $0x8] sm:$0xff]  ;;  %s2923_s21 = smov 48   ;;  %vm518_vm4 = vcmask 125954  }
   0x9   :  { %2560 = vmatpush3.msra.mxu0 %v49_v7  ;;  %2574 = vmatprep.subr.mxu1 %v2916_v2  ;;  %v142_v39 = vld [vmem:[%s3736_s1] sm:$0xff]  ;;  %v291_v48 = vsub.f32 1.0, %v143_v38  ;;  %s2922_s1 = smov 80   ;;  %s2924_s22 = smov 112   ;;  %vm710_vm5 = vcmask 128004   ;;  %vm898_vm6 = vcmask 130054  }
   0xa   :  { %2561 = vmatprep.subr.mxu0 %v48_v9  ;;  %2575 = vmatpush3.msra.mxu1 %v3041_v10  ;;  %v251_v40 = vsub.f32 1.0, %v142_v39  ;;  %vm524_vm7 = vcmask 259204   ;;  %vm327_vm8 = vcmask 261254   ;;  %vm904_vm9 = vcmask 255104  }
   0xb   :  { %2562 = vmatpush3.msra.mxu0 %v48_v9  ;;  %2576 = vmatprep.mubr.msk.f32.mxu1 %vm2917_vm1, %v2916_v2  ;;  %vm716_vm10 = vcmask 257154   ;;  %vm321_vm11 = vcmask 123904  }
   0xc   :  { %2563 = vmatprep.subr.mxu0 %v47_v11  ;;  %2577 = vmatmul.mubr.f32.vlgmr.msra.gmra.mxu1 %v2916_v2 }
   0xd   :  { %2564 = vmatpush3.msra.mxu0 %v47_v11  ;;  %2579 = vmatprep.subr.mxu1 %v2916_v2 }
   0xe   :  { %2566 = vmatmul.mubr.msk.f32.vlgmr.msra.gmra.mxu0 %vm60_vm0, %v46_v12  ;;  %2580 = vmatpush3.msra.mxu1 %v3009_v3 }
   0xf   :  { %2581 = vmatprep.subr.mxu1 %v2916_v2  ;;  %2587 = vmatprep.mubr.msk.f32.mxu1 %vm2917_vm1, %v2916_v2 }
  0x10   :  { %2582 = vmatpush3.msra.mxu1 %v3018_v5  ;;  %2590 = vmatprep.subr.mxu0 %v2916_v2 }
  0x11   :  { %2583 = vmatprep.subr.mxu1 %v2916_v2  ;;  %2591 = vmatpush3.msra.mxu0 %v3009_v3 }
  0x12   :  { %2584 = vmatpush3.msra.mxu1 %v3031_v8  ;;  %2592 = vmatprep.subr.mxu0 %v2916_v2 }
  0x13   :  { %2585 = vmatprep.subr.mxu1 %v2916_v2  ;;  %2593 = vmatpush3.msra.mxu0 %v3018_v5 }
  0x14   :  { %2586 = vmatpush3.msra.mxu1 %v3041_v10  ;;  %2594 = vmatprep.subr.mxu0 %v2916_v2 }
  0x15   :  { %2595 = vmatpush3.msra.mxu0 %v3031_v8  ;;  %2598 = vmatprep.mubr.msk.f32.mxu0 %vm2917_vm1, %v2916_v2 }
  0x16   :  { %2596 = vmatprep.subr.mxu0 %v2916_v2  ;;  %2601 = vmatprep.subr.mxu1 %v2916_v2 }
  0x17   :  { %2597 = vmatpush3.msra.mxu0 %v3041_v10  ;;  %2732 = vset.pattern.permute.xlu1 %v2918_v23 }
  0x18   :  { %2612 = vmatprep.subr.mxu0 %v2916_v2  ;;  %2733 = vset.pattern.permute.xlu0 %v2918_v23 }
  0xcc   :  { %v218_v14 = vpop.f32.mrf.mxu1 }
  0xce   :  { %v2567_v15 = vpop.f32.mrf.mxu0  ;;  %v2578_v16 = vpop.f32.mrf.mxu1 }
  0xcf   :  { %v3081_v17 = vadd.f32 %v2567_v15, %v2433_v13 }
  0xd0   :  { %v133_v18 = vpop.f32.mrf.mxu0 }
  0xd1   :  { %v3083_v19 = vadd.f32 %v2433_v13, %v133_v18  ;;  %v224_v20 = vrot.slane %v3081_v17, 6  ;;  %v417_v16 = vrot.slane %v3081_v17, 4 }
  0xd3   :  { %v222_v21 = vadd.f32 %v218_v14, %v3083_v19  ;;  %v226_v22 = vadd.f32 %v224_v20, %v218_v14 }
  0xd5   :  { %2762 = vtanh.f32 %v222_v21  ;;  %v2436_v26 = vmul.f32 -1.442695, %v222_v21  ;;  %v2437_v27 = vmul.f32 -1.442695, %v226_v22 }
  0xd6   :  { %2764 = vtanh.f32 %v226_v22  ;;  %v414_v22 = vrot.slane %v3083_v19, 2 }
  0xd7   :  { %2766 = vpow2.f32 %v2436_v26 }
  0xd8   :  { %2768 = vpow2.f32 %v2437_v27 }
  0xe2   :  { %v2763_v24 = vpop.eup %2762 }
  0xe3   :  { %v2765_v25 = vpop.eup %2764  ;;  %236 = vrot.lane.b32.xlu1 %v2763_v24, %s2919_s4 }
  0xe4   :  { %276 = vrot.lane.b32.xlu0 %v2765_v25, %s2919_s4  ;;  %v2767_v28 = vpop.eup %2766 }
  0xe5   :  { %v2769_v29 = vpop.eup %2768  ;;  %v230_v30 = vadd.f32 1.0, %v2767_v28 }
  0xe6   :  { %v270_v31 = vadd.f32 1.0, %v2769_v29 }
  0xe7   :  { %2770 = vrcp.f32 %v230_v30 }
  0xe8   :  { %2772 = vrcp.f32 %v270_v31 }
  0xf4   :  { %v2771_v32 = vpop.eup %2770 }
  0xf5   :  { %v2773_v34 = vpop.eup %2772  ;;  %v234_v45 = vmul.f32 0.0, %v2771_v32 }
  0xf6   :  { %v274_v41 = vmul.f32 0.0, %v2773_v34 }
 0x155   :  { %v237_v33 = vpop.permute.xlu1 %236 }
 0x156   :  { %v277_v35 = vpop.permute.xlu0 %276  ;;  %v239_v36 = vmul.f32 %v2771_v32, %v237_v33 }
 0x157   :  { %v279_v37 = vmul.f32 %v2773_v34, %v277_v35 }
 0x158   :  { %241 = vrot.lane.b32.xlu1 %v239_v36, %s2920_s15 }
 0x159   :  { %281 = vrot.lane.b32.xlu0 %v279_v37, %s2920_s15 }
 0x15c   :  { %294 = vperm.xlu1 %2732, %v143_v38  }
 0x160   :  { %254 = vperm.xlu1 %2732, %v142_v39  }
 0x164   :  { %260 = vperm.xlu1 %2732, %v251_v40  }
 0x1ca   :  { %v242_v44 = vpop.permute.xlu1 %241 }
 0x1cb   :  { %v282_v42 = vpop.permute.xlu0 %281  ;;  %v3101_v46 = vadd.f32 %v242_v44, %v234_v45 }
 0x1cc   :  { %v284_v43 = vadd.f32 %v282_v42, %v274_v41 }
 0x1ce   :  { %2774 = vtanh.f32 %v284_v43  ;;  %v311_v62 = vrot.slane %v284_v43, 2 }
 0x1cf   :  { %2776 = vtanh.f32 %v3101_v46 }
 0x1d7   :  { %v3106_v53 = vpop.permute.xlu1 %294 }
 0x1db   :  { %v2775_v47 = vpop.eup %2774  ;;  %v3109_v54 = vpop.permute.xlu1 %254 }
 0x1dc   :  { %287 = vrot.lane.b32.xlu0 %v2775_v47, %s2921_s20  ;;  %v2777_v49 = vpop.eup %2776  ;;  %v265_v42 = vmul.f32 %v3109_v54, %v3101_v46 }
 0x1df   :  { %v3113_v56 = vpop.permute.xlu1 %260 }
 0x1e0   :  { %305 = vperm.xlu0 %2733, %v291_v48   ;;  %v3119_v60 = vmul.f32 0.0, %v3113_v56 }
 0x1e2   :  { %v3167_v45 = vadd.f32 %v265_v42, %v3119_v60 }
 0x1e4   :  { %247 = vrot.lane.b32.xlu0 %v2777_v49, %s2921_s20 }
 0x24e   :  { %v288_v50 = vpop.permute.xlu0 %287 }
 0x24f   :  { %v290_v51 = vmul.f32 %v2773_v34, %v288_v50 }
 0x251   :  { %v298_v52 = vrot.slane %v290_v51, 2 }
 0x253   :  { %299 = vrot.lane.b32.xlu1 %v298_v52, %s2920_s15 }
 0x25b   :  { %v3111_v55 = vpop.permute.xlu0 %305 }
 0x25c   :  { %v308_v0 = vmul.f32 0.0, %v3111_v55 }
 0x25f   :  { %v248_v57 = vpop.permute.xlu0 %247 }
 0x260   :  { %v250_v58 = vmul.f32 %v2771_v32, %v248_v57 }
 0x262   :  { %v3116_v59 = vmul.f32 %v3109_v54, %v250_v58 }
 0x264   :  { %v3123_v61 = vadd.f32 %v3119_v60, %v3116_v59 }
 0x266   :  { %330 = vrot.lane.b32.xlu0 %v3123_v61, %s2922_s1 }
 0x26a   :  { %312 = vrot.lane.b32.xlu0 %v311_v62, %s2923_s21 }
 0x2c5   :  { %v300_v63 = vpop.permute.xlu1 %299 }
 0x2c6   :  { %v3130_v1 = vmul.f32 %v300_v63, %v3106_v53  ;;  %v450_v63 = vrot.slane %v3123_v61, 6 }
 0x2c8   :  { %v3133_v4 = vadd.f32 %v308_v0, %v3130_v1 }
 0x2ca   :  { %v334_v6 = vrot.slane %v3133_v4, 6 }
 0x2cc   :  { %335 = vrot.lane.b32.xlu1 %v334_v6, %s2920_s15 }
 0x2d8   :  { %v331_v7 = vpop.permute.xlu0 %330 }
 0x2dc   :  { %v313_v9 = vpop.permute.xlu0 %312 }
 0x2dd   :  { %v315_v11 = vmul.f32 %v313_v9, %v3106_v53 }
 0x2df   :  { %v3138_v12 = vadd.f32 %v315_v11, %v308_v0 }
 0x2e1   :  { %v477_v13 = vrot.slane %v3138_v12, 6 }
 0x2e3   :  { %478 = vrot.lane.b32.xlu0 %v477_v13, %s2922_s1 }
 0x33e   :  { %v336_v14 = vpop.permute.xlu1 %335 }
 0x33f   :  { %v339_v15 = vsel %vm338_vm2, %v331_v7, %v336_v14  ;;  %v504_v7 = vrot.slane %v3133_v4, 2 }
 0x340   :  { %2588 = vmatmul.mubr.msk.f32.vlgmr.msra.gmra.mxu1 %vm148_vm3, %v339_v15 }
 0x341   :  { %2602 = vmatpush3.msra.mxu1 %v3009_v3  ;;  %2609 = vmatprep.mubr.msk.f32.mxu1 %vm2917_vm1, %v2916_v2  ;;  %v506_v11 = vmul.f32 %v504_v7, %v3111_v55 }
 0x342   :  { %2603 = vmatprep.subr.mxu1 %v2916_v2 }
 0x343   :  { %2604 = vmatpush3.msra.mxu1 %v3018_v5 }
 0x344   :  { %2605 = vmatprep.subr.mxu1 %v2916_v2 }
 0x345   :  { %2606 = vmatpush3.msra.mxu1 %v3031_v8 }
 0x346   :  { %2607 = vmatprep.subr.mxu1 %v2916_v2 }
 0x347   :  { %2608 = vmatpush3.msra.mxu1 %v3041_v10 }
 0x348   :  { %2623 = vmatprep.subr.mxu1 %v2916_v2 }
 0x355   :  { %v479_v40 = vpop.permute.xlu0 %478 }
 0x400   :  { %v409_v18 = vpop.f32.mrf.mxu1 }
 0x401   :  { %v419_v21 = vadd.f32 %v417_v16, %v409_v18  ;;  %v416_v25 = vadd.f32 %v414_v22, %v409_v18  ;;  %v514_v18 = vrot.slane %v3138_v12, 2 }
 0x402   :  { %v2589_v24 = vpop.f32.mrf.mxu1 }
 0x403   :  { %2778 = vtanh.f32 %v419_v21  ;;  %v2440_v28 = vmul.f32 -1.442695, %v419_v21  ;;  %v2439_v29 = vmul.f32 -1.442695, %v416_v25 }
 0x404   :  { %2780 = vtanh.f32 %v416_v25  ;;  %v516_v25 = vmul.f32 %v514_v18, %v3111_v55 }
 0x405   :  { %2782 = vpow2.f32 %v2440_v28 }
 0x406   :  { %2784 = vpow2.f32 %v2439_v29 }
 0x410   :  { %v2779_v26 = vpop.eup %2778 }
 0x411   :  { %483 = vrot.lane.b32.xlu1 %v2779_v26, %s2919_s4  ;;  %v2781_v27 = vpop.eup %2780 }
 0x412   :  { %v2783_v30 = vpop.eup %2782 }
 0x413   :  { %v472_v31 = vadd.f32 1.0, %v2783_v30  ;;  %v2785_v32 = vpop.eup %2784 }
 0x414   :  { %v423_v33 = vadd.f32 1.0, %v2785_v32 }
 0x415   :  { %429 = vrot.lane.b32.xlu1 %v2781_v27, %s2919_s4  ;;  %2786 = vrcp.f32 %v472_v31 }
 0x416   :  { %2788 = vrcp.f32 %v423_v33  ;;  %v609_v33 = vrot.slane %v3081_v17, 2 }
 0x422   :  { %v2787_v34 = vpop.eup %2786 }
 0x423   :  { %v2789_v37 = vpop.eup %2788  ;;  %v481_v41 = vmul.f32 %v2787_v34, %v479_v40  ;;  %v463_v40 = vrot.slane %v3167_v45, 6 }
 0x424   :  { %v427_v47 = vmul.f32 %v2789_v37, %v3167_v45 }
 0x483   :  { %v484_v35 = vpop.permute.xlu1 %483 }
 0x484   :  { %v486_v36 = vmul.f32 %v2787_v34, %v484_v35 }
 0x486   :  { %488 = vrot.lane.b32.xlu0 %v486_v36, %s2920_s15 }
 0x487   :  { %v430_v38 = vpop.permute.xlu1 %429 }
 0x488   :  { %v432_v39 = vmul.f32 %v2789_v37, %v430_v38 }
 0x48a   :  { %434 = vrot.lane.b32.xlu1 %v432_v39, %s2920_s15 }
 0x4f8   :  { %v489_v43 = vpop.permute.xlu0 %488 }
 0x4f9   :  { %v491_v44 = vadd.f32 %v489_v43, %v481_v41 }
 0x4fb   :  { %2790 = vtanh.f32 %v491_v44  ;;  %v509_v0 = vrot.slane %v491_v44, 4 }
 0x4fc   :  { %v435_v48 = vpop.permute.xlu1 %434 }
 0x4fd   :  { %v437_v49 = vadd.f32 %v435_v48, %v427_v47 }
 0x4ff   :  { %2792 = vtanh.f32 %v437_v49  ;;  %v457_v6 = vrot.slane %v437_v49, 6 }
 0x508   :  { %v2791_v50 = vpop.eup %2790 }
 0x509   :  { %494 = vrot.lane.b32.xlu0 %v2791_v50, %s2921_s20 }
 0x50c   :  { %v2793_v51 = vpop.eup %2792 }
 0x50d   :  { %440 = vrot.lane.b32.xlu1 %v2793_v51, %s2921_s20 }
 0x57b   :  { %v495_v52 = vpop.permute.xlu0 %494 }
 0x57c   :  { %v497_v57 = vmul.f32 %v2787_v34, %v495_v52 }
 0x57e   :  { %v499_v46 = vrot.slane %v497_v57, 4 }
 0x57f   :  { %v441_v58 = vpop.permute.xlu1 %440 }
 0x580   :  { %v443_v62 = vmul.f32 %v2789_v37, %v441_v58  ;;  %500 = vrot.lane.b32.xlu0 %v499_v46, %s2920_s15  ;;  %v606_v37 = vrot.slane %v3083_v19, 4 }
 0x582   :  { %v445_v60 = vrot.slane %v443_v62, 6 }
 0x584   :  { %446 = vrot.lane.b32.xlu1 %v445_v60, %s2922_s1  ;;  %451 = vrot.lane.b32.xlu0 %v450_v63, %s2922_s1 }
 0x588   :  { %510 = vrot.lane.b32.xlu0 %v509_v0, %s2923_s21 }
 0x58c   :  { %458 = vrot.lane.b32.xlu0 %v457_v6, %s2924_s22 }
 0x5f2   :  { %v501_v9 = vpop.permute.xlu0 %500 }
 0x5f3   :  { %v3181_v13 = vmul.f32 %v501_v9, %v3106_v53 }
 0x5f5   :  { %v3184_v61 = vadd.f32 %v506_v11, %v3181_v13 }
 0x5f6   :  { %v447_v14 = vpop.permute.xlu1 %446  ;;  %v452_v15 = vpop.permute.xlu0 %451 }
 0x5f7   :  { %v449_v21 = vmul.f32 %v447_v14, %v3109_v54  ;;  %v527_v24 = vrot.slane %v3184_v61, 2  ;;  %v454_v12 = vmul.f32 %v452_v15, %v3113_v56 }
 0x5f9   :  { %519 = vst.msk [vmem:[#allocation2] sm:$0xc] %vm518_vm4, %v449_v21  ;;  %528 = vrot.lane.b32.xlu1 %v527_v24, %s2920_s15  ;;  %v3200_v29 = vadd.f32 %v454_v12, %v449_v21 }
 0x5fa   :  { %v511_v4 = vpop.permute.xlu0 %510 }
 0x5fb   :  { %v513_v26 = vmul.f32 %v511_v4, %v3106_v53  ;;  %v648_v61 = vrot.slane %v3200_v29, 6 }
 0x5fd   :  { %v3195_v27 = vadd.f32 %v516_v25, %v513_v26 }
 0x5fe   :  { %v459_v57 = vpop.permute.xlu0 %458 }
 0x5ff   :  { %v670_v28 = vrot.slane %v3195_v27, 4  ;;  %v461_v46 = vmul.f32 %v459_v57, %v3109_v54 }
 0x601   :  { %671 = vrot.lane.b32.xlu0 %v670_v28, %s2922_s1 }
 0x66b   :  { %v529_v30 = vpop.permute.xlu1 %528 }
 0x66c   :  { %v531_v31 = vsel %vm338_vm2, %v3200_v29, %v529_v30  ;;  %v798_v29 = vrot.slane %v3083_v19, 6 }
 0x66d   :  { %v533_v32 = vrot.slane %v531_v31, 2 }
 0x66f   :  { %2599 = vmatmul.mubr.msk.f32.vlgmr.msra.gmra.mxu0 %vm148_vm3, %v533_v32 }
 0x670   :  { %2613 = vmatpush3.msra.mxu0 %v3009_v3  ;;  %2620 = vmatprep.mubr.msk.f32.mxu0 %vm2917_vm1, %v2916_v2 }
 0x671   :  { %2614 = vmatprep.subr.mxu0 %v2916_v2 }
 0x672   :  { %2615 = vmatpush3.msra.mxu0 %v3018_v5 }
 0x673   :  { %2616 = vmatprep.subr.mxu0 %v2916_v2  ;;  %v672_v7 = vpop.permute.xlu0 %671 }
 0x674   :  { %2617 = vmatpush3.msra.mxu0 %v3031_v8 }
 0x675   :  { %2618 = vmatprep.subr.mxu0 %v2916_v2 }
 0x676   :  { %2619 = vmatpush3.msra.mxu0 %v3041_v10 }
 0x677   :  { %2634 = vmatprep.subr.mxu0 %v2916_v2 }
 0x72f   :  { %v602_v34 = vpop.f32.mrf.mxu0 }
 0x730   :  { %v611_v35 = vadd.f32 %v609_v33, %v602_v34  ;;  %v608_v38 = vadd.f32 %v606_v37, %v602_v34 }
 0x731   :  { %v2600_v36 = vpop.f32.mrf.mxu0 }
 0x732   :  { %2794 = vtanh.f32 %v611_v35  ;;  %v2443_v42 = vmul.f32 -1.442695, %v611_v35  ;;  %v2442_v43 = vmul.f32 -1.442695, %v608_v38 }
 0x733   :  { %2796 = vtanh.f32 %v608_v38  ;;  %v698_v38 = vmul.f32 %v527_v24, %v3111_v55  ;;  %v650_v24 = vmul.f32 %v648_v61, %v3113_v56 }
 0x734   :  { %2798 = vpow2.f32 %v2443_v42 }
 0x735   :  { %2800 = vpow2.f32 %v2442_v43 }
 0x73f   :  { %v2795_v39 = vpop.eup %2794 }
 0x740   :  { %676 = vrot.lane.b32.xlu1 %v2795_v39, %s2919_s4  ;;  %v2797_v41 = vpop.eup %2796 }
 0x741   :  { %v2799_v44 = vpop.eup %2798 }
 0x742   :  { %v665_v47 = vadd.f32 1.0, %v2799_v44  ;;  %v2801_v48 = vpop.eup %2800 }
 0x743   :  { %v615_v49 = vadd.f32 1.0, %v2801_v48 }
 0x744   :  { %464 = vrot.lane.b32.xlu1 %v463_v40, %s2924_s22  ;;  %2802 = vrcp.f32 %v665_v47 }
 0x745   :  { %2804 = vrcp.f32 %v615_v49 }
 0x748   :  { %626 = vrot.lane.b32.xlu1 %v2797_v41, %s2919_s4 }
 0x751   :  { %v2803_v50 = vpop.eup %2802 }
 0x752   :  { %v2805_v60 = vpop.eup %2804  ;;  %v674_v9 = vmul.f32 %v2803_v50, %v672_v7 }
 0x7b2   :  { %v677_v51 = vpop.permute.xlu1 %676 }
 0x7b3   :  { %v679_v52 = vmul.f32 %v2803_v50, %v677_v51 }
 0x7b5   :  { %681 = vrot.lane.b32.xlu0 %v679_v52, %s2920_s15 }
 0x7b6   :  { %v465_v45 = vpop.permute.xlu1 %464 }
 0x7b7   :  { %v467_v58 = vmul.f32 %v465_v45, %v3113_v56 }
 0x7b9   :  { %v3228_v62 = vadd.f32 %v467_v58, %v461_v46 }
 0x7ba   :  { %v627_v63 = vpop.permute.xlu1 %626 }
 0x7bb   :  { %v629_v0 = vmul.f32 %v2805_v60, %v627_v63  ;;  %v620_v6 = vrot.slane %v3228_v62, 2  ;;  %v658_v58 = vrot.slane %v3228_v62, 6  ;;  %v706_v63 = vrot.slane %v3195_v27, 2 }
 0x7bd   :  { %631 = vrot.lane.b32.xlu0 %v629_v0, %s2920_s15  ;;  %621 = vrot.lane.b32.xlu1 %v620_v6, %s2920_s15  ;;  %v660_v7 = vmul.f32 %v658_v58, %v3113_v56 }
 0x827   :  { %v682_v11 = vpop.permute.xlu0 %681 }
 0x828   :  { %v684_v14 = vadd.f32 %v682_v11, %v674_v9  ;;  %v708_v9 = vmul.f32 %v706_v63, %v3111_v55 }
 0x82a   :  { %2806 = vtanh.f32 %v684_v14  ;;  %v701_v42 = vrot.slane %v684_v14, 6 }
 0x82f   :  { %v622_v15 = vpop.permute.xlu1 %621  ;;  %v632_v21 = vpop.permute.xlu0 %631 }
 0x830   :  { %v624_v18 = vmul.f32 %v2805_v60, %v622_v15 }
 0x832   :  { %v634_v4 = vadd.f32 %v632_v21, %v624_v18 }
 0x834   :  { %2808 = vtanh.f32 %v634_v4  ;;  %v653_v35 = vrot.slane %v634_v4, 4 }
 0x837   :  { %v2807_v25 = vpop.eup %2806 }
 0x838   :  { %687 = vrot.lane.b32.xlu1 %v2807_v25, %s2921_s20 }
 0x841   :  { %v2809_v26 = vpop.eup %2808 }
 0x842   :  { %637 = vrot.lane.b32.xlu0 %v2809_v26, %s2921_s20 }
 0x8aa   :  { %v688_v28 = vpop.permute.xlu1 %687 }
 0x8ab   :  { %v690_v12 = vmul.f32 %v2803_v50, %v688_v28 }
 0x8ad   :  { %v692_v30 = vrot.slane %v690_v12, 6 }
 0x8af   :  { %693 = vrot.lane.b32.xlu1 %v692_v30, %s2920_s15 }
 0x8b4   :  { %v638_v31 = vpop.permute.xlu0 %637 }
 0x8b5   :  { %v640_v32 = vmul.f32 %v2805_v60, %v638_v31 }
 0x8b7   :  { %v642_v34 = vrot.slane %v640_v32, 4 }
 0x8b9   :  { %643 = vrot.lane.b32.xlu0 %v642_v34, %s2922_s1 }
 0x8bd   :  { %654 = vrot.lane.b32.xlu0 %v653_v35, %s2924_s22 }
 0x921   :  { %v694_v36 = vpop.permute.xlu1 %693 }
 0x922   :  { %v3242_v39 = vmul.f32 %v694_v36, %v3106_v53 }
 0x924   :  { %v3245_v40 = vadd.f32 %v698_v38, %v3242_v39 }
 0x926   :  { %v719_v41 = vrot.slane %v3245_v40, 6 }
 0x928   :  { %720 = vrot.lane.b32.xlu1 %v719_v41, %s2920_s15 }
 0x92b   :  { %v644_v43 = vpop.permute.xlu0 %643 }
 0x92c   :  { %v646_v44 = vmul.f32 %v644_v43, %v3109_v54  ;;  %702 = vrot.lane.b32.xlu1 %v701_v42, %s2923_s21 }
 0x92e   :  { %711 = vst.msk [vmem:[#allocation2] sm:$0x30] %vm710_vm5, %v646_v44  ;;  %v3254_v47 = vadd.f32 %v650_v24, %v646_v44 }
 0x92f   :  { %v655_v46 = vpop.permute.xlu0 %654 }
 0x930   :  { %v657_v0 = vmul.f32 %v655_v46, %v3109_v54 }
 0x932   :  { %v3279_v11 = vadd.f32 %v660_v7, %v657_v0 }
 0x934   :  { %v810_v27 = vrot.slane %v3279_v11, 4 }
 0x99a   :  { %v721_v48 = vpop.permute.xlu1 %720 }
 0x99b   :  { %v723_v49 = vsel %vm338_vm2, %v3254_v47, %v721_v48 }
 0x99c   :  { %v725_v50 = vrot.slane %v723_v49, 4  ;;  %v882_v49 = vrot.slane %v3245_v40, 2 }
 0x99e   :  { %2610 = vmatmul.mubr.msk.f32.vlgmr.msra.gmra.mxu1 %vm148_vm3, %v725_v50  ;;  %v703_v60 = vpop.permute.xlu1 %702 }
 0x99f   :  { %2624 = vmatpush3.msra.mxu1 %v3009_v3  ;;  %2631 = vmatprep.mubr.msk.f32.mxu1 %vm2917_vm1, %v2916_v2  ;;  %v705_v6 = vmul.f32 %v703_v60, %v3106_v53 }
 0x9a0   :  { %2625 = vmatprep.subr.mxu1 %v2916_v2 }
 0x9a1   :  { %2626 = vmatpush3.msra.mxu1 %v3018_v5  ;;  %v3281_v15 = vadd.f32 %v708_v9, %v705_v6  ;;  %v838_v9 = vrot.slane %v3254_v47, 6 }
 0x9a2   :  { %2627 = vmatprep.subr.mxu1 %v2916_v2 }
 0x9a3   :  { %2628 = vmatpush3.msra.mxu1 %v3031_v8  ;;  %v860_v62 = vrot.slane %v3281_v15, 2 }
 0x9a4   :  { %2629 = vmatprep.subr.mxu1 %v2916_v2 }
 0x9a5   :  { %2630 = vmatpush3.msra.mxu1 %v3041_v10 }
 0x9a6   :  { %2645 = vmatprep.subr.mxu1 %v2916_v2 }
 0xa5e   :  { %v794_v51 = vpop.f32.mrf.mxu1 }
 0xa5f   :  { %v800_v52 = vadd.f32 %v798_v29, %v794_v51  ;;  %v801_v57 = vadd.f32 %v794_v51, %v3081_v17 }
 0xa60   :  { %v2611_v45 = vpop.f32.mrf.mxu1 }
 0xa61   :  { %2810 = vtanh.f32 %v800_v52  ;;  %v2445_v21 = vmul.f32 -1.442695, %v800_v52  ;;  %v2446_v4 = vmul.f32 -1.442695, %v801_v57  ;;  %v884_v52 = vmul.f32 %v882_v49, %v3111_v55 }
 0xa62   :  { %2812 = vtanh.f32 %v801_v57 }
 0xa63   :  { %2814 = vpow2.f32 %v2445_v21 }
 0xa64   :  { %2816 = vpow2.f32 %v2446_v4 }
 0xa6e   :  { %v2811_v14 = vpop.eup %2810 }
 0xa6f   :  { %v2813_v18 = vpop.eup %2812  ;;  %816 = vrot.lane.b32.xlu0 %v2811_v14, %s2919_s4 }
 0xa70   :  { %866 = vrot.lane.b32.xlu1 %v2813_v18, %s2919_s4  ;;  %v2815_v25 = vpop.eup %2814  ;;  %v840_v18 = vmul.f32 %v838_v9, %v3113_v56 }
 0xa71   :  { %v2817_v26 = vpop.eup %2816  ;;  %v805_v28 = vadd.f32 1.0, %v2815_v25 }
 0xa72   :  { %v855_v12 = vadd.f32 1.0, %v2817_v26 }
 0xa73   :  { %811 = vrot.lane.b32.xlu0 %v810_v27, %s2920_s15  ;;  %2818 = vrcp.f32 %v805_v28 }
 0xa74   :  { %861 = vrot.lane.b32.xlu1 %v860_v62, %s2922_s1  ;;  %2820 = vrcp.f32 %v855_v12 }
 0xa80   :  { %v2819_v30 = vpop.eup %2818 }
 0xa81   :  { %v2821_v32 = vpop.eup %2820 }
 0xae1   :  { %v817_v31 = vpop.permute.xlu0 %816 }
 0xae2   :  { %v867_v34 = vpop.permute.xlu1 %866  ;;  %v819_v35 = vmul.f32 %v2819_v30, %v817_v31 }
 0xae3   :  { %v869_v36 = vmul.f32 %v2821_v32, %v867_v34 }
 0xae4   :  { %821 = vrot.lane.b32.xlu0 %v819_v35, %s2920_s15 }
 0xae5   :  { %871 = vrot.lane.b32.xlu1 %v869_v36, %s2920_s15  ;;  %v812_v38 = vpop.permute.xlu0 %811 }
 0xae6   :  { %v862_v41 = vpop.permute.xlu1 %861  ;;  %v814_v42 = vmul.f32 %v2819_v30, %v812_v38  ;;  %v848_v38 = vrot.slane %v3279_v11, 6 }
 0xae7   :  { %v864_v43 = vmul.f32 %v2821_v32, %v862_v41 }
 0xb56   :  { %v822_v44 = vpop.permute.xlu0 %821 }
 0xb57   :  { %v872_v61 = vpop.permute.xlu1 %871  ;;  %v824_v24 = vadd.f32 %v822_v44, %v814_v42 }
 0xb58   :  { %v3293_v48 = vadd.f32 %v872_v61, %v864_v43 }
 0xb59   :  { %2822 = vtanh.f32 %v824_v24  ;;  %v843_v7 = vrot.slane %v824_v24, 2 }
 0xb5a   :  { %2824 = vtanh.f32 %v3293_v48 }
 0xb66   :  { %v2823_v50 = vpop.eup %2822 }
 0xb67   :  { %v2825_v51 = vpop.eup %2824  ;;  %827 = vrot.lane.b32.xlu0 %v2823_v50, %s2921_s20 }
 0xb68   :  { %877 = vrot.lane.b32.xlu1 %v2825_v51, %s2921_s20  ;;  %v890_v51 = vmul.f32 %v3293_v48, %v3106_v53 }
 0xb6b   :  { %886 = vrot.lane.b32.xlu0 %v884_v52, %s2924_s22 }
 0xbd9   :  { %v828_v57 = vpop.permute.xlu0 %827 }
 0xbda   :  { %v878_v45 = vpop.permute.xlu1 %877  ;;  %v830_v46 = vmul.f32 %v2819_v30, %v828_v57 }
 0xbdb   :  { %v880_v58 = vmul.f32 %v2821_v32, %v878_v45 }
 0xbdc   :  { %v832_v60 = vrot.slane %v830_v46, 2 }
 0xbdd   :  { %v3302_v63 = vmul.f32 %v880_v58, %v3106_v53  ;;  %v887_v0 = vpop.permute.xlu0 %886 }
 0xbde   :  { %833 = vrot.lane.b32.xlu1 %v832_v60, %s2922_s1 }
 0xbdf   :  { %v3306_v40 = vadd.f32 %v887_v0, %v3302_v63 }
 0xbe1   :  { %v907_v6 = vrot.slane %v3306_v40, 2 }
 0xbe3   :  { %908 = vrot.lane.b32.xlu0 %v907_v6, %s2921_s20 }
 0xbe7   :  { %844 = vrot.lane.b32.xlu0 %v843_v7, %s2924_s22 }
 0xc50   :  { %v834_v14 = vpop.permute.xlu1 %833 }
 0xc51   :  { %v836_v27 = vmul.f32 %v834_v14, %v3109_v54 }
 0xc53   :  { %v3316_v21 = vadd.f32 %v840_v18, %v836_v27  ;;  %899 = vst.msk [vmem:[#allocation2] sm:$0xc0] %vm898_vm6, %v836_v27 }
 0xc55   :  { %v909_v4 = vpop.permute.xlu0 %908  ;;  %v1019_v27 = vrot.slane %v3316_v21, 6 }
 0xc56   :  { %v911_v25 = vsel %vm338_vm2, %v3316_v21, %v909_v4 }
 0xc57   :  { %v913_v26 = vrot.slane %v911_v25, 6  ;;  %v1021_v25 = vmul.f32 %v1019_v27, %v3111_v55 }
 0xc59   :  { %2621 = vmatmul.mubr.msk.f32.vlgmr.msra.gmra.mxu0 %vm148_vm3, %v913_v26  ;;  %v845_v36 = vpop.permute.xlu0 %844 }
 0xc5a   :  { %2635 = vmatpush3.msra.mxu0 %v3009_v3  ;;  %2642 = vmatprep.mubr.msk.f32.mxu0 %vm2917_vm1, %v2916_v2  ;;  %v847_v15 = vmul.f32 %v845_v36, %v3109_v54 }
 0xc5b   :  { %2636 = vmatprep.subr.mxu0 %v2916_v2 }
 0xc5c   :  { %2637 = vmatpush3.msra.mxu0 %v3018_v5  ;;  %v892_v5 = vmul.f32 %v860_v62, %v3111_v55  ;;  %v850_v62 = vmul.f32 %v848_v38, %v3113_v56 }
 0xc5d   :  { %2638 = vmatprep.subr.mxu0 %v2916_v2 }
 0xc5e   :  { %2639 = vmatpush3.msra.mxu0 %v3031_v8  ;;  %v3343_v43 = vadd.f32 %v850_v62, %v847_v15 }
 0xc5f   :  { %2640 = vmatprep.subr.mxu0 %v2916_v2 }
 0xc60   :  { %2641 = vmatpush3.msra.mxu0 %v3041_v10  ;;  %v996_v24 = vrot.slane %v3343_v43, 6 }
 0xd19   :  { %v982_v47 = vpop.f32.mrf.mxu0 }
 0xd1a   :  { %v987_v28 = vadd.f32 %v982_v47, %v798_v29  ;;  %v986_v12 = vadd.f32 %v982_v47, %v3081_v17 }
 0xd1b   :  { %v2622_v3 = vpop.f32.mrf.mxu0 }
 0xd1c   :  { %2826 = vtanh.f32 %v987_v28  ;;  %v2449_v10 = vmul.f32 -1.442695, %v987_v28  ;;  %v2448_v29 = vmul.f32 -1.442695, %v986_v12 }
 0xd1d   :  { %2828 = vtanh.f32 %v986_v12 }
 0xd1e   :  { %2830 = vpow2.f32 %v2449_v10 }
 0xd1f   :  { %2832 = vpow2.f32 %v2448_v29 }
 0xd29   :  { %v2827_v30 = vpop.eup %2826 }
 0xd2a   :  { %1044 = vrot.lane.b32.xlu1 %v2827_v30, %s2919_s4  ;;  %v2829_v8 = vpop.eup %2828 }
 0xd2b   :  { %v2831_v31 = vpop.eup %2830 }
 0xd2c   :  { %v1038_v32 = vadd.f32 1.0, %v2831_v31  ;;  %v2833_v34 = vpop.eup %2832 }
 0xd2d   :  { %v991_v35 = vadd.f32 1.0, %v2833_v34 }
 0xd2e   :  { %894 = vrot.lane.b32.xlu1 %v892_v5, %s2922_s1  ;;  %2834 = vrcp.f32 %v1038_v32 }
 0xd2f   :  { %2836 = vrcp.f32 %v991_v35  ;;  %v2890_v35 = vld [vmem:[%s3738_s3 + $0x18] sm:$0xff] }
 0xd32   :  { %1002 = vrot.lane.b32.xlu1 %v2829_v8, %s2919_s4 }
 0xd3b   :  { %v2835_v41 = vpop.eup %2834 }
 0xd3c   :  { %v2837_v11 = vpop.eup %2836 }
 0xd9c   :  { %v1045_v42 = vpop.permute.xlu1 %1044 }
 0xd9d   :  { %v1047_v44 = vmul.f32 %v2835_v41, %v1045_v42 }
 0xd9f   :  { %1049 = vrot.lane.b32.xlu0 %v1047_v44, %s2920_s15  ;;  %v2892_v44 = vld [vmem:[%s3738_s3 + $0x8] sm:$0xff] }
 0xda0   :  { %v895_v61 = vpop.permute.xlu1 %894 }
 0xda1   :  { %v897_v52 = vadd.f32 %v895_v61, %v890_v51 }
 0xda3   :  { %997 = vrot.lane.b32.xlu0 %v996_v24, %s2920_s15  ;;  %v1042_v57 = vmul.f32 %v2835_v41, %v897_v52  ;;  %v1077_v10 = vrot.slane %v897_v52, 2 }
 0xda4   :  { %v1003_v49 = vpop.permute.xlu1 %1002 }
 0xda5   :  { %v1005_v50 = vmul.f32 %v2837_v11, %v1003_v49 }
 0xda7   :  { %1007 = vrot.lane.b32.xlu1 %v1005_v50, %s2920_s15 }
 0xe11   :  { %v1050_v45 = vpop.permute.xlu0 %1049 }
 0xe12   :  { %v1052_v46 = vadd.f32 %v1050_v45, %v1042_v57  ;;  %v1029_v45 = vmul.f32 %v996_v24, %v3111_v55 }
 0xe14   :  { %2838 = vtanh.f32 %v1052_v46  ;;  %v1071_v29 = vrot.slane %v1052_v46, 2 }
 0xe15   :  { %v998_v58 = vpop.permute.xlu0 %997 }
 0xe16   :  { %v1000_v60 = vmul.f32 %v2837_v11, %v998_v58 }
 0xe19   :  { %v1008_v0 = vpop.permute.xlu1 %1007 }
 0xe1a   :  { %v3353_v7 = vadd.f32 %v1008_v0, %v1000_v60 }
 0xe1c   :  { %2840 = vtanh.f32 %v3353_v7 }
 0xe21   :  { %v2839_v9 = vpop.eup %2838 }
 0xe22   :  { %1055 = vrot.lane.b32.xlu0 %v2839_v9, %s2921_s20 }
 0xe29   :  { %v2841_v14 = vpop.eup %2840 }
 0xe2a   :  { %1013 = vrot.lane.b32.xlu1 %v2841_v14, %s2921_s20 }
 0xe2e   :  { %1065 = vrot.lane.b32.xlu1 %v907_v6, %s2920_s15 }
 0xe94   :  { %v1056_v48 = vpop.permute.xlu0 %1055 }
 0xe95   :  { %v1058_v18 = vmul.f32 %v2835_v41, %v1056_v48  ;;  %v2891_v41 = vld [vmem:[%s3738_s3 + $0x10] sm:$0xff] }
 0xe97   :  { %v1060_v4 = vrot.slane %v1058_v18, 2 }
 0xe99   :  { %1061 = vrot.lane.b32.xlu0 %v1060_v4, %s2920_s15 }
 0xe9c   :  { %v1014_v26 = vpop.permute.xlu1 %1013 }
 0xe9d   :  { %1023 = vrot.lane.b32.xlu0 %v1021_v25, %s2923_s21  ;;  %v1016_v28 = vmul.f32 %v2837_v11, %v1014_v26  ;;  %v2893_v11 = vld [vmem:[%s3738_s3] sm:$0xff]  ;;  %v1027_v25 = vmul.f32 %v3353_v7, %v3106_v53 }
 0xe9f   :  { %v3373_v21 = vmul.f32 %v1016_v28, %v3106_v53 }
 0xea0   :  { %v1066_v47 = vpop.permute.xlu1 %1065 }
 0xea1   :  { %v1068_v12 = vmul.f32 %v1066_v47, %v3113_v56 }
 0xf0b   :  { %v1062_v3 = vpop.permute.xlu0 %1061 }
 0xf0c   :  { %v3367_v40 = vmul.f32 %v1062_v3, %v3109_v54 }
 0xf0e   :  { %v3370_v6 = vadd.f32 %v1068_v12, %v3367_v40 }
 0xf0f   :  { %v1024_v30 = vpop.permute.xlu0 %1023 }
 0xf10   :  { %v3376_v5 = vadd.f32 %v1024_v30, %v3373_v21  ;;  %v1098_v8 = vrot.slane %v3370_v6, 6 }
 0xf12   :  { %1099 = vrot.lane.b32.xlu0 %v1098_v8, %s2920_s15  ;;  %1094 = vrot.lane.b32.xlu1 %v3376_v5, %s2922_s1 }
 0xf16   :  { %1078 = vrot.lane.b32.xlu0 %v1077_v10, %s2923_s21  ;;  %1072 = vrot.lane.b32.xlu1 %v1071_v29, %s2923_s21 }
 0xf84   :  { %v1095_v31 = vpop.permute.xlu1 %1094  ;;  %v1100_v32 = vpop.permute.xlu0 %1099 }
 0xf85   :  { %v1102_v34 = vsel %vm338_vm2, %v1095_v31, %v1100_v32 }
 0xf86   :  { %2632 = vmatmul.mubr.msk.f32.vlgmr.msra.gmra.mxu1 %vm148_vm3, %v1102_v34 }
 0xf87   :  { %2646 = vmatpush3.msra.mxu1 %v2890_v35  ;;  %2653 = vmatprep.mubr.msk.f32.mxu1 %vm2917_vm1, %v2916_v2 }
 0xf88   :  { %v1073_v36 = vpop.permute.xlu1 %1072  ;;  %v1079_v38 = vpop.permute.xlu0 %1078  ;;  %2647 = vmatprep.subr.mxu1 %v2916_v2 }
 0xf89   :  { %v1075_v15 = vmul.f32 %v1073_v36, %v3109_v54  ;;  %v1081_v62 = vmul.f32 %v1079_v38, %v3113_v56  ;;  %2648 = vmatpush3.msra.mxu1 %v2891_v41  ;;  %v1208_v36 = vrot.slane %v3376_v5, 6  ;;  %v1262_v41 = vrot.slane %v3370_v6, 2 }
 0xf8a   :  { %2649 = vmatprep.subr.mxu1 %v2916_v2 }
 0xf8b   :  { %v3398_v42 = vadd.f32 %v1081_v62, %v1075_v15  ;;  %2650 = vmatpush3.msra.mxu1 %v2892_v44 }
 0xf8c   :  { %2651 = vmatprep.subr.mxu1 %v2916_v2 }
 0xf8d   :  { %v1235_v61 = vrot.slane %v3398_v42, 6  ;;  %2652 = vmatpush3.msra.mxu1 %v2893_v11 }
 0xf8f   :  { %1236 = vrot.lane.b32.xlu0 %v1235_v61, %s2922_s1  ;;  %v1264_v61 = vmul.f32 %v1262_v41, %v3113_v56 }
0x1001   :  { %v1237_v27 = vpop.permute.xlu0 %1236 }
0x1046   :  { %v1172_v49 = vpop.f32.mrf.mxu1 }
0x1047   :  { %v1177_v50 = vadd.f32 %v1172_v49, %v606_v37  ;;  %v1176_v52 = vadd.f32 %v1172_v49, %v609_v33 }
0x1048   :  { %v2633_v51 = vpop.f32.mrf.mxu1 }
0x1049   :  { %2842 = vtanh.f32 %v1177_v50  ;;  %v2452_v46 = vmul.f32 -1.442695, %v1177_v50  ;;  %v2451_v37 = vmul.f32 -1.442695, %v1176_v52  ;;  %v1272_v50 = vrot.slane %v3398_v42, 2 }
0x104a   :  { %2844 = vtanh.f32 %v1176_v52 }
0x104b   :  { %2846 = vpow2.f32 %v2452_v46  ;;  %v1274_v6 = vmul.f32 %v1272_v50, %v3113_v56 }
0x104c   :  { %2848 = vpow2.f32 %v2451_v37 }
0x1056   :  { %v2843_v2 = vpop.eup %2842 }
0x1057   :  { %1241 = vrot.lane.b32.xlu1 %v2843_v2, %s2919_s4  ;;  %v2845_v57 = vpop.eup %2844 }
0x1058   :  { %v2847_v58 = vpop.eup %2846 }
0x1059   :  { %v1230_v33 = vadd.f32 1.0, %v2847_v58  ;;  %v2849_v60 = vpop.eup %2848 }
0x105a   :  { %v1181_v0 = vadd.f32 1.0, %v2849_v60 }
0x105b   :  { %1187 = vrot.lane.b32.xlu1 %v2845_v57, %s2919_s4  ;;  %2850 = vrcp.f32 %v1230_v33 }
0x105c   :  { %2852 = vrcp.f32 %v1181_v0 }
0x105f   :  { %1031 = vrot.lane.b32.xlu1 %v1029_v45, %s2920_s15 }
0x1068   :  { %v2851_v9 = vpop.eup %2850 }
0x1069   :  { %v2853_v18 = vpop.eup %2852  ;;  %v1239_v47 = vmul.f32 %v2851_v9, %v1237_v27 }
0x10c9   :  { %v1242_v14 = vpop.permute.xlu1 %1241 }
0x10ca   :  { %v1244_v48 = vmul.f32 %v2851_v9, %v1242_v14 }
0x10cc   :  { %1246 = vrot.lane.b32.xlu0 %v1244_v48, %s2920_s15 }
0x10cd   :  { %v1188_v43 = vpop.permute.xlu1 %1187 }
0x10ce   :  { %v1190_v24 = vmul.f32 %v2853_v18, %v1188_v43 }
0x10d0   :  { %1192 = vrot.lane.b32.xlu0 %v1190_v24, %s2920_s15 }
0x10d1   :  { %v1032_v4 = vpop.permute.xlu1 %1031 }
0x10d2   :  { %v1034_v26 = vadd.f32 %v1032_v4, %v1027_v25 }
0x10d4   :  { %v1185_v12 = vmul.f32 %v2853_v18, %v1034_v26  ;;  %v1221_v24 = vrot.slane %v1034_v26, 6 }
0x113e   :  { %v1247_v28 = vpop.permute.xlu0 %1246 }
0x113f   :  { %v1249_v3 = vadd.f32 %v1247_v28, %v1239_v47 }
0x1141   :  { %2854 = vtanh.f32 %v1249_v3  ;;  %v1267_v15 = vrot.slane %v1249_v3, 4 }
0x1142   :  { %v1193_v30 = vpop.permute.xlu0 %1192 }
0x1143   :  { %v1195_v8 = vadd.f32 %v1193_v30, %v1185_v12 }
0x1145   :  { %2856 = vtanh.f32 %v1195_v8  ;;  %v1215_v62 = vrot.slane %v1195_v8, 6 }
0x114e   :  { %v2855_v10 = vpop.eup %2854 }
0x114f   :  { %1252 = vrot.lane.b32.xlu1 %v2855_v10, %s2921_s20 }
0x1152   :  { %v2857_v29 = vpop.eup %2856 }
0x1153   :  { %1198 = vrot.lane.b32.xlu0 %v2857_v29, %s2921_s20 }
0x11c1   :  { %v1253_v31 = vpop.permute.xlu1 %1252 }
0x11c2   :  { %v1255_v32 = vmul.f32 %v2851_v9, %v1253_v31 }
0x11c4   :  { %v1257_v34 = vrot.slane %v1255_v32, 4 }
0x11c5   :  { %v1199_v35 = vpop.permute.xlu0 %1198 }
0x11c6   :  { %v1201_v7 = vmul.f32 %v2853_v18, %v1199_v35  ;;  %1258 = vrot.lane.b32.xlu1 %v1257_v34, %s2920_s15 }
0x11c8   :  { %v1203_v38 = vrot.slane %v1201_v7, 6 }
0x11ca   :  { %1209 = vrot.lane.b32.xlu1 %v1208_v36, %s2922_s1  ;;  %1204 = vrot.lane.b32.xlu0 %v1203_v38, %s2922_s1 }
0x11ce   :  { %1268 = vrot.lane.b32.xlu1 %v1267_v15, %s2923_s21 }
0x11d2   :  { %1216 = vrot.lane.b32.xlu1 %v1215_v62, %s2924_s22 }
0x1238   :  { %v1259_v44 = vpop.permute.xlu1 %1258 }
0x1239   :  { %v3434_v11 = vmul.f32 %v1259_v44, %v3109_v54 }
0x123b   :  { %v3437_v5 = vadd.f32 %v1264_v61, %v3434_v11 }
0x123c   :  { %v1210_v49 = vpop.permute.xlu1 %1209  ;;  %v1205_v46 = vpop.permute.xlu0 %1204 }
0x123d   :  { %v1283_v51 = vrot.slane %v3437_v5, 2  ;;  %v1212_v42 = vmul.f32 %v1210_v49, %v3111_v55  ;;  %v3452_v37 = vmul.f32 %v1205_v46, %v3106_v53 }
0x123f   :  { %1284 = vrot.lane.b32.xlu0 %v1283_v51, %s2920_s15  ;;  %v3455_v58 = vadd.f32 %v1212_v42, %v3452_v37 }
0x1240   :  { %v1269_v52 = vpop.permute.xlu1 %1268 }
0x1241   :  { %v1271_v2 = vmul.f32 %v1269_v52, %v3109_v54 }
0x1243   :  { %v3446_v57 = vadd.f32 %v1274_v6, %v1271_v2 }
0x1244   :  { %v1217_v8 = vpop.permute.xlu1 %1216 }
0x1245   :  { %v1422_v45 = vrot.slane %v3446_v57, 4  ;;  %v1219_v10 = vmul.f32 %v1217_v8, %v3106_v53 }
0x1247   :  { %1423 = vrot.lane.b32.xlu1 %v1422_v45, %s2922_s1 }
0x12b1   :  { %v1285_v33 = vpop.permute.xlu0 %1284 }
0x12b2   :  { %v1287_v60 = vsel %vm338_vm2, %v3455_v58, %v1285_v33 }
0x12b3   :  { %v1289_v0 = vrot.slane %v1287_v60, 2 }
0x12b5   :  { %2643 = vmatmul.mubr.msk.f32.vlgmr.msra.gmra.mxu0 %vm148_vm3, %v1289_v0 }
0x12b9   :  { %v1424_v36 = vpop.permute.xlu1 %1423 }
0x1375   :  { %v1358_v9 = vpop.f32.mrf.mxu0 }
0x1376   :  { %v1363_v14 = vadd.f32 %v1358_v9, %v414_v22  ;;  %v1362_v18 = vadd.f32 %v1358_v9, %v417_v16  ;;  %v1450_v9 = vmul.f32 %v1283_v51, %v3113_v56 }
0x1377   :  { %v2644_v48 = vpop.f32.mrf.mxu0 }
0x1378   :  { %2858 = vtanh.f32 %v1363_v14  ;;  %v2455_v4 = vmul.f32 -1.442695, %v1363_v14  ;;  %v2454_v25 = vmul.f32 -1.442695, %v1362_v18 }
0x1379   :  { %2860 = vtanh.f32 %v1362_v18 }
0x137a   :  { %2862 = vpow2.f32 %v2455_v4 }
0x137b   :  { %2864 = vpow2.f32 %v2454_v25 }
0x1385   :  { %v2859_v43 = vpop.eup %2858 }
0x1386   :  { %1428 = vrot.lane.b32.xlu0 %v2859_v43, %s2919_s4  ;;  %v2861_v27 = vpop.eup %2860 }
0x1387   :  { %v2863_v22 = vpop.eup %2862 }
0x1388   :  { %v1417_v47 = vadd.f32 1.0, %v2863_v22  ;;  %v2865_v28 = vpop.eup %2864 }
0x1389   :  { %v1367_v3 = vadd.f32 1.0, %v2865_v28 }
0x138a   :  { %1222 = vrot.lane.b32.xlu0 %v1221_v24, %s2924_s22  ;;  %2866 = vrcp.f32 %v1417_v47 }
0x138b   :  { %2868 = vrcp.f32 %v1367_v3 }
0x138e   :  { %1378 = vrot.lane.b32.xlu0 %v2861_v27, %s2919_s4  ;;  %v1400_v27 = vrot.slane %v3455_v58, 6 }
0x1390   :  { %v1402_v5 = vmul.f32 %v1400_v27, %v3111_v55 }
0x1397   :  { %v2867_v16 = vpop.eup %2866 }
0x1398   :  { %v2869_v32 = vpop.eup %2868  ;;  %v1426_v38 = vmul.f32 %v2867_v16, %v1424_v36 }
0x13f8   :  { %v1429_v12 = vpop.permute.xlu0 %1428 }
0x13f9   :  { %v1431_v30 = vmul.f32 %v2867_v16, %v1429_v12 }
0x13fb   :  { %1433 = vrot.lane.b32.xlu1 %v1431_v30, %s2920_s15 }
0x13fc   :  { %v1223_v26 = vpop.permute.xlu0 %1222 }
0x13fd   :  { %v1225_v29 = vmul.f32 %v1223_v26, %v3111_v55 }
0x13ff   :  { %v1226_v31 = vadd.f32 %v1225_v29, %v1219_v10  ;;  %v1458_v10 = vrot.slane %v3446_v57, 2 }
0x1400   :  { %v1379_v34 = vpop.permute.xlu0 %1378 }
0x1401   :  { %v1381_v35 = vmul.f32 %v2869_v32, %v1379_v34  ;;  %v1372_v7 = vrot.slane %v1226_v31, 2  ;;  %v1410_v30 = vrot.slane %v1226_v31, 6 }
0x1403   :  { %1373 = vrot.lane.b32.xlu0 %v1372_v7, %s2920_s15  ;;  %1383 = vrot.lane.b32.xlu1 %v1381_v35, %s2920_s15  ;;  %v1412_v29 = vmul.f32 %v1410_v30, %v3111_v55  ;;  %v2461_v30 = vld [vmem:[%s3742_s7] ss:$0 sm:$0xff] }
0x146d   :  { %v1434_v15 = vpop.permute.xlu1 %1433 }
0x146e   :  { %v1436_v62 = vadd.f32 %v1434_v15, %v1426_v38 }
0x1470   :  { %2870 = vtanh.f32 %v1436_v62  ;;  %v1453_v43 = vrot.slane %v1436_v62, 6 }
0x1475   :  { %v1374_v41 = vpop.permute.xlu0 %1373  ;;  %v1384_v61 = vpop.permute.xlu1 %1383 }
0x1476   :  { %v1376_v44 = vmul.f32 %v2869_v32, %v1374_v41 }
0x1478   :  { %v1386_v49 = vadd.f32 %v1384_v61, %v1376_v44 }
0x147a   :  { %2872 = vtanh.f32 %v1386_v49  ;;  %v1405_v60 = vrot.slane %v1386_v49, 4 }
0x147d   :  { %v2871_v50 = vpop.eup %2870 }
0x147e   :  { %1439 = vrot.lane.b32.xlu0 %v2871_v50, %s2921_s20 }
0x1487   :  { %v2873_v52 = vpop.eup %2872 }
0x1488   :  { %1389 = vrot.lane.b32.xlu1 %v2873_v52, %s2921_s20 }
0x14f0   :  { %v1440_v6 = vpop.permute.xlu0 %1439 }
0x14f1   :  { %v1442_v2 = vmul.f32 %v2867_v16, %v1440_v6 }
0x14f3   :  { %v1444_v45 = vrot.slane %v1442_v2, 6 }
0x14f5   :  { %1445 = vrot.lane.b32.xlu0 %v1444_v45, %s2920_s15 }
0x14fa   :  { %v1390_v46 = vpop.permute.xlu1 %1389 }
0x14fb   :  { %v1392_v42 = vmul.f32 %v2869_v32, %v1390_v46 }
0x14fd   :  { %v1394_v33 = vrot.slane %v1392_v42, 4 }
0x14ff   :  { %1395 = vrot.lane.b32.xlu1 %v1394_v33, %s2922_s1 }
0x1503   :  { %1406 = vrot.lane.b32.xlu1 %v1405_v60, %s2924_s22 }
0x1567   :  { %v1446_v0 = vpop.permute.xlu0 %1445 }
0x1568   :  { %v3481_v14 = vmul.f32 %v1446_v0, %v3109_v54 }
0x156a   :  { %v1451_v48 = vadd.f32 %v1450_v9, %v3481_v14 }
0x156c   :  { %v1469_v18 = vrot.slane %v1451_v48, 6 }
0x156e   :  { %1470 = vrot.lane.b32.xlu0 %v1469_v18, %s2920_s15 }
0x1571   :  { %v1396_v24 = vpop.permute.xlu1 %1395 }
0x1572   :  { %1454 = vrot.lane.b32.xlu0 %v1453_v43, %s2923_s21  ;;  %v3488_v4 = vmul.f32 %v1396_v24, %v3106_v53 }
0x1574   :  { %v1403_v51 = vadd.f32 %v1402_v5, %v3488_v4 }
0x1575   :  { %v1407_v12 = vpop.permute.xlu1 %1406 }
0x1576   :  { %v1409_v8 = vmul.f32 %v1407_v12, %v3106_v53 }
0x1578   :  { %v1413_v32 = vadd.f32 %v1412_v29, %v1409_v8 }
0x15e0   :  { %v1471_v25 = vpop.permute.xlu0 %1470 }
0x15e1   :  { %v1473_v22 = vsel %vm338_vm2, %v1403_v51, %v1471_v25 }
0x15e2   :  { %v1475_v47 = vrot.slane %v1473_v22, 4 }
0x15e4   :  { %2654 = vmatmul.mubr.msk.f32.vlgmr.msra.gmra.mxu1 %vm148_vm3, %v1475_v47  ;;  %v1455_v26 = vpop.permute.xlu0 %1454  ;;  %v1624_v47 = vld [vmem:[%s3740_s5 + $0x8] sm:$0xff] }
0x15e5   :  { %v1457_v34 = vmul.f32 %v1455_v26, %v3109_v54 }
0x16a4   :  { %v1544_v28 = vpop.f32.mrf.mxu1 }
0x16a5   :  { %v1548_v3 = vadd.f32 %v1544_v28, %v224_v20  ;;  %v1549_v16 = vadd.f32 %v1544_v28, %v3083_v19  ;;  %v1460_v20 = vmul.f32 %v1458_v10, %v3113_v56  ;;  %v1558_v19 = vrot.slane %v1413_v32, 4  ;;  %v1709_v28 = vld [vmem:[%s3741_s6 + $0x18] sm:$0xff] }
0x16a6   :  { %v2655_v58 = vpop.f32.mrf.mxu1 }
0x16a7   :  { %2874 = vtanh.f32 %v1548_v3  ;;  %v1461_v31 = vadd.f32 %v1460_v20, %v1457_v34  ;;  %v2457_v57 = vmul.f32 -1.442695, %v1548_v3  ;;  %v2458_v55 = vmul.f32 -1.442695, %v1549_v16  ;;  %v1707_v3 = vld [vmem:[%s3741_s6 + $0x8] sm:$0xff] }
0x16a8   :  { %2876 = vtanh.f32 %v1549_v16  ;;  %v1706_v16 = vld [vmem:[%s3741_s6] sm:$0xff]  ;;  %v2467_v20 = vld [vmem:[%s3741_s6 + $0x28] sm:$0xff] }
0x16a9   :  { %v1593_v7 = vrot.slane %v1461_v31, 2  ;;  %2878 = vpow2.f32 %v2457_v57  ;;  %v1974_v57 = vld [vmem:[%s3743_s8 + $0x18] sm:$0xff] }
0x16aa   :  { %2880 = vpow2.f32 %v2458_v55  ;;  %v1973_v55 = vld [vmem:[%s3743_s8 + $0x10] sm:$0xff] }
0x16b4   :  { %v2875_v35 = vpop.eup %2874 }
0x16b5   :  { %v2877_v17 = vpop.eup %2876  ;;  %1564 = vrot.lane.b32.xlu1 %v2875_v35, %s2919_s4  ;;  %v2469_v35 = vld [vmem:[%s3741_s6 + $0x38] sm:$0xff] }
0x16b6   :  { %1599 = vrot.lane.b32.xlu0 %v2877_v17, %s2919_s4  ;;  %v2879_v36 = vpop.eup %2878  ;;  %v2468_v17 = vld [vmem:[%s3741_s6 + $0x30] sm:$0xff] }
0x16b7   :  { %v1553_v38 = vadd.f32 1.0, %v2879_v36  ;;  %v2881_v15 = vpop.eup %2880  ;;  %v1972_v36 = vld [vmem:[%s3743_s8 + $0x8] sm:$0xff] }
0x16b8   :  { %v1588_v56 = vadd.f32 1.0, %v2881_v15  ;;  %v2471_v15 = vld [vmem:[%s3742_s7 + $0x1] ss:$0 sm:$0xff] }
0x16b9   :  { %1559 = vrot.lane.b32.xlu1 %v1558_v19, %s2920_s15  ;;  %2882 = vrcp.f32 %v1553_v38  ;;  %v2466_v19 = vld [vmem:[%s3741_s6 + $0x20] sm:$0xff] }
0x16ba   :  { %2884 = vrcp.f32 %v1588_v56  ;;  %v1971_v38 = vld [vmem:[%s3743_s8] sm:$0xff] }
0x16bd   :  { %1594 = vrot.lane.b32.xlu1 %v1593_v7, %s2922_s1 }
0x16c6   :  { %v2883_v62 = vpop.eup %2882 }
0x16c7   :  { %v2885_v49 = vpop.eup %2884 }
0x1727   :  { %v1565_v41 = vpop.permute.xlu1 %1564 }
0x1728   :  { %v1567_v44 = vmul.f32 %v2883_v62, %v1565_v41  ;;  %v1600_v61 = vpop.permute.xlu0 %1599 }
0x1729   :  { %v1602_v50 = vmul.f32 %v2885_v49, %v1600_v61 }
0x172a   :  { %1569 = vrot.lane.b32.xlu0 %v1567_v44, %s2920_s15 }
0x172b   :  { %v1560_v52 = vpop.permute.xlu1 %1559 }
0x172c   :  { %v1562_v6 = vmul.f32 %v2883_v62, %v1560_v52  ;;  %v2474_v52 = vld [vmem:[%s3744_s9] ss:$0 sm:$0xff] }
0x172e   :  { %1604 = vrot.lane.b32.xlu0 %v1602_v50, %s2920_s15  ;;  %v2925_v50 = vmov 1  }
0x172f   :  { %v1595_v2 = vpop.permute.xlu1 %1594  ;;  %2734 = vset.pattern.permute.xlu1 %v2925_v50 }
0x1730   :  { %v1597_v42 = vmul.f32 %v2885_v49, %v1595_v2 }
0x179c   :  { %v1570_v45 = vpop.permute.xlu0 %1569 }
0x179d   :  { %v1572_v46 = vadd.f32 %v1570_v45, %v1562_v6 }
0x179f   :  { %2886 = vtanh.f32 %v1572_v46  ;;  %v2477_v46 = vld [vmem:[%s3746_s11] ss:$0 sm:$0xff] }
0x17a0   :  { %v1605_v33 = vpop.permute.xlu0 %1604 }
0x17a1   :  { %v1607_v60 = vadd.f32 %v1605_v33, %v1597_v42 }
0x17a3   :  { %2888 = vtanh.f32 %v1607_v60  ;;  %v2926_v60 = vmov 3  }
0x17ac   :  { %v2887_v0 = vpop.eup %2886 }
0x17ad   :  { %1575 = vrot.lane.b32.xlu1 %v2887_v0, %s2921_s20  ;;  %v2927_v0 = vmov 2  }
0x17b0   :  { %v2889_v9 = vpop.eup %2888 }
0x17b1   :  { %521 = vrot.lane.b32.xlu1 %v3181_v13, %s2920_s15  ;;  %1610 = vrot.lane.b32.xlu0 %v2889_v9, %s2921_s20  ;;  %v2077_v9 = vlaneseq }
0x17b5   :  { %901 = vrot.lane.b32.xlu1 %v3302_v63, %s2921_s20  ;;  %324 = vrot.lane.b32.xlu0 %v3130_v1, %s2920_s15 }
0x17b9   :  { %318 = vrot.lane.b32.xlu1 %v3116_v59, %s2922_s1  ;;  %713 = vrot.lane.b32.xlu0 %v3242_v39, %s2920_s15  ;;  %v1623_v39 = vld [vmem:[%s3740_s5] sm:$0xff] }
0x17ba   :  { %2660 = vmatprep.mubr.msk.f32.mxu0 %vm338_vm2, %v1623_v39  ;;  %2678 = vmatprep.mubr.msk.f32.mxu1 %vm338_vm2, %v1623_v39 }
0x17bd   :  { %1278 = vrot.lane.b32.xlu1 %v3434_v11, %s2920_s15  ;;  %1084 = vrot.lane.b32.xlu0 %v3373_v21, %s2922_s1 }
0x17c1   :  { %1089 = vrot.lane.b32.xlu0 %v3367_v40, %s2920_s15 }
0x17c5   :  { %1464 = vrot.lane.b32.xlu0 %v3481_v14, %s2920_s15 }
0x181f   :  { %v1576_v13 = vpop.permute.xlu1 %1575 }
0x1820   :  { %v1578_v1 = vmul.f32 %v2883_v62, %v1576_v13  ;;  %v2078_v13 = vshrl.u32 %v2077_v9, 7 }
0x1822   :  { %v1580_v63 = vrot.slane %v1578_v1, 2  ;;  %v2079_v1 = vsub.s32 0, %v2078_v13 }
0x1823   :  { %v1611_v59 = vpop.permute.xlu0 %1610  ;;  %v522_v48 = vpop.permute.xlu1 %521 }
0x1824   :  { %v1613_v18 = vmul.f32 %v2885_v49, %v1611_v59  ;;  %525 = vst.msk [vmem:[#allocation2 + $0x8] sm:$0x30] %vm524_vm7, %v522_v48  ;;  %1581 = vrot.lane.b32.xlu1 %v1580_v63, %s2922_s1  ;;  %v2063_v63 = vld [vmem:[%s3745_s10] sm:$0xf]  ;;  %v2090_v59 = vsub.s32 1, %v2078_v13 }
0x1825   :  { %1462 = vst.msk [vmem:[#allocation2 + $0x8] sm:$0x30] %vm710_vm5, %v3488_v4  ;;  %v3621_v48 = vrot.slane %v2063_v63, %v2079_v1 }
0x1826   :  { %v1614_v40 = vmul.f32 %v1613_v18, %v3109_v54  ;;  %v2102_v18 = vsub.s32 2, %v2078_v13  ;;  %v3623_v39 = vrot.slane %v2063_v63, %v2090_v59 }
0x1827   :  { %v325_v21 = vpop.permute.xlu0 %324  ;;  %v902_v11 = vpop.permute.xlu1 %901 }
0x1828   :  { %328 = vst.msk [vmem:[#allocation2 + $0x8] sm:$0xc0] %vm327_vm8, %v325_v21  ;;  %1617 = vrot.lane.b32.xlu1 %v1614_v40, %s2921_s20 }
0x1829   :  { %905 = vst.msk [vmem:[#allocation2 + $0x8] sm:$0x3] %vm904_vm9, %v902_v11  ;;  %v2114_v11 = vsub.s32 3, %v2078_v13 }
0x182b   :  { %v714_v14 = vpop.permute.xlu0 %713  ;;  %v319_v43 = vpop.permute.xlu1 %318 }
0x182c   :  { %717 = vst.msk [vmem:[#allocation2 + $0x8] sm:$0xc] %vm716_vm10, %v714_v14 }
0x182d   :  { %322 = vst.msk [vmem:[#allocation2] sm:$0x3] %vm321_vm11, %v319_v43  ;;  %v3626_v43 = vrot.slane %v2063_v63, %v2102_v18 }
0x182e   :  { %1276 = vst.msk [vmem:[#allocation2 + $0x8] sm:$0xc] %vm518_vm4, %v3452_v37 }
0x182f   :  { %v1085_v24 = vpop.permute.xlu0 %1084  ;;  %v1279_v27 = vpop.permute.xlu1 %1278 }
0x1830   :  { %1087 = vst.msk [vmem:[#allocation2 + $0x8] sm:$0x3] %vm321_vm11, %v1085_v24 }
0x1831   :  { %1281 = vst.msk [vmem:[#allocation2] sm:$0x30] %vm524_vm7, %v1279_v27 }
0x1833   :  { %v1090_v54 = vpop.permute.xlu0 %1089 }
0x1834   :  { %1092 = vst.msk [vmem:[#allocation2] sm:$0xc0] %vm327_vm8, %v1090_v54  ;;  %v3629_v54 = vrot.slane %v2063_v63, %v2114_v11 }
0x1837   :  { %v1465_v4 = vpop.permute.xlu0 %1464 }
0x1838   :  { %1467 = vst.msk [vmem:[#allocation2] sm:$0xc] %vm716_vm10, %v1465_v4 }
0x1896   :  { %v1582_v5 = vpop.permute.xlu1 %1581 }
0x1897   :  { %v1584_v51 = vmul.f32 %v1582_v5, %v3106_v53  ;;  %v1708_v53 = vld [vmem:[%s3741_s6 + $0x10] sm:$0xff] }
0x1899   :  { %1615 = vst.msk [vmem:[#allocation2 + $0x8] sm:$0xc0] %vm898_vm6, %v1584_v51 }
0x189a   :  { %v1618_v25 = vpop.permute.xlu1 %1617 }
0x189b   :  { %1620 = vst.msk [vmem:[#allocation2] sm:$0x3] %vm904_vm9, %v1618_v25 }
0x18a0   :  { %v1622_v22 = vld [vmem:[#allocation2 + $0x8] sm:$0xff] }
0x18a1   :  { %2656 = vmatprep.subr.mxu0 %v1622_v22 }
0x18a2   :  { %2657 = vmatpush3.msra.mxu0 %v1622_v22  ;;  %v1621_v37 = vld [vmem:[#allocation2] sm:$0xff] }
0x18a3   :  { %2658 = vmatprep.subr.mxu0 %v1621_v37 }
0x18a4   :  { %2659 = vmatpush3.msra.mxu0 %v1621_v37 }
0x18a5   :  { %2661 = vmatmul.mubr.msk.f32.vlgmr.msra.gmra.mxu0 %vm338_vm2, %v1624_v47  ;;  %2663 = vmatprep.subr.mxu0 %v1709_v28 }
0x18a6   :  { %2664 = vmatpush3.msra.mxu0 %v1709_v28 }
0x18a7   :  { %2665 = vmatprep.subr.mxu0 %v1708_v53 }
0x18a8   :  { %2666 = vmatpush3.msra.mxu0 %v1708_v53 }
0x18a9   :  { %2667 = vmatprep.subr.mxu0 %v1707_v3 }
0x18aa   :  { %2668 = vmatpush3.msra.mxu0 %v1707_v3 }
0x18ab   :  { %2669 = vmatprep.subr.mxu0 %v1706_v16 }
0x18ac   :  { %2670 = vmatpush3.msra.mxu0 %v1706_v16 }
0x18ad   :  { %2692 = vmatprep.subr.mxu0 %v1974_v57 }
0x1965   :  { %v2662_v58 = vpop.f32.mrf.mxu0 }
0x1967   :  { %v1697_v12 = vpop.f32.mrf.mxu0 }
0x1968   :  { %2671 = vmatprep.mubr.msk.f32.mxu0 %vm148_vm3, %v1697_v12 }
0x1969   :  { %2672 = vmatmul.mubr.msk.f32.vlgmr.msra.gmra.mxu0 %vm148_vm3, %v2662_v58 }
0x196a   :  { %2693 = vmatpush3.msra.mxu0 %v1974_v57 }
0x196b   :  { %2694 = vmatprep.subr.mxu0 %v1973_v55 }
0x196c   :  { %2695 = vmatpush3.msra.mxu0 %v1973_v55 }
0x196d   :  { %2696 = vmatprep.subr.mxu0 %v1972_v36 }
0x196e   :  { %2697 = vmatpush3.msra.mxu0 %v1972_v36 }
0x196f   :  { %2698 = vmatprep.subr.mxu0 %v1971_v38 }
0x1970   :  { %2699 = vmatpush3.msra.mxu0 %v1971_v38 }
0x1a29   :  { %v2673_v8 = vpop.f32.mrf.mxu0 }
0x1a2a   :  { %v1795_v26 = vadd.f32 %v2673_v8, %v2461_v30 }
0x1a2b   :  { %v1789_v10 = vpop.f32.mrf.mxu0 }
0x1a2c   :  { %v1799_v29 = vmax.f32 %v1795_v26, 0.0  ;;  %v1790_v32 = vadd.f32 %v2461_v30, %v1789_v10 }
0x1a2e   :  { %v1798_v34 = vmax.f32 %v1790_v32, 0.0  ;;  %2674 = vmatprep.subr.mxu1 %v1799_v29 }
0x1a2f   :  { %2675 = vmatpush3.msra.mxu1 %v1799_v29 }
0x1a30   :  { %2676 = vmatprep.subr.mxu1 %v1798_v34 }
0x1a31   :  { %2677 = vmatpush3.msra.mxu1 %v1798_v34 }
0x1a32   :  { %2679 = vmatmul.mubr.msk.f32.vlgmr.msra.gmra.mxu1 %vm338_vm2, %v1624_v47  ;;  %2681 = vmatprep.subr.mxu1 %v2469_v35 }
0x1a33   :  { %2682 = vmatpush3.msra.mxu1 %v2469_v35 }
0x1a34   :  { %2683 = vmatprep.subr.mxu1 %v2468_v17 }
0x1a35   :  { %2684 = vmatpush3.msra.mxu1 %v2468_v17 }
0x1a36   :  { %2685 = vmatprep.subr.mxu1 %v2467_v20 }
0x1a37   :  { %2686 = vmatpush3.msra.mxu1 %v2467_v20 }
0x1a38   :  { %2687 = vmatprep.subr.mxu1 %v2466_v19 }
0x1a39   :  { %2688 = vmatpush3.msra.mxu1 %v2466_v19 }
0x1af2   :  { %v2680_v31 = vpop.f32.mrf.mxu1 }
0x1af4   :  { %v1866_v7 = vpop.f32.mrf.mxu1 }
0x1af5   :  { %2689 = vmatprep.mubr.msk.f32.mxu1 %vm148_vm3, %v1866_v7 }
0x1af6   :  { %2690 = vmatmul.mubr.msk.f32.vlgmr.msra.gmra.mxu1 %vm148_vm3, %v2680_v31 }
0x1bb6   :  { %v2691_v56 = vpop.f32.mrf.mxu1 }
0x1bb7   :  { %v1966_v62 = vadd.f32 %v2691_v56, %v2471_v15 }
0x1bb8   :  { %v1960_v41 = vpop.f32.mrf.mxu1 }
0x1bb9   :  { %v1961_v44 = vadd.f32 %v2471_v15, %v1960_v41  ;;  %v1970_v49 = vmax.f32 %v1966_v62, 0.0 }
0x1bbb   :  { %v1969_v61 = vmax.f32 %v1961_v44, 0.0 }
0x1bbd   :  { %2700 = vmatprep.mubr.msk.f32.mxu0 %vm148_vm3, %v1969_v61 }
0x1bbe   :  { %2701 = vmatmul.mubr.msk.f32.vlgmr.msra.gmra.mxu0 %vm148_vm3, %v1970_v49 }
0x1c7e   :  { %v2702_v6 = vpop.f32.mrf.mxu0 }
0x1c7f   :  { %v3605_v2 = vadd.f32 %v2702_v6, %v2474_v52 }
0x1c80   :  { %v2054_v45 = vpop.f32.mrf.mxu0 }
0x1c81   :  { %v3610_v42 = vadd.f32 %v2474_v52, %v2054_v45 }
0x1c83   :  { %v2071_v33 = vadd.f32 %v2477_v46, %v3610_v42  ;;  %v2121_v53 = vrot.slane %v3610_v42, 2  ;;  %v2156_v7 = vrot.slane %v3610_v42, 4  ;;  %v2191_v13 = vrot.slane %v3610_v42, 6 }
0x1c85   :  { %2085 = vperm.xlu1 %2734, %v2071_v33   ;;  %2074 = vperm.xlu0 %2733, %v2071_v33  }
0x1c89   :  { %2736 = vset.pattern.permute.xlu1 %v2926_v60  ;;  %2735 = vset.pattern.permute.xlu0 %v2927_v0 }
0x1c8a   :  { %2109 = vperm.xlu1 %2736, %v2071_v33   ;;  %2097 = vperm.xlu0 %2735, %v2071_v33  }
0x1c8e   :  { %2737 = vset.pattern.permute.xlu1 %v2918_v23  ;;  %2738 = vset.pattern.permute.xlu0 %v2925_v50 }
0x1d00   :  { %v2086_v40 = vpop.permute.xlu1 %2085  ;;  %v2075_v21 = vpop.permute.xlu0 %2074 }
0x1d01   :  { %v2081_v14 = vadd.f32 %v3621_v48, %v2075_v21  ;;  %v2092_v24 = vadd.f32 %v3623_v39, %v2086_v40 }
0x1d03   :  { %vm2082_vm12 = vcmp.gt.f32.partialorder %v2081_v14, -1e+30 }
0x1d04   :  { %v2083_v27 = vsel %vm2082_vm12, %v2081_v14, -1e+30 }
0x1d05   :  { %vm2093_vm13 = vcmp.gt.f32.partialorder %v2092_v24, %v2083_v27  ;;  %v2110_v4 = vpop.permute.xlu1 %2109  ;;  %v2098_v5 = vpop.permute.xlu0 %2097 }
0x1d06   :  { %v2094_v51 = vsel %vm2093_vm13, %v2092_v24, %v2083_v27  ;;  %v2104_v25 = vadd.f32 %v3626_v43, %v2098_v5  ;;  %v2116_v22 = vadd.f32 %v3629_v54, %v2110_v4  ;;  %v2095_v37 = vsel %vm2093_vm13, 1, %v2918_v23 }
0x1d08   :  { %vm2105_vm14 = vcmp.gt.f32.partialorder %v2104_v25, %v2094_v51 }
0x1d09   :  { %v2106_v47 = vsel %vm2105_vm14, %v2104_v25, %v2094_v51  ;;  %v2107_v28 = vsel %vm2105_vm14, 2, %v2095_v37 }
0x1d0a   :  { %vm2117_vm15 = vcmp.gt.f32.partialorder %v2116_v22, %v2106_v47 }
0x1d0b   :  { %v2118_v3 = vsel %vm2117_vm15, %v2116_v22, %v2106_v47  ;;  %v3635_v16 = vsel %vm2117_vm15, 3, %v2107_v28 }
0x1d0c   :  { %v2123_v58 = vadd.f32 %v2121_v53, %v2118_v3 }
0x1d0e   :  { %2133 = vperm.xlu0 %2738, %v2123_v58   ;;  %2126 = vperm.xlu1 %2737, %v2123_v58  }
0x1d12   :  { %2739 = vset.pattern.permute.xlu1 %v2927_v0  ;;  %2741 = vset.pattern.permute.xlu0 %v2918_v23 }
0x1d13   :  { %2141 = vperm.xlu1 %2739, %v2123_v58  }
0x1d17   :  { %2740 = vset.pattern.permute.xlu1 %v2926_v60 }
0x1d18   :  { %2149 = vperm.xlu1 %2740, %v2123_v58  }
0x1d1c   :  { %2742 = vset.pattern.permute.xlu1 %v2925_v50 }
0x1d89   :  { %v2134_v12 = vpop.permute.xlu0 %2133  ;;  %v2127_v30 = vpop.permute.xlu1 %2126 }
0x1d8a   :  { %v2129_v8 = vadd.f32 %v2127_v30, %v3621_v48  ;;  %v2136_v26 = vadd.f32 %v2134_v12, %v3623_v39 }
0x1d8c   :  { %vm2130_vm0 = vcmp.gt.f32.partialorder %v2129_v8, -1e+30 }
0x1d8d   :  { %v2131_v10 = vsel %vm2130_vm0, %v2129_v8, -1e+30 }
0x1d8e   :  { %vm2137_vm1 = vcmp.gt.f32.partialorder %v2136_v26, %v2131_v10  ;;  %v2142_v29 = vpop.permute.xlu1 %2141 }
0x1d8f   :  { %v2138_v32 = vsel %vm2137_vm1, %v2136_v26, %v2131_v10  ;;  %v2144_v34 = vadd.f32 %v2142_v29, %v3626_v43  ;;  %v2139_v35 = vsel %vm2137_vm1, 1, %v2918_v23 }
0x1d91   :  { %vm2145_vm2 = vcmp.gt.f32.partialorder %v2144_v34, %v2138_v32 }
0x1d92   :  { %v2147_v17 = vsel %vm2145_vm2, 2, %v2139_v35  ;;  %v2146_v31 = vsel %vm2145_vm2, %v2144_v34, %v2138_v32 }
0x1d93   :  { %v2150_v20 = vpop.permute.xlu1 %2149 }
0x1d94   :  { %v2152_v19 = vadd.f32 %v2150_v20, %v3629_v54  ;;  %v2260_v20 = vrot.slane %v3605_v2, 2 }
0x1d96   :  { %vm2153_vm3 = vcmp.gt.f32.partialorder %v2152_v19, %v2146_v31 }
0x1d97   :  { %v2154_v57 = vsel %vm2153_vm3, %v2152_v19, %v2146_v31  ;;  %v3647_v55 = vsel %vm2153_vm3, 3, %v2147_v17 }
0x1d98   :  { %v2158_v36 = vadd.f32 %v2156_v7, %v2154_v57 }
0x1d9a   :  { %2168 = vperm.xlu1 %2742, %v2158_v36   ;;  %2161 = vperm.xlu0 %2741, %v2158_v36  }
0x1d9e   :  { %2743 = vset.pattern.permute.xlu1 %v2927_v0  ;;  %2744 = vset.pattern.permute.xlu0 %v2926_v60 }
0x1d9f   :  { %2176 = vperm.xlu1 %2743, %v2158_v36   ;;  %2184 = vperm.xlu0 %2744, %v2158_v36  }
0x1da3   :  { %2745 = vset.pattern.permute.xlu1 %v2918_v23  ;;  %2747 = vset.pattern.permute.xlu0 %v2927_v0 }
0x1e15   :  { %v2169_v38 = vpop.permute.xlu1 %2168  ;;  %v2162_v15 = vpop.permute.xlu0 %2161 }
0x1e16   :  { %v2164_v56 = vadd.f32 %v2162_v15, %v3621_v48  ;;  %v2171_v62 = vadd.f32 %v2169_v38, %v3623_v39 }
0x1e18   :  { %vm2165_vm4 = vcmp.gt.f32.partialorder %v2164_v56, -1e+30 }
0x1e19   :  { %v2166_v41 = vsel %vm2165_vm4, %v2164_v56, -1e+30 }
0x1e1a   :  { %vm2172_vm5 = vcmp.gt.f32.partialorder %v2171_v62, %v2166_v41  ;;  %v2177_v44 = vpop.permute.xlu1 %2176  ;;  %v2185_v61 = vpop.permute.xlu0 %2184 }
0x1e1b   :  { %v2173_v49 = vsel %vm2172_vm5, %v2171_v62, %v2166_v41  ;;  %v2179_v52 = vadd.f32 %v2177_v44, %v3626_v43  ;;  %v2174_v6 = vsel %vm2172_vm5, 1, %v2918_v23  ;;  %v2187_v45 = vadd.f32 %v2185_v61, %v3629_v54 }
0x1e1d   :  { %vm2180_vm6 = vcmp.gt.f32.partialorder %v2179_v52, %v2173_v49 }
0x1e1e   :  { %v2182_v46 = vsel %vm2180_vm6, 2, %v2174_v6  ;;  %v2181_v33 = vsel %vm2180_vm6, %v2179_v52, %v2173_v49 }
0x1e1f   :  { %vm2188_vm7 = vcmp.gt.f32.partialorder %v2187_v45, %v2181_v33 }
0x1e20   :  { %v2189_v1 = vsel %vm2188_vm7, %v2187_v45, %v2181_v33  ;;  %v3659_v63 = vsel %vm2188_vm7, 3, %v2182_v46  ;;  %v2295_v45 = vrot.slane %v3605_v2, 4 }
0x1e21   :  { %v2193_v59 = vadd.f32 %v2191_v13, %v2189_v1 }
0x1e23   :  { %2211 = vperm.xlu0 %2747, %v2193_v59   ;;  %2196 = vperm.xlu1 %2745, %v2193_v59  }
0x1e27   :  { %2746 = vset.pattern.permute.xlu1 %v2925_v50  ;;  %2750 = vset.pattern.permute.xlu0 %v2925_v50 }
0x1e28   :  { %2203 = vperm.xlu1 %2746, %v2193_v59  }
0x1e2c   :  { %2748 = vset.pattern.permute.xlu1 %v2926_v60 }
0x1e2d   :  { %2219 = vperm.xlu1 %2748, %v2193_v59  }
0x1e31   :  { %2749 = vset.pattern.permute.xlu1 %v2918_v23 }
0x1e9e   :  { %v2197_v18 = vpop.permute.xlu1 %2196  ;;  %v2212_v40 = vpop.permute.xlu0 %2211 }
0x1e9f   :  { %v2199_v42 = vadd.f32 %v2197_v18, %v3621_v48  ;;  %v2214_v24 = vadd.f32 %v2212_v40, %v3626_v43 }
0x1ea1   :  { %vm2200_vm8 = vcmp.gt.f32.partialorder %v2199_v42, -1e+30 }
0x1ea2   :  { %v2201_v14 = vsel %vm2200_vm8, %v2199_v42, -1e+30  ;;  %vm2344_vm8 = vcmask 25600  }
0x1ea3   :  { %v2204_v21 = vpop.permute.xlu1 %2203 }
0x1ea4   :  { %v2206_v11 = vadd.f32 %v2204_v21, %v3623_v39 }
0x1ea6   :  { %vm2207_vm9 = vcmp.gt.f32.partialorder %v2206_v11, %v2201_v14 }
0x1ea7   :  { %v2208_v27 = vsel %vm2207_vm9, %v2206_v11, %v2201_v14  ;;  %v2209_v4 = vsel %vm2207_vm9, 1, %v2918_v23 }
0x1ea8   :  { %vm2215_vm10 = vcmp.gt.f32.partialorder %v2214_v24, %v2208_v27  ;;  %v2220_v5 = vpop.permute.xlu1 %2219 }
0x1ea9   :  { %v2216_v51 = vsel %vm2215_vm10, %v2214_v24, %v2208_v27  ;;  %v2217_v25 = vsel %vm2215_vm10, 2, %v2209_v4  ;;  %v2222_v22 = vadd.f32 %v2220_v5, %v3629_v54  ;;  %vm2354_vm10 = vcmask 58424  }
0x1eab   :  { %vm2223_vm11 = vcmp.gt.f32.partialorder %v2222_v22, %v2216_v51 }
0x1eac   :  { %v2224_v37 = vsel %vm2223_vm11, %v2222_v22, %v2216_v51  ;;  %v3670_v47 = vsel %vm2223_vm11, 3, %v2217_v25  ;;  %v3709_v22 = vand.u32 127, %v2077_v9 }
0x1ead   :  { %v2226_v28 = vadd.f32 %v2224_v37, %v3605_v2 }
0x1eaf   :  { %2236 = vperm.xlu0 %2750, %v2226_v28   ;;  %2229 = vperm.xlu1 %2749, %v2226_v28  }
0x1eb3   :  { %2751 = vset.pattern.permute.xlu1 %v2927_v0  ;;  %2753 = vset.pattern.permute.xlu0 %v2918_v23 }
0x1eb4   :  { %2244 = vperm.xlu1 %2751, %v2226_v28  }
0x1eb8   :  { %2752 = vset.pattern.permute.xlu1 %v2926_v60 }
0x1eb9   :  { %2252 = vperm.xlu1 %2752, %v2226_v28  }
0x1ebd   :  { %2754 = vset.pattern.permute.xlu1 %v2925_v50 }
0x1f2a   :  { %v2237_v53 = vpop.permute.xlu0 %2236  ;;  %v2230_v3 = vpop.permute.xlu1 %2229 }
0x1f2b   :  { %v2232_v58 = vadd.f32 %v2230_v3, %v3621_v48  ;;  %v2239_v12 = vadd.f32 %v2237_v53, %v3623_v39 }
0x1f2d   :  { %vm2233_vm12 = vcmp.gt.f32.partialorder %v2232_v58, -1e+30 }
0x1f2e   :  { %v2234_v30 = vsel %vm2233_vm12, %v2232_v58, -1e+30  ;;  %vm2363_vm12 = vcmask 50224  }
0x1f2f   :  { %vm2240_vm13 = vcmp.gt.f32.partialorder %v2239_v12, %v2234_v30  ;;  %v2245_v8 = vpop.permute.xlu1 %2244 }
0x1f30   :  { %v2241_v26 = vsel %vm2240_vm13, %v2239_v12, %v2234_v30  ;;  %v2247_v10 = vadd.f32 %v2245_v8, %v3626_v43  ;;  %v2242_v29 = vsel %vm2240_vm13, 1, %v2918_v23 }
0x1f32   :  { %vm2248_vm14 = vcmp.gt.f32.partialorder %v2247_v10, %v2241_v26 }
0x1f33   :  { %v2250_v32 = vsel %vm2248_vm14, 2, %v2242_v29  ;;  %v2249_v17 = vsel %vm2248_vm14, %v2247_v10, %v2241_v26  ;;  %vm2372_vm14 = vcmask 42024  }
0x1f34   :  { %v2253_v34 = vpop.permute.xlu1 %2252 }
0x1f35   :  { %v2255_v35 = vadd.f32 %v2253_v34, %v3629_v54 }
0x1f37   :  { %vm2256_vm15 = vcmp.gt.f32.partialorder %v2255_v35, %v2249_v17 }
0x1f38   :  { %v2257_v19 = vsel %vm2256_vm15, %v2255_v35, %v2249_v17  ;;  %v3683_v31 = vsel %vm2256_vm15, 3, %v2250_v32 }
0x1f39   :  { %v2262_v7 = vadd.f32 %v2260_v20, %v2257_v19  ;;  %v2375_v19 = vcvt.s32.f32 %v3683_v31 }
0x1f3b   :  { %2272 = vperm.xlu1 %2754, %v2262_v7   ;;  %2265 = vperm.xlu0 %2753, %v2262_v7  }
0x1f3f   :  { %2755 = vset.pattern.permute.xlu1 %v2927_v0  ;;  %2756 = vset.pattern.permute.xlu0 %v2926_v60 }
0x1f40   :  { %2280 = vperm.xlu1 %2755, %v2262_v7   ;;  %2288 = vperm.xlu0 %2756, %v2262_v7  }
0x1f44   :  { %2757 = vset.pattern.permute.xlu1 %v2918_v23  ;;  %2759 = vset.pattern.permute.xlu0 %v2927_v0 }
0x1fb6   :  { %v2273_v57 = vpop.permute.xlu1 %2272  ;;  %v2266_v36 = vpop.permute.xlu0 %2265 }
0x1fb7   :  { %v2268_v38 = vadd.f32 %v2266_v36, %v3621_v48  ;;  %v2275_v15 = vadd.f32 %v2273_v57, %v3623_v39 }
0x1fb9   :  { %vm2269_vm0 = vcmp.gt.f32.partialorder %v2268_v38, -1e+30 }
0x1fba   :  { %v2270_v56 = vsel %vm2269_vm0, %v2268_v38, -1e+30  ;;  %vm2381_vm0 = vcmask 33824  }
0x1fbb   :  { %vm2276_vm1 = vcmp.gt.f32.partialorder %v2275_v15, %v2270_v56  ;;  %v2281_v62 = vpop.permute.xlu1 %2280  ;;  %v2289_v41 = vpop.permute.xlu0 %2288 }
0x1fbc   :  { %v2277_v44 = vsel %vm2276_vm1, %v2275_v15, %v2270_v56  ;;  %v2283_v61 = vadd.f32 %v2281_v62, %v3626_v43  ;;  %v2278_v49 = vsel %vm2276_vm1, 1, %v2918_v23  ;;  %v2291_v52 = vadd.f32 %v2289_v41, %v3629_v54 }
0x1fbd   :  { %v2384_v56 = vcvt.s32.f32 %v3670_v47 }
0x1fbe   :  { %vm2284_vm2 = vcmp.gt.f32.partialorder %v2283_v61, %v2277_v44 }
0x1fbf   :  { %v2286_v0 = vsel %vm2284_vm2, 2, %v2278_v49  ;;  %v2285_v6 = vsel %vm2284_vm2, %v2283_v61, %v2277_v44  ;;  %vm2390_vm2 = vcmask 25624   ;;  %v2393_v49 = vcvt.s32.f32 %v3659_v63 }
0x1fc0   :  { %vm2292_vm3 = vcmp.gt.f32.partialorder %v2291_v52, %v2285_v6 }
0x1fc1   :  { %v2293_v46 = vsel %vm2292_vm3, %v2291_v52, %v2285_v6  ;;  %v2294_v33 = vsel %vm2292_vm3, 3, %v2286_v0 }
0x1fc2   :  { %v2297_v13 = vadd.f32 %v2295_v45, %v2293_v46  ;;  %v2366_v29 = vcvt.s32.f32 %v2294_v33  ;;  %v2402_v46 = vcvt.s32.f32 %v3647_v55 }
0x1fc4   :  { %2315 = vperm.xlu0 %2759, %v2297_v13   ;;  %2300 = vperm.xlu1 %2757, %v2297_v13  }
0x1fc8   :  { %2758 = vset.pattern.permute.xlu1 %v2925_v50  ;;  %2761 = vset.pattern.permute.xlu0 %v2926_v60 }
0x1fc9   :  { %2307 = vperm.xlu1 %2758, %v2297_v13  }
0x1fcd   :  { %2760 = vset.pattern.permute.xlu1 %v2926_v60 }
0x1fce   :  { %2323 = vperm.xlu1 %2760, %v2297_v13  }
0x203f   :  { %v2301_v1 = vpop.permute.xlu1 %2300  ;;  %v2316_v18 = vpop.permute.xlu0 %2315 }
0x2040   :  { %v2303_v59 = vadd.f32 %v2301_v1, %v3621_v48  ;;  %v2318_v11 = vadd.f32 %v2316_v18, %v3626_v43  ;;  %v2330_v48 = vrot.slane %v3605_v2, 6  ;;  %v2411_v18 = vcvt.s32.f32 %v3635_v16 }
0x2042   :  { %vm2304_vm4 = vcmp.gt.f32.partialorder %v2303_v59, -1e+30 }
0x2043   :  { %v2305_v21 = vsel %vm2304_vm4, %v2303_v59, -1e+30  ;;  %vm2399_vm4 = vcmask 17424  }
0x2044   :  { %v2308_v42 = vpop.permute.xlu1 %2307 }
0x2045   :  { %v2310_v40 = vadd.f32 %v2308_v42, %v3623_v39  ;;  %v2478_v39 = vld [vmem:[%s3747_s12] ss:$0 sm:$0xff]  ;;  %s2928_s12 = smov [#allocation3]  }
0x2046   :  { %s2425_s20 = sshll.u32 %s2928_s12, 4  ;;  %s2426_s20 = int_to_ptr.vmem [resolvable:$true] %s2425_s20 }
0x2047   :  { %vm2311_vm5 = vcmp.gt.f32.partialorder %v2310_v40, %v2305_v21  ;;  %s2894_s1 = scalar_lea.vmem %s2426_s20, 32  ;;  %p2899_p1 = scmp.lt.s32.totalorder %s2426_s20, %s2426_s20 }
0x2048   :  { %v2312_v14 = vsel %vm2311_vm5, %v2310_v40, %v2305_v21  ;;  %v2313_v50 = vsel %vm2311_vm5, 1, %v2918_v23  ;;  %p2895_p0 = scmp.ne.s32.totalorder %s2426_s20, %s2894_s1  ;;  %p2900_p2 = scmp.lt.s32.totalorder %s2894_s1, %s2894_s1 }
0x2049   :  { %vm2319_vm6 = vcmp.gt.f32.partialorder %v2318_v11, %v2312_v14  ;;  %v2324_v24 = vpop.permute.xlu1 %2323 }
0x204a   :  { %v2320_v27 = vsel %vm2319_vm6, %v2318_v11, %v2312_v14  ;;  %v2321_v60 = vsel %vm2319_vm6, 2, %v2313_v50  ;;  %v2326_v4 = vadd.f32 %v2324_v24, %v3629_v54  ;;  %v2343_v54 = vcvt.s32.f32 %v3709_v22  ;;  %p2901_p3 = por %p2900_p2, %p2899_p1 }
0x204b   :  { %vm2408_vm6 = vcmask 9224  }
0x204c   :  { %vm2327_vm7 = vcmp.gt.f32.partialorder %v2326_v4, %v2320_v27  ;;  %p2902_p4 = pnand %p2901_p3, %p2895_p0 }
0x204d   :  { %v2328_v5 = vsel %vm2327_vm7, %v2326_v4, %v2320_v27  ;;  %v2329_v51 = vsel %vm2327_vm7, 3, %v2321_v60 }
0x204e   :  { %v2332_v43 = vadd.f32 %v2330_v48, %v2328_v5  ;;  %v2357_v12 = vcvt.s32.f32 %v2329_v51 }
0x2050   :  { %v2340_v25 = vadd.f32 %v2478_v39, %v2332_v43 }
0x2052   :  { %v2345_v23 = vsel %vm2344_vm8, %v2340_v25, -inf }
0x2053   :  { %2346 = vmax.xlane.f32.xlu1 %v2345_v23 }
0x20dc   :  { %v2347_v37 = vpop.xlane.xlu1 %2346 }
0x20dd   :  { %vm2348_vm9 = vcmp.eq.f32.partialorder %v2340_v25, %v2347_v37 }
0x20de   :  { %v2349_v2 = vsel %vm2348_vm9, %v2343_v54, 4.0  ;;  %vm2417_vm9 = vcmask 1024  }
0x20df   :  { %v2350_v28 = vsel %vm2344_vm8, %v2349_v2, inf }
0x20e0   :  { %2351 = vmin.xlane.f32.xlu0 %v2350_v28 }
0x2169   :  { %v2352_v53 = vpop.xlane.xlu0 %2351 }
0x216a   :  { %v2703_v3 = vtrunc.f32 %v2352_v53 }
0x216c   :  { %v2704_v58 = vcvt.f32.s32 %v2703_v3 }
0x216e   :  { %2355 = vst.msk [vmem:[#allocation3] sm:$0x3] %vm2354_vm10, %v2704_v58  ;;  %vm2356_vm11 = vcmp.eq.s32.totalorder %v3709_v22, %v2704_v58 }
0x216f   :  { %v2358_v30 = vsel %vm2356_vm11, %v2357_v12, 0.0 }
0x2170   :  { %v2359_v9 = vsel %vm2344_vm8, %v2358_v30, 0.0 }
0x2171   :  { %2360 = vadd.xlane.f32.xlu0 %v2359_v9 }
0x21fa   :  { %v2361_v8 = vpop.xlane.xlu0 %2360 }
0x21fb   :  { %v2705_v26 = vtrunc.f32 %v2361_v8 }
0x21fd   :  { %v2706_v10 = vcvt.f32.s32 %v2705_v26 }
0x21ff   :  { %2364 = vst.msk [vmem:[#allocation3] sm:$0x3] %vm2363_vm12, %v2706_v10  ;;  %vm2365_vm13 = vcmp.eq.s32.totalorder %v3709_v22, %v2706_v10 }
0x2200   :  { %v2367_v32 = vsel %vm2365_vm13, %v2366_v29, 0.0 }
0x2201   :  { %v2368_v34 = vsel %vm2344_vm8, %v2367_v32, 0.0 }
0x2202   :  { %2369 = vadd.xlane.f32.xlu1 %v2368_v34 }
0x228b   :  { %v2370_v35 = vpop.xlane.xlu1 %2369 }
0x228c   :  { %v2707_v17 = vtrunc.f32 %v2370_v35 }
0x228e   :  { %v2708_v20 = vcvt.f32.s32 %v2707_v17 }
0x2290   :  { %2373 = vst.msk [vmem:[#allocation3] sm:$0x3] %vm2372_vm14, %v2708_v20  ;;  %vm2374_vm15 = vcmp.eq.s32.totalorder %v3709_v22, %v2708_v20 }
0x2291   :  { %v2376_v7 = vsel %vm2374_vm15, %v2375_v19, 0.0 }
0x2292   :  { %v2377_v57 = vsel %vm2344_vm8, %v2376_v7, 0.0 }
0x2293   :  { %2378 = vadd.xlane.f32.xlu0 %v2377_v57 }
0x231c   :  { %v2379_v36 = vpop.xlane.xlu0 %2378 }
0x231d   :  { %v2709_v38 = vtrunc.f32 %v2379_v36 }
0x231f   :  { %v2710_v15 = vcvt.f32.s32 %v2709_v38 }
0x2321   :  { %2382 = vst.msk [vmem:[#allocation3] sm:$0x3] %vm2381_vm0, %v2710_v15  ;;  %vm2383_vm1 = vcmp.eq.s32.totalorder %v3709_v22, %v2710_v15 }
0x2322   :  { %v2385_v62 = vsel %vm2383_vm1, %v2384_v56, 0.0 }
0x2323   :  { %v2386_v41 = vsel %vm2344_vm8, %v2385_v62, 0.0 }
0x2324   :  { %2387 = vadd.xlane.f32.xlu1 %v2386_v41 }
0x23ad   :  { %v2388_v31 = vpop.xlane.xlu1 %2387 }
0x23ae   :  { %v2711_v44 = vtrunc.f32 %v2388_v31 }
0x23b0   :  { %v2712_v61 = vcvt.f32.s32 %v2711_v44 }
0x23b2   :  { %2391 = vst.msk [vmem:[#allocation3] sm:$0x3] %vm2390_vm2, %v2712_v61  ;;  %vm2392_vm3 = vcmp.eq.s32.totalorder %v3709_v22, %v2712_v61 }
0x23b3   :  { %v2394_v52 = vsel %vm2392_vm3, %v2393_v49, 0.0 }
0x23b4   :  { %v2395_v0 = vsel %vm2344_vm8, %v2394_v52, 0.0 }
0x23b5   :  { %2396 = vadd.xlane.f32.xlu0 %v2395_v0 }
0x243e   :  { %v2397_v47 = vpop.xlane.xlu0 %2396 }
0x243f   :  { %v2713_v6 = vtrunc.f32 %v2397_v47 }
0x2441   :  { %v2714_v45 = vcvt.f32.s32 %v2713_v6 }
0x2443   :  { %2400 = vst.msk [vmem:[#allocation3] sm:$0x3] %vm2399_vm4, %v2714_v45  ;;  %vm2401_vm5 = vcmp.eq.s32.totalorder %v3709_v22, %v2714_v45 }
0x2444   :  { %v2403_v33 = vsel %vm2401_vm5, %v2402_v46, 0.0 }
0x2445   :  { %v2404_v13 = vsel %vm2344_vm8, %v2403_v33, 0.0 }
0x2446   :  { %2405 = vadd.xlane.f32.xlu1 %v2404_v13 }
0x24cf   :  { %v2406_v63 = vpop.xlane.xlu1 %2405 }
0x24d0   :  { %v2715_v1 = vtrunc.f32 %v2406_v63 }
0x24d2   :  { %v2716_v59 = vcvt.f32.s32 %v2715_v1 }
0x24d4   :  { %vm2410_vm7 = vcmp.eq.s32.totalorder %v3709_v22, %v2716_v59  ;;  %2409 = vst.msk [vmem:[#allocation3] sm:$0x3] %vm2408_vm6, %v2716_v59 }
0x24d5   :  { %v2412_v42 = vsel %vm2410_vm7, %v2411_v18, 0.0 }
0x24d6   :  { %v2413_v40 = vsel %vm2344_vm8, %v2412_v42, 0.0 }
0x24d7   :  { %2414 = vadd.xlane.f32.xlu0 %v2413_v40 }
0x2560   :  { %v2415_v55 = vpop.xlane.xlu0 %2414 }
0x2561   :  { %v2717_v21 = vtrunc.f32 %v2415_v55 }
0x2563   :  { %v2718_v11 = vcvt.f32.s32 %v2717_v21 }
0x2565   :  { %2418 = vst.msk [vmem:[#allocation3] sm:$0x3] %vm2417_vm9, %v2718_v11 }
0x2566   :  { %2905 = shalt.err (!%p2902_p4)
}
0x2567   :  { %2428 = dma.vmem_to_hbm [thread:$0]  %s2426_s20, 32, %s3748_s13, [#allocation4]  }
0x2568   :  { %2914 = dma.done.wait [#allocation4], 32  }
0x2569   :  { %2915 = vsyncadd [#allocation4], 4294967264 }
0x256a   :  { %2432 = vsyncpa [#allocation4], 1 }

</bundles_post_ra>
